<compile_context>
chip_gen: v7x
topology: tpu7x:2x2x1
jax: 0.10.0
libtpu: 0.0.40
codegen_flags: <defaults>
</compile_context>

<pallas_src>
import jax
import jax.numpy as jnp
import numpy as np
from jax.experimental import pallas as pl
from jax.experimental.pallas import tpu as pltpu


# ----------------------------------------------------------------------------
# Pallas kernel: one batch tile per grid step.
# ----------------------------------------------------------------------------
def _im_reward_kernel(
    # packed data (blocked on batch): [obs | obs_next | act | other_act | rew | pad]
    data_ref,
    # feature net
    wf_ref, bf_ref,
    # fused hidden layer (w1a|w2a|w3a along N, b1|b2|b3 along N)
    whid_ref, bhid_ref,
    # per-branch second-input weights
    w1b_ref, w2b_ref, w3b_ref,
    # heads
    w1o_ref, b1o_ref, w2o_ref, b2o_ref, w3o_ref, b3o_ref,
    # narrow lane-dense output slab: [fwd_loss | rew_loss | act_hat | pad]
    out_ref,
):
    f32 = jnp.float32
    tb = data_ref.shape[0]
    D = wf_ref.shape[0]                 # obs dim
    A, H = w1b_ref.shape                # action dim, hidden
    n_other = w3b_ref.shape[0] // A     # number of other agents

    def mm(a, w_ref):
        w = w_ref[...]
        return jnp.dot(a.astype(w.dtype), w, preferred_element_type=f32)

    # ---- unpack the lane-packed input slab (single dense load) ---------------
    data = data_ref[...]                                                # (tb, PACK_W) f32
    obs = data[:, 0:D]
    obsn = data[:, D:2 * D]
    ints = pltpu.bitcast(data[:, 2 * D:2 * D + 1 + n_other], jnp.int32)  # (tb, 1+n_other)
    act_i = ints[:, 0:1]                                                # (tb, 1)
    oth_i = ints[:, 1:1 + n_other]                                      # (tb, n_other)
    rew = data[:, 2 * D + 1 + n_other:2 * D + 2 + n_other]              # (tb, 1) f32

    # ---- feature net: two matmuls, shared RHS stays resident -----------------
    bf = bf_ref[...].astype(f32)
    phi1 = jnp.maximum(mm(obs, wf_ref) + bf, 0.0)                       # (tb, F)
    phi2 = jnp.maximum(mm(obsn, wf_ref) + bf, 0.0)                      # (tb, F)

    # ---- one-hot encodings built in-kernel (iota compare) --------------------
    iota_a = jax.lax.broadcasted_iota(jnp.int32, (tb, A), 1)
    act_oh = (iota_a == act_i).astype(f32)                              # (tb, A)

    iota_na = jax.lax.broadcasted_iota(jnp.int32, (tb, n_other * A), 1)
    oth_oh = jnp.zeros((tb, n_other * A), f32)
    for j in range(n_other):                                            # static, tiny
        col = oth_i[:, j:j + 1] + j * A                                 # (tb, 1)
        oth_oh = oth_oh + (iota_na == col).astype(f32)

    # ---- fused hidden layer: one (tb, 3H) matmul sharing LHS = phi1 ----------
    h_base = mm(phi1, whid_ref) + bhid_ref[...].astype(f32)             # (tb, 3H)
    h1 = jnp.maximum(h_base[:, 0 * H:1 * H] + mm(act_oh, w1b_ref), 0.0)
    h2 = jnp.maximum(h_base[:, 1 * H:2 * H] + mm(phi2, w2b_ref), 0.0)
    h3 = jnp.maximum(h_base[:, 2 * H:3 * H] + mm(oth_oh, w3b_ref), 0.0)

    # ---- heads ----------------------------------------------------------------
    phi2_hat = mm(h1, w1o_ref) + b1o_ref[...].astype(f32)               # (tb, F)
    act_hat = mm(h2, w2o_ref) + b2o_ref[...].astype(f32)                # (tb, A)
    # reward head (N=1): VPU multiply + lane reduce instead of an MXU matmul
    pred_rew = (jnp.sum(h3 * w3o_ref[...].astype(f32), axis=1, keepdims=True)
                + b3o_ref[...].astype(f32))                             # (tb, 1)

    # ---- losses (f32) ---------------------------------------------------------
    d = phi2_hat - phi2
    fwd_loss = 0.5 * jnp.sum(d * d, axis=1, keepdims=True)              # (tb, 1)
    rd = pred_rew - rew
    rew_loss = 0.5 * (rd * rd)                                          # (tb, 1)

    # ---- narrow output: write directly into lane slices (pad lanes untouched,
    #      sliced off in the wrapper) -------------------------------------------
    out_ref[:, 0:1] = fwd_loss
    out_ref[:, 1:2] = rew_loss
    out_ref[:, 2:2 + A] = act_hat


# ----------------------------------------------------------------------------
# Wrapper
# ----------------------------------------------------------------------------
_KPARAM_ORDER = ("wf", "bf", "whid", "bhid", "w1b", "w2b", "w3b",
                 "w1o", "b1o", "w2o", "b2o", "w3o_row", "b3o")


def _round_up(x, m):
    return ((x + m - 1) // m) * m


def _cdiv(a, b):
    return (a + b - 1) // b


def prepare_kernel_params(params, compute_dtype=jnp.float32):
    """One-time fusion of the three shared-LHS hidden-layer weights + dtype cast.

    bf16 weights are valid on every generation (v5e/v6e/v7x MXUs run bf16 at
    full rate); the kernel keeps all elementwise math, accumulation and losses
    in f32.
    """
    cdt = compute_dtype
    return {
        "wf": params["wf"].astype(cdt),
        "bf": params["bf"].astype(jnp.float32),
        "whid": jnp.concatenate([params["w1a"], params["w2a"], params["w3a"]],
                                axis=1).astype(cdt),
        "bhid": jnp.concatenate([params["b1"], params["b2"], params["b3"]],
                                axis=1).astype(jnp.float32),
        "w1b": params["w1b"].astype(cdt),
        "w2b": params["w2b"].astype(cdt),
        "w3b": params["w3b"].astype(cdt),
        "w1o": params["w1o"].astype(cdt),
        "b1o": params["b1o"].astype(jnp.float32),
        "w2o": params["w2o"].astype(cdt),
        "b2o": params["b2o"].astype(jnp.float32),
        "w3o_row": params["w3o"].T.astype(jnp.float32),   # (1, H) for VPU reduce
        "b3o": params["b3o"].astype(jnp.float32),
    }


def _pack_inputs(obs, obs_next, curr_act, prev_other_act, rew, b_pad):
    """Pack the five narrow inputs into one lane-contiguous f32 slab.

    Per-row layout: [obs (D) | obs_next (D) | act (1, i32 bits) |
                     other_act (n_other, i32 bits) | rew (1) | pad].
    One XLA pass (concat + pad fuse) replaces five per-input pad passes and lets
    the kernel issue a single dense DMA per grid step. Callers that can supply a
    pre-packed slab avoid even this pass.
    """
    B = obs.shape[0]
    as_f32_bits = lambda x: jax.lax.bitcast_convert_type(
        x.astype(jnp.int32), jnp.float32)
    packed = jnp.concatenate(
        [obs.astype(jnp.float32),
         obs_next.astype(jnp.float32),
         as_f32_bits(curr_act.reshape(-1, 1)),
         as_f32_bits(prev_other_act),
         rew.astype(jnp.float32).reshape(-1, 1)],
        axis=1)
    pack_w = _round_up(packed.shape[1], 8)
    packed = jnp.pad(packed, ((0, b_pad - B), (0, pack_w - packed.shape[1])))
    return packed


def im_reward_forward(obs, obs_next, curr_act, prev_other_act, rew, kparams,
                      *, action_dim, block_b=1024):
    """Returns (forward_mse_loss[B], rew_mse_loss[B], act_hat[B, action_dim])."""
    B = obs.shape[0]

    # Batch tile: big tiles amortize the ~0.35 us per-grid-step overhead, but
    # keep >=2 grid steps (pipeline depth; v7x splits the "parallel" axis over
    # its 2 TensorCores) and >=4 steps when that still leaves >=512-row tiles.
    sub = 8                                   # f32 data slab sublane packing
    tb = min(block_b, B)
    if B > sub:
        tb = min(tb, _cdiv(B, 2))
    if B >= 4 * 512:
        tb = min(tb, _cdiv(B, 4))
    tb = max(_round_up(tb, sub), sub)
    b_pad = _round_up(B, tb)
    nb = b_pad // tb

    data = _pack_inputs(obs, obs_next, curr_act, prev_other_act, rew, b_pad)
    weights = [kparams[k] for k in _KPARAM_ORDER]

    # narrow fused output: [fwd_loss | rew_loss | act_hat | pad]
    out_w = _round_up(2 + action_dim, 8)

    def weight_spec(w):
        # constant index_map -> weights stay VMEM-resident across grid steps
        return pl.BlockSpec(w.shape, lambda i: (0, 0))

    out = pl.pallas_call(
        _im_reward_kernel,
        grid=(nb,),
        in_specs=[pl.BlockSpec((tb, data.shape[1]), lambda i: (i, 0))]
                 + [weight_spec(w) for w in weights],
        out_specs=pl.BlockSpec((tb, out_w), lambda i: (i, 0)),
        out_shape=jax.ShapeDtypeStruct((b_pad, out_w), jnp.float32),
        compiler_params=pltpu.CompilerParams(
            dimension_semantics=("parallel",),
            vmem_limit_bytes=32 * 1024 * 1024,   # tiles are tiny; safe everywhere
        ),
    )(data, *weights)

    fwd_loss = out[:B, 0]
    rew_loss = out[:B, 1]
    act_hat = out[:B, 2:2 + action_dim]
    return fwd_loss, rew_loss, act_hat


# ----------------------------------------------------------------------------
# Deterministic parameter construction (PyTorch Linear-style uniform init).
# ----------------------------------------------------------------------------
def _linear_init(key, fan_in, fan_out):
    kw, kb = jax.random.split(key)
    bound = 1.0 / np.sqrt(fan_in)
    w = jax.random.uniform(kw, (fan_in, fan_out), jnp.float32, -bound, bound)
    b = jax.random.uniform(kb, (1, fan_out), jnp.float32, -bound, bound)
    return w, b


def make_params(key, obs_dim, feature_dim, action_dim, num_other_agents, hidden):
    keys = jax.random.split(key, 7)
    p = {}
    # feature net: Linear(obs_dim, feature_dim) + ReLU
    # TODO(synk): the PyTorch module takes an arbitrary feature_net; a concrete
    # Linear+ReLU is used here.
    p["wf"], p["bf"] = _linear_init(keys[0], obs_dim, feature_dim)

    # forward model: MLP(feature_dim + action_dim -> hidden -> feature_dim)
    w1, p["b1"] = _linear_init(keys[1], feature_dim + action_dim, hidden)
    p["w1a"], p["w1b"] = w1[:feature_dim], w1[feature_dim:]
    p["w1o"], p["b1o"] = _linear_init(keys[2], hidden, feature_dim)

    # inverse model: MLP(2*feature_dim -> hidden -> action_dim)
    w2, p["b2"] = _linear_init(keys[3], 2 * feature_dim, hidden)
    p["w2a"], p["w2b"] = w2[:feature_dim], w2[feature_dim:]
    p["w2o"], p["b2o"] = _linear_init(keys[4], hidden, action_dim)

    # reward model: MLP(feature_dim + n_agents*action_dim -> hidden -> 1)
    w3, p["b3"] = _linear_init(keys[5], feature_dim + num_other_agents * action_dim,
                               hidden)
    p["w3a"], p["w3b"] = w3[:feature_dim], w3[feature_dim:]
    p["w3o"], p["b3o"] = _linear_init(keys[6], hidden, 1)
    return p


# ----------------------------------------------------------------------------
# Pure-JAX reference (mirrors the PyTorch forward) for correctness checks.
# ----------------------------------------------------------------------------
def reference_forward(obs, obs_next, curr_act, prev_other_act, rew, p, *, action_dim):
    B = obs.shape[0]
    n_agents = prev_other_act.shape[1]
    relu = lambda x: jnp.maximum(x, 0.0)

    phi1 = relu(obs @ p["wf"] + p["bf"])
    phi2 = relu(obs_next @ p["wf"] + p["bf"])

    act_oh = jax.nn.one_hot(curr_act, action_dim, dtype=jnp.float32)
    x1 = jnp.concatenate([phi1, act_oh], axis=1)
    w1 = jnp.concatenate([p["w1a"], p["w1b"]], axis=0)
    phi2_hat = relu(x1 @ w1 + p["b1"]) @ p["w1o"] + p["b1o"]
    forward_mse_loss = 0.5 * jnp.sum((phi2_hat - phi2) ** 2, axis=1)

    x2 = jnp.concatenate([phi1, phi2], axis=1)
    w2 = jnp.concatenate([p["w2a"], p["w2b"]], axis=0)
    act_hat = relu(x2 @ w2 + p["b2"]) @ p["w2o"] + p["b2o"]

    oth_oh = jax.nn.one_hot(prev_other_act, action_dim,
                            dtype=jnp.float32).reshape(B, n_agents * action_dim)
    x3 = jnp.concatenate([phi1, oth_oh], axis=1)
    w3 = jnp.concatenate([p["w3a"], p["w3b"]], axis=0)
    pred_rew = relu(x3 @ w3 + p["b3"]) @ p["w3o"] + p["b3o"]
    rew_mse_loss = 0.5 * jnp.sum((pred_rew - rew.reshape(B, 1)) ** 2, axis=1)

    return forward_mse_loss, rew_mse_loss, act_hat


if __name__ == "__main__":
    # Small, module-consistent shapes; B chosen so the batch grid has 2 steps
    # (tile capping keeps >=2 grid steps for pipelining / the v7x 2-TC split).
    B = 512
    OBS_DIM = 16
    FEATURE_DIM = 32
    ACTION_DIM = 8
    N_OTHER_AGENTS = 3
    HIDDEN = 32

    key = jax.random.PRNGKey(0)
    k_obs, k_obsn, k_act, k_oth, k_rew, k_param = jax.random.split(key, 6)

    obs = jax.random.normal(k_obs, (B, OBS_DIM), jnp.float32)
    obs_next = jax.random.normal(k_obsn, (B, OBS_DIM), jnp.float32)
    curr_act = jax.random.randint(k_act, (B,), 0, ACTION_DIM)
    prev_other_act = jax.random.randint(k_oth, (B, N_OTHER_AGENTS), 0, ACTION_DIM)
    rew = jax.random.normal(k_rew, (B,), jnp.float32)

    params = make_params(k_param, OBS_DIM, FEATURE_DIM, ACTION_DIM,
                         N_OTHER_AGENTS, HIDDEN)
    ref_fwd, ref_rew, ref_act = reference_forward(
        obs, obs_next, curr_act, prev_other_act, rew, params,
        action_dim=ACTION_DIM)

    # ---- f32 weight path: exact check ----------------------------------------
    kp_f32 = prepare_kernel_params(params, compute_dtype=jnp.float32)
    fwd_loss, rew_loss, act_hat = im_reward_forward(
        obs, obs_next, curr_act, prev_other_act, rew, kp_f32,
        action_dim=ACTION_DIM)
    jax.block_until_ready((fwd_loss, rew_loss, act_hat))

    np.testing.assert_allclose(np.asarray(fwd_loss), np.asarray(ref_fwd),
                               rtol=1e-4, atol=1e-4)
    np.testing.assert_allclose(np.asarray(rew_loss), np.asarray(ref_rew),
                               rtol=1e-4, atol=1e-4)
    np.testing.assert_allclose(np.asarray(act_hat), np.asarray(ref_act),
                               rtol=1e-4, atol=1e-4)

    # ---- bf16 weight/matmul path (f32 accumulation & losses): loose check ----
    kp_bf16 = prepare_kernel_params(params, compute_dtype=jnp.bfloat16)
    fwd_b, rew_b, act_b = im_reward_forward(
        obs, obs_next, curr_act, prev_other_act, rew, kp_bf16,
        action_dim=ACTION_DIM)
    jax.block_until_ready((fwd_b, rew_b, act_b))

    np.testing.assert_allclose(np.asarray(fwd_b), np.asarray(ref_fwd),
                               rtol=5e-2, atol=5e-2)
    np.testing.assert_allclose(np.asarray(rew_b), np.asarray(ref_rew),
                               rtol=5e-2, atol=5e-2)
    np.testing.assert_allclose(np.asarray(act_b), np.asarray(ref_act),
                               rtol=5e-2, atol=5e-2)

    print("KERNEL_OK")
</pallas_src>

<mosaic_0001>
module attributes {stable_mosaic.version = 11 : i64} {
  func.func @_im_reward_kernel(%arg0: i32, %arg1: memref<256x40xf32, #tpu.memory_space<vmem>>, %arg2: memref<16x32xf32, #tpu.memory_space<vmem>>, %arg3: memref<1x32xf32, #tpu.memory_space<vmem>>, %arg4: memref<32x96xf32, #tpu.memory_space<vmem>>, %arg5: memref<1x96xf32, #tpu.memory_space<vmem>>, %arg6: memref<8x32xf32, #tpu.memory_space<vmem>>, %arg7: memref<32x32xf32, #tpu.memory_space<vmem>>, %arg8: memref<24x32xf32, #tpu.memory_space<vmem>>, %arg9: memref<32x32xf32, #tpu.memory_space<vmem>>, %arg10: memref<1x32xf32, #tpu.memory_space<vmem>>, %arg11: memref<32x8xf32, #tpu.memory_space<vmem>>, %arg12: memref<1x8xf32, #tpu.memory_space<vmem>>, %arg13: memref<1x32xf32, #tpu.memory_space<vmem>>, %arg14: memref<1x1xf32, #tpu.memory_space<vmem>>, %arg15: memref<256x16xf32, #tpu.memory_space<vmem>>) attributes {dimension_semantics = [#tpu.dimension_semantics<parallel>], iteration_bounds = array<i64: 2>, scalar_prefetch = 0 : i64, scratch_operands = 0 : i64, tpu.core_type = #tpu.core_type<tc>, window_params = [{transform_indices = @transform_0, window_bounds = array<i64: 256, 40>}, {pipeline_mode = #tpu.pipeline_mode<synchronous>, transform_indices = @transform_1, window_bounds = array<i64: 16, 32>}, {pipeline_mode = #tpu.pipeline_mode<synchronous>, transform_indices = @transform_2, window_bounds = array<i64: 1, 32>}, {pipeline_mode = #tpu.pipeline_mode<synchronous>, transform_indices = @transform_3, window_bounds = array<i64: 32, 96>}, {pipeline_mode = #tpu.pipeline_mode<synchronous>, transform_indices = @transform_4, window_bounds = array<i64: 1, 96>}, {pipeline_mode = #tpu.pipeline_mode<synchronous>, transform_indices = @transform_5, window_bounds = array<i64: 8, 32>}, {pipeline_mode = #tpu.pipeline_mode<synchronous>, transform_indices = @transform_6, window_bounds = array<i64: 32, 32>}, {pipeline_mode = #tpu.pipeline_mode<synchronous>, transform_indices = @transform_7, window_bounds = array<i64: 24, 32>}, {pipeline_mode = #tpu.pipeline_mode<synchronous>, transform_indices = @transform_8, window_bounds = array<i64: 32, 32>}, {pipeline_mode = #tpu.pipeline_mode<synchronous>, transform_indices = @transform_9, window_bounds = array<i64: 1, 32>}, {pipeline_mode = #tpu.pipeline_mode<synchronous>, transform_indices = @transform_10, window_bounds = array<i64: 32, 8>}, {pipeline_mode = #tpu.pipeline_mode<synchronous>, transform_indices = @transform_11, window_bounds = array<i64: 1, 8>}, {pipeline_mode = #tpu.pipeline_mode<synchronous>, transform_indices = @transform_12, window_bounds = array<i64: 1, 32>}, {pipeline_mode = #tpu.pipeline_mode<synchronous>, transform_indices = @transform_13, window_bounds = array<i64: 1, 1>}, {transform_indices = @transform_14, window_bounds = array<i64: 256, 16>}]} {
    %c0 = arith.constant 0 : index
    %c0_0 = arith.constant 0 : index
    %0 = vector.load %arg1[%c0, %c0_0] : memref<256x40xf32, #tpu.memory_space<vmem>>, vector<256x40xf32>
    %1 = vector.extract_strided_slice %0 {offsets = [0, 0], sizes = [256, 16], strides = [1, 1]} : vector<256x40xf32> to vector<256x16xf32>
    %2 = vector.extract_strided_slice %0 {offsets = [0, 16], sizes = [256, 16], strides = [1, 1]} : vector<256x40xf32> to vector<256x16xf32>
    %3 = vector.extract_strided_slice %0 {offsets = [0, 32], sizes = [256, 4], strides = [1, 1]} : vector<256x40xf32> to vector<256x4xf32>
    %4 = tpu.bitcast %3 : vector<256x4xf32> -> vector<256x4xi32>
    %5 = vector.extract_strided_slice %4 {offsets = [0, 0], sizes = [256, 1], strides = [1, 1]} : vector<256x4xi32> to vector<256x1xi32>
    %6 = vector.extract_strided_slice %4 {offsets = [0, 1], sizes = [256, 3], strides = [1, 1]} : vector<256x4xi32> to vector<256x3xi32>
    %7 = vector.extract_strided_slice %0 {offsets = [0, 36], sizes = [256, 1], strides = [1, 1]} : vector<256x40xf32> to vector<256x1xf32>
    %c0_1 = arith.constant 0 : index
    %c0_2 = arith.constant 0 : index
    %8 = vector.load %arg3[%c0_1, %c0_2] : memref<1x32xf32, #tpu.memory_space<vmem>>, vector<1x32xf32>
    %c0_3 = arith.constant 0 : index
    %c0_4 = arith.constant 0 : index
    %9 = vector.load %arg2[%c0_3, %c0_4] : memref<16x32xf32, #tpu.memory_space<vmem>>, vector<16x32xf32>
    %cst = arith.constant dense<0.000000e+00> : vector<256x32xf32>
    %10 = tpu.matmul %1, %9, %cst {dimension_numbers = #tpu.dot_dimension_numbers<[1], [0], [0], [1], [0, 0, 1, 1], [], []>} : vector<256x16xf32>, vector<16x32xf32>, vector<256x32xf32> -> vector<256x32xf32>
    %11 = vector.broadcast %8 : vector<1x32xf32> to vector<256x32xf32>
    %12 = arith.addf %10, %11 : vector<256x32xf32>
    %cst_5 = arith.constant 0.000000e+00 : f32
    %13 = vector.broadcast %cst_5 : f32 to vector<256x32xf32>
    %14 = arith.maximumf %12, %13 : vector<256x32xf32>
    %c0_6 = arith.constant 0 : index
    %c0_7 = arith.constant 0 : index
    %15 = vector.load %arg2[%c0_6, %c0_7] : memref<16x32xf32, #tpu.memory_space<vmem>>, vector<16x32xf32>
    %cst_8 = arith.constant dense<0.000000e+00> : vector<256x32xf32>
    %16 = tpu.matmul %2, %15, %cst_8 {dimension_numbers = #tpu.dot_dimension_numbers<[1], [0], [0], [1], [0, 0, 1, 1], [], []>} : vector<256x16xf32>, vector<16x32xf32>, vector<256x32xf32> -> vector<256x32xf32>
    %17 = vector.broadcast %8 : vector<1x32xf32> to vector<256x32xf32>
    %18 = arith.addf %16, %17 : vector<256x32xf32>
    %cst_9 = arith.constant 0.000000e+00 : f32
    %19 = vector.broadcast %cst_9 : f32 to vector<256x32xf32>
    %20 = arith.maximumf %18, %19 : vector<256x32xf32>
    %21 = tpu.iota {dimensions = array<i32: 1>} : vector<256x8xi32>
    %22 = vector.broadcast %5 : vector<256x1xi32> to vector<256x8xi32>
    %23 = arith.cmpi eq, %21, %22 : vector<256x8xi32>
    %24 = arith.extui %23 : vector<256x8xi1> to vector<256x8xi32>
    %25 = arith.sitofp %24 : vector<256x8xi32> to vector<256x8xf32>
    %26 = tpu.iota {dimensions = array<i32: 1>} : vector<256x24xi32>
    %cst_10 = arith.constant 0.000000e+00 : f32
    %27 = vector.broadcast %cst_10 : f32 to vector<256x24xf32>
    %28 = vector.extract_strided_slice %6 {offsets = [0, 0], sizes = [256, 1], strides = [1, 1]} : vector<256x3xi32> to vector<256x1xi32>
    %c0_i32 = arith.constant 0 : i32
    %29 = vector.broadcast %c0_i32 : i32 to vector<256x1xi32>
    %30 = arith.addi %28, %29 : vector<256x1xi32>
    %31 = vector.broadcast %30 : vector<256x1xi32> to vector<256x24xi32>
    %32 = arith.cmpi eq, %26, %31 : vector<256x24xi32>
    %33 = arith.extui %32 : vector<256x24xi1> to vector<256x24xi32>
    %34 = arith.sitofp %33 : vector<256x24xi32> to vector<256x24xf32>
    %35 = arith.addf %27, %34 : vector<256x24xf32>
    %36 = vector.extract_strided_slice %6 {offsets = [0, 1], sizes = [256, 1], strides = [1, 1]} : vector<256x3xi32> to vector<256x1xi32>
    %c8_i32 = arith.constant 8 : i32
    %37 = vector.broadcast %c8_i32 : i32 to vector<256x1xi32>
    %38 = arith.addi %36, %37 : vector<256x1xi32>
    %39 = vector.broadcast %38 : vector<256x1xi32> to vector<256x24xi32>
    %40 = arith.cmpi eq, %26, %39 : vector<256x24xi32>
    %41 = arith.extui %40 : vector<256x24xi1> to vector<256x24xi32>
    %42 = arith.sitofp %41 : vector<256x24xi32> to vector<256x24xf32>
    %43 = arith.addf %35, %42 : vector<256x24xf32>
    %44 = vector.extract_strided_slice %6 {offsets = [0, 2], sizes = [256, 1], strides = [1, 1]} : vector<256x3xi32> to vector<256x1xi32>
    %c16_i32 = arith.constant 16 : i32
    %45 = vector.broadcast %c16_i32 : i32 to vector<256x1xi32>
    %46 = arith.addi %44, %45 : vector<256x1xi32>
    %47 = vector.broadcast %46 : vector<256x1xi32> to vector<256x24xi32>
    %48 = arith.cmpi eq, %26, %47 : vector<256x24xi32>
    %49 = arith.extui %48 : vector<256x24xi1> to vector<256x24xi32>
    %50 = arith.sitofp %49 : vector<256x24xi32> to vector<256x24xf32>
    %51 = arith.addf %43, %50 : vector<256x24xf32>
    %c0_11 = arith.constant 0 : index
    %c0_12 = arith.constant 0 : index
    %52 = vector.load %arg4[%c0_11, %c0_12] : memref<32x96xf32, #tpu.memory_space<vmem>>, vector<32x96xf32>
    %cst_13 = arith.constant dense<0.000000e+00> : vector<256x96xf32>
    %53 = tpu.matmul %14, %52, %cst_13 {dimension_numbers = #tpu.dot_dimension_numbers<[1], [0], [0], [1], [0, 0, 1, 1], [], []>} : vector<256x32xf32>, vector<32x96xf32>, vector<256x96xf32> -> vector<256x96xf32>
    %c0_14 = arith.constant 0 : index
    %c0_15 = arith.constant 0 : index
    %54 = vector.load %arg5[%c0_14, %c0_15] : memref<1x96xf32, #tpu.memory_space<vmem>>, vector<1x96xf32>
    %55 = vector.broadcast %54 : vector<1x96xf32> to vector<256x96xf32>
    %56 = arith.addf %53, %55 : vector<256x96xf32>
    %57 = vector.extract_strided_slice %56 {offsets = [0, 0], sizes = [256, 32], strides = [1, 1]} : vector<256x96xf32> to vector<256x32xf32>
    %c0_16 = arith.constant 0 : index
    %c0_17 = arith.constant 0 : index
    %58 = vector.load %arg6[%c0_16, %c0_17] : memref<8x32xf32, #tpu.memory_space<vmem>>, vector<8x32xf32>
    %cst_18 = arith.constant dense<0.000000e+00> : vector<256x32xf32>
    %59 = tpu.matmul %25, %58, %cst_18 {dimension_numbers = #tpu.dot_dimension_numbers<[1], [0], [0], [1], [0, 0, 1, 1], [], []>} : vector<256x8xf32>, vector<8x32xf32>, vector<256x32xf32> -> vector<256x32xf32>
    %60 = arith.addf %57, %59 : vector<256x32xf32>
    %cst_19 = arith.constant 0.000000e+00 : f32
    %61 = vector.broadcast %cst_19 : f32 to vector<256x32xf32>
    %62 = arith.maximumf %60, %61 : vector<256x32xf32>
    %63 = vector.extract_strided_slice %56 {offsets = [0, 32], sizes = [256, 32], strides = [1, 1]} : vector<256x96xf32> to vector<256x32xf32>
    %c0_20 = arith.constant 0 : index
    %c0_21 = arith.constant 0 : index
    %64 = vector.load %arg7[%c0_20, %c0_21] : memref<32x32xf32, #tpu.memory_space<vmem>>, vector<32x32xf32>
    %cst_22 = arith.constant dense<0.000000e+00> : vector<256x32xf32>
    %65 = tpu.matmul %20, %64, %cst_22 {dimension_numbers = #tpu.dot_dimension_numbers<[1], [0], [0], [1], [0, 0, 1, 1], [], []>} : vector<256x32xf32>, vector<32x32xf32>, vector<256x32xf32> -> vector<256x32xf32>
    %66 = arith.addf %63, %65 : vector<256x32xf32>
    %cst_23 = arith.constant 0.000000e+00 : f32
    %67 = vector.broadcast %cst_23 : f32 to vector<256x32xf32>
    %68 = arith.maximumf %66, %67 : vector<256x32xf32>
    %69 = vector.extract_strided_slice %56 {offsets = [0, 64], sizes = [256, 32], strides = [1, 1]} : vector<256x96xf32> to vector<256x32xf32>
    %c0_24 = arith.constant 0 : index
    %c0_25 = arith.constant 0 : index
    %70 = vector.load %arg8[%c0_24, %c0_25] : memref<24x32xf32, #tpu.memory_space<vmem>>, vector<24x32xf32>
    %cst_26 = arith.constant dense<0.000000e+00> : vector<256x32xf32>
    %71 = tpu.matmul %51, %70, %cst_26 {dimension_numbers = #tpu.dot_dimension_numbers<[1], [0], [0], [1], [0, 0, 1, 1], [], []>} : vector<256x24xf32>, vector<24x32xf32>, vector<256x32xf32> -> vector<256x32xf32>
    %72 = arith.addf %69, %71 : vector<256x32xf32>
    %cst_27 = arith.constant 0.000000e+00 : f32
    %73 = vector.broadcast %cst_27 : f32 to vector<256x32xf32>
    %74 = arith.maximumf %72, %73 : vector<256x32xf32>
    %c0_28 = arith.constant 0 : index
    %c0_29 = arith.constant 0 : index
    %75 = vector.load %arg9[%c0_28, %c0_29] : memref<32x32xf32, #tpu.memory_space<vmem>>, vector<32x32xf32>
    %cst_30 = arith.constant dense<0.000000e+00> : vector<256x32xf32>
    %76 = tpu.matmul %62, %75, %cst_30 {dimension_numbers = #tpu.dot_dimension_numbers<[1], [0], [0], [1], [0, 0, 1, 1], [], []>} : vector<256x32xf32>, vector<32x32xf32>, vector<256x32xf32> -> vector<256x32xf32>
    %c0_31 = arith.constant 0 : index
    %c0_32 = arith.constant 0 : index
    %77 = vector.load %arg10[%c0_31, %c0_32] : memref<1x32xf32, #tpu.memory_space<vmem>>, vector<1x32xf32>
    %78 = vector.broadcast %77 : vector<1x32xf32> to vector<256x32xf32>
    %79 = arith.addf %76, %78 : vector<256x32xf32>
    %c0_33 = arith.constant 0 : index
    %c0_34 = arith.constant 0 : index
    %80 = vector.load %arg11[%c0_33, %c0_34] : memref<32x8xf32, #tpu.memory_space<vmem>>, vector<32x8xf32>
    %cst_35 = arith.constant dense<0.000000e+00> : vector<256x8xf32>
    %81 = tpu.matmul %68, %80, %cst_35 {dimension_numbers = #tpu.dot_dimension_numbers<[1], [0], [0], [1], [0, 0, 1, 1], [], []>} : vector<256x32xf32>, vector<32x8xf32>, vector<256x8xf32> -> vector<256x8xf32>
    %c0_36 = arith.constant 0 : index
    %c0_37 = arith.constant 0 : index
    %82 = vector.load %arg12[%c0_36, %c0_37] : memref<1x8xf32, #tpu.memory_space<vmem>>, vector<1x8xf32>
    %83 = vector.broadcast %82 : vector<1x8xf32> to vector<256x8xf32>
    %84 = arith.addf %81, %83 : vector<256x8xf32>
    %c0_38 = arith.constant 0 : index
    %c0_39 = arith.constant 0 : index
    %85 = vector.load %arg13[%c0_38, %c0_39] : memref<1x32xf32, #tpu.memory_space<vmem>>, vector<1x32xf32>
    %86 = vector.broadcast %85 : vector<1x32xf32> to vector<256x32xf32>
    %87 = arith.mulf %74, %86 : vector<256x32xf32>
    %cst_40 = arith.constant dense<0.000000e+00> : vector<256xf32>
    %88 = vector.multi_reduction <add>, %87, %cst_40 [1] : vector<256x32xf32> to vector<256xf32>
    %89 = vector.shape_cast %88 : vector<256xf32> to vector<256x1xf32>
    %c0_41 = arith.constant 0 : index
    %c0_42 = arith.constant 0 : index
    %90 = vector.load %arg14[%c0_41, %c0_42] : memref<1x1xf32, #tpu.memory_space<vmem>>, vector<1x1xf32>
    %91 = vector.broadcast %90 : vector<1x1xf32> to vector<256x1xf32>
    %92 = arith.addf %89, %91 : vector<256x1xf32>
    %93 = arith.subf %79, %20 : vector<256x32xf32>
    %94 = arith.mulf %93, %93 : vector<256x32xf32>
    %cst_43 = arith.constant dense<0.000000e+00> : vector<256xf32>
    %95 = vector.multi_reduction <add>, %94, %cst_43 [1] : vector<256x32xf32> to vector<256xf32>
    %96 = vector.shape_cast %95 : vector<256xf32> to vector<256x1xf32>
    %cst_44 = arith.constant 5.000000e-01 : f32
    %97 = vector.broadcast %cst_44 : f32 to vector<256x1xf32>
    %98 = arith.mulf %97, %96 : vector<256x1xf32>
    %99 = arith.subf %92, %7 : vector<256x1xf32>
    %100 = arith.mulf %99, %99 : vector<256x1xf32>
    %cst_45 = arith.constant 5.000000e-01 : f32
    %101 = vector.broadcast %cst_45 : f32 to vector<256x1xf32>
    %102 = arith.mulf %101, %100 : vector<256x1xf32>
    %c0_46 = arith.constant 0 : index
    %c0_47 = arith.constant 0 : index
    %103 = vector.load %arg15[%c0_46, %c0_47] : memref<256x16xf32, #tpu.memory_space<vmem>>, vector<256x1xf32>
    tpu.vector_store %arg15[%c0_46, %c0_47], %98 {strides = array<i32>} : memref<256x16xf32, #tpu.memory_space<vmem>>, vector<256x1xf32>,
    %c0_48 = arith.constant 0 : index
    %c1 = arith.constant 1 : index
    %104 = vector.load %arg15[%c0_48, %c1] : memref<256x16xf32, #tpu.memory_space<vmem>>, vector<256x1xf32>
    tpu.vector_store %arg15[%c0_48, %c1], %102 {strides = array<i32>} : memref<256x16xf32, #tpu.memory_space<vmem>>, vector<256x1xf32>,
    %c0_49 = arith.constant 0 : index
    %c2 = arith.constant 2 : index
    %105 = vector.load %arg15[%c0_49, %c2] : memref<256x16xf32, #tpu.memory_space<vmem>>, vector<256x8xf32>
    tpu.vector_store %arg15[%c0_49, %c2], %84 {strides = array<i32>} : memref<256x16xf32, #tpu.memory_space<vmem>>, vector<256x8xf32>,
    return
  }
  func.func @transform_0(%arg0: i32) -> (i32, i32) {
    %c0_i32 = arith.constant 0 : i32
    %c0_i32_0 = arith.constant 0 : i32
    return %arg0, %c0_i32 : i32, i32
  }
  func.func @transform_1(%arg0: i32) -> (i32, i32) {
    %c0_i32 = arith.constant 0 : i32
    %c0_i32_0 = arith.constant 0 : i32
    %c0_i32_1 = arith.constant 0 : i32
    return %c0_i32, %c0_i32_0 : i32, i32
  }
  func.func @transform_2(%arg0: i32) -> (i32, i32) {
    %c0_i32 = arith.constant 0 : i32
    %c0_i32_0 = arith.constant 0 : i32
    %c0_i32_1 = arith.constant 0 : i32
    return %c0_i32, %c0_i32_0 : i32, i32
  }
  func.func @transform_3(%arg0: i32) -> (i32, i32) {
    %c0_i32 = arith.constant 0 : i32
    %c0_i32_0 = arith.constant 0 : i32
    %c0_i32_1 = arith.constant 0 : i32
    return %c0_i32, %c0_i32_0 : i32, i32
  }
  func.func @transform_4(%arg0: i32) -> (i32, i32) {
    %c0_i32 = arith.constant 0 : i32
    %c0_i32_0 = arith.constant 0 : i32
    %c0_i32_1 = arith.constant 0 : i32
    return %c0_i32, %c0_i32_0 : i32, i32
  }
  func.func @transform_5(%arg0: i32) -> (i32, i32) {
    %c0_i32 = arith.constant 0 : i32
    %c0_i32_0 = arith.constant 0 : i32
    %c0_i32_1 = arith.constant 0 : i32
    return %c0_i32, %c0_i32_0 : i32, i32
  }
  func.func @transform_6(%arg0: i32) -> (i32, i32) {
    %c0_i32 = arith.constant 0 : i32
    %c0_i32_0 = arith.constant 0 : i32
    %c0_i32_1 = arith.constant 0 : i32
    return %c0_i32, %c0_i32_0 : i32, i32
  }
  func.func @transform_7(%arg0: i32) -> (i32, i32) {
    %c0_i32 = arith.constant 0 : i32
    %c0_i32_0 = arith.constant 0 : i32
    %c0_i32_1 = arith.constant 0 : i32
    return %c0_i32, %c0_i32_0 : i32, i32
  }
  func.func @transform_8(%arg0: i32) -> (i32, i32) {
    %c0_i32 = arith.constant 0 : i32
    %c0_i32_0 = arith.constant 0 : i32
    %c0_i32_1 = arith.constant 0 : i32
    return %c0_i32, %c0_i32_0 : i32, i32
  }
  func.func @transform_9(%arg0: i32) -> (i32, i32) {
    %c0_i32 = arith.constant 0 : i32
    %c0_i32_0 = arith.constant 0 : i32
    %c0_i32_1 = arith.constant 0 : i32
    return %c0_i32, %c0_i32_0 : i32, i32
  }
  func.func @transform_10(%arg0: i32) -> (i32, i32) {
    %c0_i32 = arith.constant 0 : i32
    %c0_i32_0 = arith.constant 0 : i32
    %c0_i32_1 = arith.constant 0 : i32
    return %c0_i32, %c0_i32_0 : i32, i32
  }
  func.func @transform_11(%arg0: i32) -> (i32, i32) {
    %c0_i32 = arith.constant 0 : i32
    %c0_i32_0 = arith.constant 0 : i32
    %c0_i32_1 = arith.constant 0 : i32
    return %c0_i32, %c0_i32_0 : i32, i32
  }
  func.func @transform_12(%arg0: i32) -> (i32, i32) {
    %c0_i32 = arith.constant 0 : i32
    %c0_i32_0 = arith.constant 0 : i32
    %c0_i32_1 = arith.constant 0 : i32
    return %c0_i32, %c0_i32_0 : i32, i32
  }
  func.func @transform_13(%arg0: i32) -> (i32, i32) {
    %c0_i32 = arith.constant 0 : i32
    %c0_i32_0 = arith.constant 0 : i32
    %c0_i32_1 = arith.constant 0 : i32
    return %c0_i32, %c0_i32_0 : i32, i32
  }
  func.func @transform_14(%arg0: i32) -> (i32, i32) {
    %c0_i32 = arith.constant 0 : i32
    %c0_i32_0 = arith.constant 0 : i32
    return %arg0, %c0_i32 : i32, i32
  }
}

</mosaic_0001>

<bundles_post_ra>
// kernel: tpu_custom_call.1
= control target key start
LH: loop header
LB: loop body
LE: loop exit
PB: predicated region body
PF: predicated region fallthrough
CT: control target
= control target key end

     0   :  { %s7112_s15 = smov 0   ;;  %s10325_s0 = inlined_call_operand.vmem [shape: f32[512,40], index: 0, kind: input, shape index: {}]   ;;  %s10326_s1 = inlined_call_operand.vmem [shape: f32[16,32], index: 1, kind: input, shape index: {}]   ;;  %s10327_s2 = inlined_call_operand.vmem [shape: f32[1,32], index: 2, kind: input, shape index: {}]   ;;  %s10328_s3 = inlined_call_operand.vmem [shape: f32[32,96], index: 3, kind: input, shape index: {}]   ;;  %s10329_s4 = inlined_call_operand.vmem [shape: f32[1,96], index: 4, kind: input, shape index: {}]   ;;  %s10330_s5 = inlined_call_operand.vmem [shape: f32[8,32], index: 5, kind: input, shape index: {}]   ;;  %s10331_s6 = inlined_call_operand.vmem [shape: f32[32,32], index: 6, kind: input, shape index: {}]   ;;  %s10332_s7 = inlined_call_operand.vmem [shape: f32[24,32], index: 7, kind: input, shape index: {}]   ;;  %s10333_s8 = inlined_call_operand.vmem [shape: f32[32,32], index: 8, kind: input, shape index: {}]   ;;  %s10334_s9 = inlined_call_operand.vmem [shape: f32[1,32], index: 9, kind: input, shape index: {}]   ;;  %s10335_s10 = inlined_call_operand.vmem [shape: f32[32,8], index: 10, kind: input, shape index: {}]   ;;  %s10336_s11 = inlined_call_operand.vmem [shape: f32[1,8], index: 11, kind: input, shape index: {}]   ;;  %s10337_s12 = inlined_call_operand.vmem [shape: f32[1,32], index: 12, kind: input, shape index: {}]   ;;  %s10338_s13 = inlined_call_operand.<no memory space> [shape: f32[1,1], index: 13, kind: input, shape index: {}]   ;;  %s10339_s14 = inlined_call_operand.vmem [shape: f32[512,16], index: 14, kind: output, shape index: {}]  }
   0x1   :  { %v19_v0 = vstv %s10338_s13 }
   0x2   :  { %20 = vst [vmem:[#allocation2] sm:$0x1] %v19_v0 }
   0x3 LB: > { %s5764_s16 = sadd.s32 4294967295, %s7020_s15   ;;  %p5768_p0 = scmp.ge.s32.totalorder %s7020_s15, 1  ;;  %s7020_s15 = sphi %s7112_s15, %s26_s15  }
   0x4   : > { %p415_p1 = scmp.lt.s32.totalorder %s7020_s15, 3 }
   0x6   : > { %p416_p2 = pnand %p5768_p0, %p415_p1 }
   0x8   : > { %419 = sbr.rel (%p416_p2) target bundleno = 2221 (0x8ad), region = 76 }
   0xf   : > { %v538_v1 = vld [vmem:[%s10326_s1] sm:$0xff]  ;;  %v539_v2 = vld [vmem:[%s10326_s1 + $0x8] sm:$0xff]  ;;  %s5769_s20 = sshll.u32 %s5764_s16, 5  ;;  %v7022_v4 = vmov 32   ;;  %vm546_vm0 = vcmask 130048   ;;  %s7023_s25 = smov 112  }
  0x10   : > { %v6877_v3 = vpack.c.bf16 %v539_v2, %v538_v1  ;;  %p462_p3 = scmp.lt.s32.totalorder %s5769_s20, 63  ;;  %6942 = vset.pattern.permute.xlu1 %v7022_v4  ;;  %6941 = vset.pattern.permute.xlu0 %v7022_v4  ;;  %v2516_v37 = vld [vmem:[%s10330_s5] sm:$0xff]  ;;  %v2184_v39 = vld [vmem:[%s10328_s3 + $0x8] sm:$0xff]  ;;  %v2185_v41 = vld [vmem:[%s10328_s3 + $0x10] sm:$0xff]  ;;  %v7024_v52 = vmov 33   ;;  %vm2517_vm1 = vcmask 64512  }
  0x11   : > { %v2183_v38 = vld [vmem:[%s10328_s3] sm:$0xff]  ;;  %v2186_v42 = vld [vmem:[%s10328_s3 + $0x18] sm:$0xff]  ;;  %s7028_s27 = smov 64   ;;  %s7029_s30 = smov 32  }
  0x12   : > { %6878 = vmatprep.subr.bf16.mxu0 %v6877_v3  ;;  %s10732_s20 = smov (!%p462_p3, %s5769_s20), 63  ;;  %6882 = vmatprep.subr.bf16.mxu1 %v6877_v3  ;;  %v6885_v40 = vpack.c.bf16 %v2184_v39, %v2183_v38  ;;  %v6889_v43 = vpack.c.bf16 %v2186_v42, %v2185_v41  ;;  %s7030_s26 = smov 96  }
  0x13   : > { %6880 = vmatpush3.bf16.msra.mxu0 %v6877_v3  ;;  %6884 = vmatpush3.bf16.msra.mxu1 %v6877_v3  ;;  %s5770_s21 = sshll.u32 %s10732_s20, 3  ;;  %s7031_s20 = smov 92  }
  0x14   : > { %s7134_s24 = scalar_lea.vmem %s10325_s0, %s5770_s21  ;;  %6605 = vmatprep.subr.mxu1 %v2516_v37  ;;  %6886 = vmatprep.subr.bf16.mxu0 %v6885_v40  ;;  %s9473_s29 = scalar_lea.vmem %s10339_s14, %s5770_s21 }
  0x15   : > { %v7137_v5 = vld [vmem:[%s7134_s24 + $0x10] sm:$0xff]  ;;  %v7140_v6 = vld [vmem:[%s7134_s24] sm:$0xff]  ;;  %v7143_v7 = vld [vmem:[%s7134_s24 + $0x8] sm:$0xff]  ;;  %s7032_s21 = smov 1   ;;  %s7033_s16 = smov 2  }
  0x16   : > { %872 = vrot.lane.b32.xlu1 %v7137_v5, %s7023_s25  ;;  %868 = vrot.lane.b32.xlu0 %v7140_v6, %s7023_s25  ;;  %v7152_v8 = vld [vmem:[%s7134_s24 + $0x18] sm:$0xff]  ;;  %v7163_v9 = vld [vmem:[%s7134_s24 + $0x20] sm:$0xff] }
  0x17   : > { %6449 = vmatprep.mubr.msk.f32.mxu0 %vm546_vm0, %v7140_v6  ;;  %v7166_v10 = vld [vmem:[%s7134_s24 + $0x28] sm:$0xff]  ;;  %v7177_v11 = vld [vmem:[%s7134_s24 + $0x30] sm:$0xff]  ;;  %v7180_v12 = vld [vmem:[%s7134_s24 + $0x38] sm:$0xff] }
  0x18   : > { %6450 = vmatmul.mubr.msk.f32.vlgmr.msra.gmra.mrb[0].mxu0 %vm546_vm0, %v7143_v7  ;;  %v7191_v13 = vld [vmem:[%s7134_s24 + $0x40] sm:$0xff]  ;;  %v7194_v14 = vld [vmem:[%s7134_s24 + $0x48] sm:$0xff]  ;;  %v7205_v15 = vld [vmem:[%s7134_s24 + $0x50] sm:$0xff] }
  0x19   : > { %6452 = vmatprep.mubr.msk.f32.mxu0 %vm546_vm0, %v7137_v5  ;;  %v7208_v16 = vld [vmem:[%s7134_s24 + $0x58] sm:$0xff]  ;;  %v7219_v17 = vld [vmem:[%s7134_s24 + $0x60] sm:$0xff]  ;;  %v7222_v18 = vld [vmem:[%s7134_s24 + $0x68] sm:$0xff]  ;;  %6888 = vmatpush3.bf16.msra.mxu0 %v6885_v40 }
  0x1a   : > { %874 = vrot.lane.b32.xlu1 %v7152_v8, %s7023_s25  ;;  %870 = vrot.lane.b32.xlu0 %v7143_v7, %s7023_s25  ;;  %v7233_v19 = vld [vmem:[%s7134_s24 + $0x70] sm:$0xff]  ;;  %v7236_v20 = vld [vmem:[%s7134_s24 + $0x78] sm:$0xff] }
  0x1b   : > { %v7247_v21 = vld [vmem:[%s7134_s24 + $0x80] sm:$0xff]  ;;  %v7250_v22 = vld [vmem:[%s7134_s24 + $0x88] sm:$0xff]  ;;  %v7261_v23 = vld [vmem:[%s7134_s24 + $0x90] sm:$0xff]  ;;  %6890 = vmatprep.subr.bf16.mxu0 %v6889_v43 }
  0x1c   : > { %6453 = vmatmul.mubr.msk.f32.gmra.mrb[2].mxu0 %vm546_vm0, %v7152_v8  ;;  %v7264_v24 = vld [vmem:[%s7134_s24 + $0x98] sm:$0xff]  ;;  %v7275_v25 = vld [vmem:[%s7134_s24 + $0xa0] sm:$0xff]  ;;  %v7278_v26 = vld [vmem:[%s7134_s24 + $0xa8] sm:$0xff] }
  0x1d   : > { %6455 = vmatprep.mubr.msk.f32.mxu0 %vm546_vm0, %v7163_v9  ;;  %v7289_v27 = vld [vmem:[%s7134_s24 + $0xb0] sm:$0xff]  ;;  %v7292_v28 = vld [vmem:[%s7134_s24 + $0xb8] sm:$0xff]  ;;  %v7303_v29 = vld [vmem:[%s7134_s24 + $0xc0] sm:$0xff]  ;;  %6892 = vmatpush3.bf16.msra.mxu0 %v6889_v43 }
  0x1e   : > { %878 = vrot.lane.b32.xlu1 %v7166_v10, %s7023_s25  ;;  %876 = vrot.lane.b32.xlu0 %v7163_v9, %s7023_s25  ;;  %v7306_v30 = vld [vmem:[%s7134_s24 + $0xc8] sm:$0xff]  ;;  %v7317_v31 = vld [vmem:[%s7134_s24 + $0xd0] sm:$0xff] }
  0x1f   : > { %v7320_v32 = vld [vmem:[%s7134_s24 + $0xd8] sm:$0xff]  ;;  %v7331_v33 = vld [vmem:[%s7134_s24 + $0xe0] sm:$0xff]  ;;  %v7334_v34 = vld [vmem:[%s7134_s24 + $0xe8] sm:$0xff] }
  0x20   : > { %6456 = vmatmul.mubr.msk.f32.gmra.mrb[4].mxu0 %vm546_vm0, %v7166_v10  ;;  %v7345_v35 = vld [vmem:[%s7134_s24 + $0xf0] sm:$0xff]  ;;  %v7348_v36 = vld [vmem:[%s7134_s24 + $0xf8] sm:$0xff] }
  0x21   : > { %6458 = vmatprep.mubr.msk.f32.mxu0 %vm546_vm0, %v7177_v11 }
  0x22   : > { %882 = vrot.lane.b32.xlu1 %v7180_v12, %s7023_s25  ;;  %880 = vrot.lane.b32.xlu0 %v7177_v11, %s7023_s25 }
  0x24   : > { %6459 = vmatmul.mubr.msk.f32.gmra.mrb[6].mxu0 %vm546_vm0, %v7180_v12 }
  0x25   : > { %6461 = vmatprep.mubr.msk.f32.mxu0 %vm546_vm0, %v7191_v13 }
  0x26   : > { %886 = vrot.lane.b32.xlu1 %v7194_v14, %s7023_s25  ;;  %884 = vrot.lane.b32.xlu0 %v7191_v13, %s7023_s25 }
  0x28   : > { %6462 = vmatmul.mubr.msk.f32.gmra.mrb[8].mxu0 %vm546_vm0, %v7194_v14 }
  0x29   : > { %6464 = vmatprep.mubr.msk.f32.mxu0 %vm546_vm0, %v7205_v15 }
  0x2a   : > { %890 = vrot.lane.b32.xlu1 %v7208_v16, %s7023_s25  ;;  %888 = vrot.lane.b32.xlu0 %v7205_v15, %s7023_s25 }
  0x2c   : > { %6465 = vmatmul.mubr.msk.f32.gmra.mrb[10].mxu0 %vm546_vm0, %v7208_v16 }
  0x2d   : > { %6467 = vmatprep.mubr.msk.f32.mxu0 %vm546_vm0, %v7219_v17 }
  0x2e   : > { %894 = vrot.lane.b32.xlu1 %v7222_v18, %s7023_s25  ;;  %892 = vrot.lane.b32.xlu0 %v7219_v17, %s7023_s25 }
  0x30   : > { %6468 = vmatmul.mubr.msk.f32.gmra.mrb[12].mxu0 %vm546_vm0, %v7222_v18 }
  0x31   : > { %6470 = vmatprep.mubr.msk.f32.mxu0 %vm546_vm0, %v7233_v19 }
  0x32   : > { %898 = vrot.lane.b32.xlu1 %v7236_v20, %s7023_s25  ;;  %896 = vrot.lane.b32.xlu0 %v7233_v19, %s7023_s25 }
  0x34   : > { %6471 = vmatmul.mubr.msk.f32.gmra.mrb[14].mxu0 %vm546_vm0, %v7236_v20 }
  0x35   : > { %6473 = vmatprep.mubr.msk.f32.mxu0 %vm546_vm0, %v7247_v21 }
  0x36   : > { %902 = vrot.lane.b32.xlu1 %v7250_v22, %s7023_s25  ;;  %900 = vrot.lane.b32.xlu0 %v7247_v21, %s7023_s25 }
  0x38   : > { %6474 = vmatmul.mubr.msk.f32.gmra.mrb[16].mxu0 %vm546_vm0, %v7250_v22 }
  0x39   : > { %6476 = vmatprep.mubr.msk.f32.mxu0 %vm546_vm0, %v7261_v23 }
  0x3a   : > { %906 = vrot.lane.b32.xlu1 %v7264_v24, %s7023_s25  ;;  %904 = vrot.lane.b32.xlu0 %v7261_v23, %s7023_s25 }
  0x3c   : > { %6477 = vmatmul.mubr.msk.f32.gmra.mrb[18].mxu0 %vm546_vm0, %v7264_v24 }
  0x3d   : > { %6479 = vmatprep.mubr.msk.f32.mxu0 %vm546_vm0, %v7275_v25 }
  0x3e   : > { %910 = vrot.lane.b32.xlu1 %v7278_v26, %s7023_s25  ;;  %908 = vrot.lane.b32.xlu0 %v7275_v25, %s7023_s25 }
  0x40   : > { %6480 = vmatmul.mubr.msk.f32.gmra.mrb[20].mxu0 %vm546_vm0, %v7278_v26 }
  0x41   : > { %6482 = vmatprep.mubr.msk.f32.mxu0 %vm546_vm0, %v7289_v27 }
  0x42   : > { %914 = vrot.lane.b32.xlu1 %v7292_v28, %s7023_s25  ;;  %912 = vrot.lane.b32.xlu0 %v7289_v27, %s7023_s25 }
  0x44   : > { %6483 = vmatmul.mubr.msk.f32.gmra.mrb[22].mxu0 %vm546_vm0, %v7292_v28 }
  0x45   : > { %6485 = vmatprep.mubr.msk.f32.mxu0 %vm546_vm0, %v7303_v29 }
  0x46   : > { %918 = vrot.lane.b32.xlu1 %v7306_v30, %s7023_s25  ;;  %916 = vrot.lane.b32.xlu0 %v7303_v29, %s7023_s25 }
  0x48   : > { %6486 = vmatmul.mubr.msk.f32.gmra.mrb[24].mxu0 %vm546_vm0, %v7306_v30 }
  0x49   : > { %6488 = vmatprep.mubr.msk.f32.mxu0 %vm546_vm0, %v7317_v31 }
  0x4a   : > { %922 = vrot.lane.b32.xlu1 %v7320_v32, %s7023_s25  ;;  %920 = vrot.lane.b32.xlu0 %v7317_v31, %s7023_s25 }
  0x4c   : > { %6489 = vmatmul.mubr.msk.f32.gmra.mrb[26].mxu0 %vm546_vm0, %v7320_v32 }
  0x4d   : > { %6491 = vmatprep.mubr.msk.f32.mxu0 %vm546_vm0, %v7331_v33 }
  0x4e   : > { %926 = vrot.lane.b32.xlu1 %v7334_v34, %s7023_s25  ;;  %924 = vrot.lane.b32.xlu0 %v7331_v33, %s7023_s25 }
  0x50   : > { %6492 = vmatmul.mubr.msk.f32.gmra.mrb[28].mxu0 %vm546_vm0, %v7334_v34 }
  0x51   : > { %6494 = vmatprep.mubr.msk.f32.mxu0 %vm546_vm0, %v7345_v35 }
  0x52   : > { %930 = vrot.lane.b32.xlu1 %v7348_v36, %s7023_s25  ;;  %928 = vrot.lane.b32.xlu0 %v7345_v35, %s7023_s25 }
  0x54   : > { %6495 = vmatmul.mubr.msk.f32.gmra.mrb[30].mxu0 %vm546_vm0, %v7348_v36 }
  0x56   : > { %1259 = vperm.xlu1 %6942, %v7143_v7   ;;  %1256 = vperm.xlu0 %6941, %v7140_v6  }
  0x5a   : > { %1262 = vperm.xlu1 %6942, %v7137_v5   ;;  %1265 = vperm.xlu0 %6941, %v7152_v8  }
  0x5e   : > { %1268 = vperm.xlu1 %6942, %v7163_v9   ;;  %1271 = vperm.xlu0 %6941, %v7166_v10  }
  0x62   : > { %1274 = vperm.xlu1 %6942, %v7177_v11   ;;  %1277 = vperm.xlu0 %6941, %v7180_v12  }
  0x66   : > { %1280 = vperm.xlu1 %6942, %v7191_v13   ;;  %1283 = vperm.xlu0 %6941, %v7194_v14  }
  0x6a   : > { %1286 = vperm.xlu1 %6942, %v7205_v15   ;;  %1289 = vperm.xlu0 %6941, %v7208_v16  }
  0x6e   : > { %1292 = vperm.xlu1 %6942, %v7219_v17   ;;  %1295 = vperm.xlu0 %6941, %v7222_v18  }
  0x72   : > { %1298 = vperm.xlu1 %6942, %v7233_v19   ;;  %1301 = vperm.xlu0 %6941, %v7236_v20  }
  0x76   : > { %1304 = vperm.xlu1 %6942, %v7247_v21   ;;  %1307 = vperm.xlu0 %6941, %v7250_v22  }
  0x7a   : > { %1310 = vperm.xlu1 %6942, %v7261_v23   ;;  %1313 = vperm.xlu0 %6941, %v7264_v24  }
  0x7e   : > { %1316 = vperm.xlu1 %6942, %v7275_v25   ;;  %1319 = vperm.xlu0 %6941, %v7278_v26  }
  0x82   : > { %1322 = vperm.xlu1 %6942, %v7289_v27   ;;  %1325 = vperm.xlu0 %6941, %v7292_v28  }
  0x86   : > { %1328 = vperm.xlu1 %6942, %v7303_v29   ;;  %1331 = vperm.xlu0 %6941, %v7306_v30  }
  0x88   : > { %v873_v44 = vpop.permute.xlu1 %872  ;;  %v869_v45 = vpop.permute.xlu0 %868 }
  0x89   : > { %6501 = vmatprep.mubr.msk.f32.mxu1 %vm546_vm0, %v869_v45  ;;  %v1253_v45 = vlaneseq }
  0x8a   : > { %1334 = vperm.xlu1 %6942, %v7317_v31   ;;  %1337 = vperm.xlu0 %6941, %v7320_v32  }
  0x8c   : > { %v875_v46 = vpop.permute.xlu1 %874  ;;  %v871_v47 = vpop.permute.xlu0 %870 }
  0x8d   : > { %6502 = vmatmul.mubr.msk.f32.vlgmr.msra.gmra.mrb[0].mxu1 %vm546_vm0, %v871_v47  ;;  %v7470_v47 = vand.u32 127, %v1253_v45 }
  0x8e   : > { %1340 = vperm.xlu1 %6942, %v7331_v33   ;;  %1343 = vperm.xlu0 %6941, %v7334_v34  }
  0x8f   : > { %6504 = vmatprep.mubr.msk.f32.mxu1 %vm546_vm0, %v873_v44  ;;  %6606 = vmatpush3.msra.mxu1 %v2516_v37 }
  0x90   : > { %v879_v48 = vpop.permute.xlu1 %878  ;;  %v877_v49 = vpop.permute.xlu0 %876 }
  0x91   : > { %6505 = vmatmul.mubr.msk.f32.gmra.mrb[2].mxu1 %vm546_vm0, %v875_v46  ;;  %v1671_v46 = vadd.s32 8, %v7140_v6 }
  0x92   : > { %1346 = vperm.xlu1 %6942, %v7345_v35   ;;  %1349 = vperm.xlu0 %6941, %v7348_v36  }
  0x93   : > { %6507 = vmatprep.mubr.msk.f32.mxu1 %vm546_vm0, %v877_v49  ;;  %v1674_v49 = vadd.s32 8, %v7152_v8 }
  0x94   : > { %v883_v50 = vpop.permute.xlu1 %882  ;;  %v881_v51 = vpop.permute.xlu0 %880 }
  0x95   : > { %6508 = vmatmul.mubr.msk.f32.gmra.mrb[4].mxu1 %vm546_vm0, %v879_v48  ;;  %v7025_v48 = vmov 34  }
  0x96   : > { %6943 = vset.pattern.permute.xlu1 %v7024_v52  ;;  %6944 = vset.pattern.permute.xlu0 %v7024_v52  ;;  %v10344_v52 = vmov 0.0  }
  0x97   : > { %1448 = vperm.xlu1 %6943, %v7140_v6   ;;  %1451 = vperm.xlu0 %6944, %v7143_v7  }
  0x98   : > { %v887_v53 = vpop.permute.xlu1 %886  ;;  %6510 = vmatprep.mubr.msk.f32.mxu1 %vm546_vm0, %v881_v51  ;;  %v885_v54 = vpop.permute.xlu0 %884 }
  0x99   : > { %6511 = vmatmul.mubr.msk.f32.gmra.mrb[6].mxu1 %vm546_vm0, %v883_v50 }
  0x9a   : > { %6513 = vmatprep.mubr.msk.f32.mxu1 %vm546_vm0, %v885_v54  ;;  %v1672_v54 = vadd.s32 8, %v7143_v7  ;;  %v1673_v7 = vadd.s32 8, %v7137_v5 }
  0x9b   : > { %1454 = vperm.xlu1 %6943, %v7137_v5   ;;  %1460 = vperm.xlu0 %6944, %v7163_v9  }
  0x9c   : > { %v891_v55 = vpop.permute.xlu1 %890  ;;  %v889_v56 = vpop.permute.xlu0 %888 }
  0x9d   : > { %6514 = vmatmul.mubr.msk.f32.gmra.mrb[8].mxu1 %vm546_vm0, %v887_v53 }
  0x9e   : > { %6516 = vmatprep.mubr.msk.f32.mxu1 %vm546_vm0, %v889_v56  ;;  %v1676_v56 = vadd.s32 8, %v7166_v10 }
  0x9f   : > { %1457 = vperm.xlu1 %6943, %v7152_v8   ;;  %1466 = vperm.xlu0 %6944, %v7177_v11  }
  0xa0   : > { %v895_v57 = vpop.permute.xlu1 %894  ;;  %v893_v58 = vpop.permute.xlu0 %892 }
  0xa1   : > { %6517 = vmatmul.mubr.msk.f32.gmra.mrb[10].mxu1 %vm546_vm0, %v891_v55 }
  0xa2   : > { %6519 = vmatprep.mubr.msk.f32.mxu1 %vm546_vm0, %v893_v58 }
  0xa3   : > { %1463 = vperm.xlu1 %6943, %v7166_v10   ;;  %1472 = vperm.xlu0 %6944, %v7191_v13   ;;  %v1678_v10 = vadd.s32 8, %v7180_v12 }
  0xa4   : > { %v899_v59 = vpop.permute.xlu1 %898  ;;  %v897_v60 = vpop.permute.xlu0 %896 }
  0xa5   : > { %6520 = vmatmul.mubr.msk.f32.gmra.mrb[12].mxu1 %vm546_vm0, %v895_v57 }
  0xa6   : > { %6522 = vmatprep.mubr.msk.f32.mxu1 %vm546_vm0, %v897_v60 }
  0xa7   : > { %1469 = vperm.xlu1 %6943, %v7180_v12   ;;  %1478 = vperm.xlu0 %6944, %v7205_v15   ;;  %v1675_v12 = vadd.s32 8, %v7163_v9  ;;  %v1677_v9 = vadd.s32 8, %v7177_v11 }
  0xa8   : > { %v903_v61 = vpop.permute.xlu1 %902  ;;  %v901_v62 = vpop.permute.xlu0 %900 }
  0xa9   : > { %6523 = vmatmul.mubr.msk.f32.gmra.mrb[14].mxu1 %vm546_vm0, %v899_v59 }
  0xaa   : > { %6525 = vmatprep.mubr.msk.f32.mxu1 %vm546_vm0, %v901_v62  ;;  %v2904_v62 = vld [vmem:[%s10331_s6 + $0x8] sm:$0xff] }
  0xab   : > { %1475 = vperm.xlu1 %6943, %v7194_v14   ;;  %1484 = vperm.xlu0 %6944, %v7219_v17  }
  0xac   : > { %v907_v63 = vpop.permute.xlu1 %906  ;;  %v905_v0 = vpop.permute.xlu0 %904 }
  0xad   : > { %6526 = vmatmul.mubr.msk.f32.gmra.mrb[16].mxu1 %vm546_vm0, %v903_v61  ;;  %v2903_v61 = vld [vmem:[%s10331_s6] sm:$0xff] }
  0xae   : > { %6528 = vmatprep.mubr.msk.f32.mxu1 %vm546_vm0, %v905_v0  ;;  %v7501_v0 = vpack.c.bf16 %v2904_v62, %v2903_v61  ;;  %v2906_v61 = vld [vmem:[%s10331_s6 + $0x18] sm:$0xff] }
  0xaf   : > { %1481 = vperm.xlu1 %6943, %v7208_v16   ;;  %1490 = vperm.xlu0 %6944, %v7233_v19  }
  0xb0   : > { %v911_v1 = vpop.permute.xlu1 %910  ;;  %v909_v2 = vpop.permute.xlu0 %908  ;;  %6894 = vmatprep.subr.bf16.mxu0 %v7501_v0 }
  0xb1   : > { %6529 = vmatmul.mubr.msk.f32.gmra.mrb[18].mxu1 %vm546_vm0, %v907_v63 }
  0xb2   : > { %6531 = vmatprep.mubr.msk.f32.mxu1 %vm546_vm0, %v909_v2 }
  0xb3   : > { %1487 = vperm.xlu1 %6943, %v7222_v18   ;;  %1496 = vperm.xlu0 %6944, %v7247_v21  }
  0xb4   : > { %v915_v3 = vpop.permute.xlu1 %914  ;;  %v913_v4 = vpop.permute.xlu0 %912 }
  0xb5   : > { %6532 = vmatmul.mubr.msk.f32.gmra.mrb[20].mxu1 %vm546_vm0, %v911_v1 }
  0xb6   : > { %6534 = vmatprep.mubr.msk.f32.mxu1 %vm546_vm0, %v913_v4 }
  0xb7   : > { %1493 = vperm.xlu1 %6943, %v7236_v20   ;;  %1502 = vperm.xlu0 %6944, %v7261_v23  }
  0xb8   : > { %v919_v37 = vpop.permute.xlu1 %918  ;;  %v917_v38 = vpop.permute.xlu0 %916 }
  0xb9   : > { %6535 = vmatmul.mubr.msk.f32.gmra.mrb[22].mxu1 %vm546_vm0, %v915_v3  ;;  %v1680_v3 = vadd.s32 8, %v7194_v14  ;;  %v3421_v14 = vld [vmem:[%s10332_s7 + $0x8] sm:$0xff] }
  0xba   : > { %6537 = vmatprep.mubr.msk.f32.mxu1 %vm546_vm0, %v917_v38  ;;  %v3420_v38 = vld [vmem:[%s10332_s7] sm:$0xff] }
  0xbb   : > { %1499 = vperm.xlu1 %6943, %v7250_v22   ;;  %1508 = vperm.xlu0 %6944, %v7275_v25  }
  0xbc   : > { %v923_v39 = vpop.permute.xlu1 %922  ;;  %v921_v40 = vpop.permute.xlu0 %920 }
  0xbd   : > { %6538 = vmatmul.mubr.msk.f32.gmra.mrb[24].mxu1 %vm546_vm0, %v919_v37 }
  0xbe   : > { %6540 = vmatprep.mubr.msk.f32.mxu1 %vm546_vm0, %v921_v40 }
  0xbf   : > { %1505 = vperm.xlu1 %6943, %v7264_v24   ;;  %1514 = vperm.xlu0 %6944, %v7289_v27  }
  0xc0   : > { %v925_v41 = vpop.permute.xlu0 %924  ;;  %v927_v42 = vpop.permute.xlu1 %926 }
  0xc1   : > { %6541 = vmatmul.mubr.msk.f32.gmra.mrb[26].mxu1 %vm546_vm0, %v923_v39 }
  0xc2   : > { %6543 = vmatprep.mubr.msk.f32.mxu1 %vm546_vm0, %v925_v41  ;;  %v1682_v41 = vadd.s32 8, %v7208_v16 }
  0xc3   : > { %1511 = vperm.xlu1 %6943, %v7278_v26   ;;  %1520 = vperm.xlu0 %6944, %v7303_v29  }
  0xc4   : > { %v929_v43 = vpop.permute.xlu0 %928  ;;  %v931_v44 = vpop.permute.xlu1 %930 }
  0xc5   : > { %6544 = vmatmul.mubr.msk.f32.gmra.mrb[28].mxu1 %vm546_vm0, %v927_v42  ;;  %v6901_v42 = vpack.c.bf16 %v3421_v14, %v3420_v38  ;;  %v1685_v38 = vadd.s32 8, %v7233_v19 }
  0xc6   : > { %6546 = vmatprep.mubr.msk.f32.mxu1 %vm546_vm0, %v929_v43 }
  0xc7   : > { %1517 = vperm.xlu1 %6943, %v7292_v28   ;;  %1526 = vperm.xlu0 %6944, %v7317_v31  }
  0xc8   : > { %6902 = vmatprep.subr.bf16.mxu1 %v6901_v42 }
  0xc9   : > { %6547 = vmatmul.mubr.msk.f32.gmra.mrb[30].mxu1 %vm546_vm0, %v931_v44  ;;  %v1679_v44 = vadd.s32 8, %v7191_v13  ;;  %vm2194_vm0 = vcmask 261120  }
  0xcb   : > { %1523 = vperm.xlu1 %6943, %v7306_v30   ;;  %1532 = vperm.xlu0 %6944, %v7331_v33  }
  0xcf   : > { %1529 = vperm.xlu1 %6943, %v7320_v32   ;;  %1538 = vperm.xlu0 %6944, %v7345_v35  }
  0xd3   : > { %1535 = vperm.xlu1 %6943, %v7334_v34   ;;  %6945 = vset.pattern.permute.xlu0 %v7025_v48 }
  0xd4   : > { %1704 = vperm.xlu0 %6945, %v1671_v46   ;;  %v7532_v46 = vld [vmem:[%s10327_s2] ss:$0 sm:$0xff] }
  0xd5   : > { %v1260_v50 = vpop.permute.xlu1 %1259  ;;  %v1257_v51 = vpop.permute.xlu0 %1256 }
  0xd6   : > { %vm1352_vm2 = vcmp.eq.s32.totalorder %v7470_v47, %v1260_v50  ;;  %vm1351_vm3 = vcmp.eq.s32.totalorder %v7470_v47, %v1257_v51 }
  0xd7   : > { %v5839_v53 = vsel %vm1352_vm2, 1.0, %v10344_v52  ;;  %v5838_v6 = vsel %vm1351_vm3, 1.0, %v10344_v52  ;;  %1541 = vperm.xlu1 %6943, %v7348_v36  }
  0xd8   : > { %6607 = vmatprep.mubr.msk.f32.mxu1 %vm2517_vm1, %v5838_v6  ;;  %1713 = vperm.xlu0 %6945, %v1674_v49   ;;  %v1681_v6 = vadd.s32 8, %v7205_v15 }
  0xd9   : > { %v1263_v8 = vpop.permute.xlu1 %1262  ;;  %6608 = vmatmul.mubr.msk.f32.vlgmr.msra.gmra.mrb[32].mxu1 %vm2517_vm1, %v5839_v53  ;;  %v1266_v55 = vpop.permute.xlu0 %1265 }
  0xda   : > { %vm1353_vm4 = vcmp.eq.s32.totalorder %v7470_v47, %v1263_v8  ;;  %vm1354_vm5 = vcmp.eq.s32.totalorder %v7470_v47, %v1266_v55  ;;  %6904 = vmatpush3.bf16.msra.mxu1 %v6901_v42  ;;  %v1686_v55 = vadd.s32 8, %v7236_v20  ;;  %v1683_v20 = vadd.s32 8, %v7219_v17 }
  0xdb   : > { %v5840_v57 = vsel %vm1353_vm4, 1.0, %v10344_v52  ;;  %v5841_v58 = vsel %vm1354_vm5, 1.0, %v10344_v52  ;;  %6946 = vset.pattern.permute.xlu1 %v7025_v48  ;;  %v1684_v48 = vadd.s32 8, %v7222_v18 }
  0xdc   : > { %1707 = vperm.xlu1 %6946, %v1672_v54   ;;  %6610 = vmatprep.mubr.msk.f32.mxu1 %vm2517_vm1, %v5840_v57 }
  0xdd   : > { %1719 = vperm.xlu0 %6945, %v1676_v56   ;;  %v1269_v59 = vpop.permute.xlu1 %1268  ;;  %6611 = vmatmul.mubr.msk.f32.gmra.mrb[34].mxu1 %vm2517_vm1, %v5841_v58  ;;  %v1272_v60 = vpop.permute.xlu0 %1271 }
  0xde   : > { %vm1355_vm6 = vcmp.eq.s32.totalorder %v7470_v47, %v1269_v59  ;;  %vm1356_vm7 = vcmp.eq.s32.totalorder %v7470_v47, %v1272_v60 }
  0xdf   : > { %v5842_v5 = vsel %vm1355_vm6, 1.0, %v10344_v52  ;;  %v5843_v63 = vsel %vm1356_vm7, 1.0, %v10344_v52 }
  0xe0   : > { %1710 = vperm.xlu1 %6946, %v1673_v7   ;;  %6613 = vmatprep.mubr.msk.f32.mxu1 %vm2517_vm1, %v5842_v5 }
  0xe1   : > { %1725 = vperm.xlu0 %6945, %v1678_v10   ;;  %v1275_v1 = vpop.permute.xlu1 %1274  ;;  %6614 = vmatmul.mubr.msk.f32.gmra.mrb[36].mxu1 %vm2517_vm1, %v5843_v63  ;;  %v1278_v2 = vpop.permute.xlu0 %1277  ;;  %v2905_v10 = vld [vmem:[%s10331_s6 + $0x10] sm:$0xff] }
  0xe2   : > { %vm1357_vm8 = vcmp.eq.s32.totalorder %v7470_v47, %v1275_v1  ;;  %vm1358_vm9 = vcmp.eq.s32.totalorder %v7470_v47, %v1278_v2 }
  0xe3   : > { %v5844_v4 = vsel %vm1357_vm8, 1.0, %v10344_v52  ;;  %v5845_v37 = vsel %vm1358_vm9, 1.0, %v10344_v52 }
  0xe4   : > { %1716 = vperm.xlu1 %6946, %v1675_v12   ;;  %6616 = vmatprep.mubr.msk.f32.mxu1 %vm2517_vm1, %v5844_v4  ;;  %v1688_v12 = vadd.s32 8, %v7250_v22 }
  0xe5   : > { %1731 = vperm.xlu0 %6945, %v1680_v3   ;;  %v1281_v39 = vpop.permute.xlu1 %1280  ;;  %6617 = vmatmul.mubr.msk.f32.gmra.mrb[38].mxu1 %vm2517_vm1, %v5845_v37  ;;  %v1284_v40 = vpop.permute.xlu0 %1283  ;;  %v6897_v37 = vpack.c.bf16 %v2906_v61, %v2905_v10 }
  0xe6   : > { %vm1359_vm10 = vcmp.eq.s32.totalorder %v7470_v47, %v1281_v39  ;;  %vm1360_vm11 = vcmp.eq.s32.totalorder %v7470_v47, %v1284_v40 }
  0xe7   : > { %v5846_v11 = vsel %vm1359_vm10, 1.0, %v10344_v52  ;;  %v5847_v43 = vsel %vm1360_vm11, 1.0, %v10344_v52 }
  0xe8   : > { %1722 = vperm.xlu1 %6946, %v1677_v9   ;;  %6619 = vmatprep.mubr.msk.f32.mxu1 %vm2517_vm1, %v5846_v11 }
  0xe9   : > { %1737 = vperm.xlu0 %6945, %v1682_v41   ;;  %v1287_v45 = vpop.permute.xlu1 %1286  ;;  %6620 = vmatmul.mubr.msk.f32.gmra.mrb[40].mxu1 %vm2517_vm1, %v5847_v43  ;;  %v1290_v16 = vpop.permute.xlu0 %1289  ;;  %v1690_v41 = vadd.s32 8, %v7264_v24  ;;  %v1687_v24 = vadd.s32 8, %v7247_v21 }
  0xea   : > { %vm1361_vm12 = vcmp.eq.s32.totalorder %v7470_v47, %v1287_v45  ;;  %vm1362_vm13 = vcmp.eq.s32.totalorder %v7470_v47, %v1290_v16 }
  0xeb   : > { %v5848_v49 = vsel %vm1361_vm12, 1.0, %v10344_v52  ;;  %v5849_v13 = vsel %vm1362_vm13, 1.0, %v10344_v52  ;;  %v6451_v50 = vpop.f32.mrb[0].mxu0 }
  0xec   : > { %v683_v51 = vadd.f32 %v6451_v50, %v7532_v46  ;;  %v677_v53 = vpop.f32.mrb[1].mxu0  ;;  %1728 = vperm.xlu1 %6946, %v1679_v44   ;;  %6622 = vmatprep.mubr.msk.f32.mxu1 %vm2517_vm1, %v5848_v49 }
  0xed   : > { %v678_v18 = vadd.f32 %v7532_v46, %v677_v53  ;;  %1743 = vperm.xlu0 %6945, %v1684_v48   ;;  %v1293_v54 = vpop.permute.xlu1 %1292  ;;  %6623 = vmatmul.mubr.msk.f32.gmra.mrb[42].mxu1 %vm2517_vm1, %v5849_v13  ;;  %v1296_v8 = vpop.permute.xlu0 %1295  ;;  %v1692_v13 = vadd.s32 8, %v7278_v26  ;;  %v1689_v26 = vadd.s32 8, %v7261_v23 }
  0xee   : > { %v837_v56 = vmax.f32 %v683_v51, 0.0  ;;  %vm1363_vm14 = vcmp.eq.s32.totalorder %v7470_v47, %v1293_v54  ;;  %vm1364_vm15 = vcmp.eq.s32.totalorder %v7470_v47, %v1296_v8 }
  0xef   : > { %v836_v57 = vmax.f32 %v678_v18, 0.0  ;;  %v5850_v58 = vsel %vm1363_vm14, 1.0, %v10344_v52  ;;  %v5851_v15 = vsel %vm1364_vm15, 1.0, %v10344_v52  ;;  %v6454_v7 = vpop.f32.mrb[2].mxu0 }
  0xf0   : > { %v693_v59 = vadd.f32 %v6454_v7, %v7532_v46  ;;  %v687_v60 = vpop.f32.mrb[3].mxu0  ;;  %1734 = vperm.xlu1 %6946, %v1681_v6   ;;  %6625 = vmatprep.mubr.msk.f32.mxu1 %vm2517_vm1, %v5850_v58 }
  0xf1   : > { %v688_v62 = vadd.f32 %v7532_v46, %v687_v60  ;;  %1749 = vperm.xlu0 %6945, %v1686_v55   ;;  %6557 = vmatprep.mubr.msk.f32.mxu0 %vm2194_vm0, %v836_v57  ;;  %v1299_v5 = vpop.permute.xlu1 %1298  ;;  %v1302_v63 = vpop.permute.xlu0 %1301  ;;  %v1694_v57 = vadd.s32 8, %v7292_v28  ;;  %v1691_v28 = vadd.s32 8, %v7275_v25 }
  0xf2   : > { %v839_v1 = vmax.f32 %v693_v59, 0.0  ;;  %vm1365_vm2 = vcmp.eq.s32.totalorder %v7470_v47, %v1299_v5  ;;  %6626 = vmatmul.mubr.msk.f32.gmra.mrb[44].mxu1 %vm2517_vm1, %v5851_v15  ;;  %vm1366_vm3 = vcmp.eq.s32.totalorder %v7470_v47, %v1302_v63  ;;  %6558 = vmatmul.mubr.msk.f32.vlgmr.msra.gmra.mrb[32].mxu0 %vm2194_vm0, %v837_v56  ;;  %v1696_v5 = vadd.s32 8, %v7306_v30 }
  0xf3   : > { %v838_v17 = vmax.f32 %v688_v62, 0.0  ;;  %v5852_v2 = vsel %vm1365_vm2, 1.0, %v10344_v52  ;;  %v5853_v3 = vsel %vm1366_vm3, 1.0, %v10344_v52  ;;  %v6457_v4 = vpop.f32.mrb[4].mxu0  ;;  %6896 = vmatpush3.bf16.msra.mxu0 %v7501_v0  ;;  %v1693_v30 = vadd.s32 8, %v7289_v27 }
  0xf4   : > { %v703_v22 = vadd.f32 %v6457_v4, %v7532_v46  ;;  %v697_v9 = vpop.f32.mrb[5].mxu0  ;;  %1740 = vperm.xlu1 %6946, %v1683_v20   ;;  %6628 = vmatprep.mubr.msk.f32.mxu1 %vm2517_vm1, %v5852_v2  ;;  %v3422_v4 = vld [vmem:[%s10332_s7 + $0x10] sm:$0xff] }
  0xf5   : > { %v698_v14 = vadd.f32 %v7532_v46, %v697_v9  ;;  %1755 = vperm.xlu0 %6945, %v1688_v12   ;;  %6560 = vmatprep.mubr.msk.f32.mxu0 %vm2194_vm0, %v838_v17  ;;  %v1305_v39 = vpop.permute.xlu1 %1304  ;;  %v1308_v40 = vpop.permute.xlu0 %1307 }
  0xf6   : > { %v841_v42 = vmax.f32 %v703_v22, 0.0  ;;  %vm1367_vm4 = vcmp.eq.s32.totalorder %v7470_v47, %v1305_v39  ;;  %6629 = vmatmul.mubr.msk.f32.gmra.mrb[46].mxu1 %vm2517_vm1, %v5853_v3  ;;  %vm1368_vm5 = vcmp.eq.s32.totalorder %v7470_v47, %v1308_v40  ;;  %6561 = vmatmul.mubr.msk.f32.gmra.mrb[34].mxu0 %vm2194_vm0, %v839_v1 }
  0xf7   : > { %v840_v0 = vmax.f32 %v698_v14, 0.0  ;;  %v5854_v19 = vsel %vm1367_vm4, 1.0, %v10344_v52  ;;  %v5855_v11 = vsel %vm1368_vm5, 1.0, %v10344_v52  ;;  %v6460_v43 = vpop.f32.mrb[6].mxu0  ;;  %6898 = vmatprep.subr.bf16.mxu0 %v6897_v37  ;;  %6715 = vmatprep.subr.mxu1 %v3422_v4 }
  0xf8   : > { %v713_v44 = vadd.f32 %v6460_v43, %v7532_v46  ;;  %v707_v45 = vpop.f32.mrb[7].mxu0  ;;  %1746 = vperm.xlu1 %6946, %v1685_v38   ;;  %6631 = vmatprep.mubr.msk.f32.mxu1 %vm2517_vm1, %v5854_v19  ;;  %v1698_v38 = vadd.s32 8, %v7320_v32  ;;  %v1695_v32 = vadd.s32 8, %v7303_v29 }
  0xf9   : > { %v708_v16 = vadd.f32 %v7532_v46, %v707_v45  ;;  %1761 = vperm.xlu0 %6945, %v1690_v41   ;;  %6563 = vmatprep.mubr.msk.f32.mxu0 %vm2194_vm0, %v840_v0  ;;  %v1311_v48 = vpop.permute.xlu1 %1310  ;;  %v1314_v49 = vpop.permute.xlu0 %1313 }
  0xfa   : > { %v843_v50 = vmax.f32 %v713_v44, 0.0  ;;  %vm1369_vm6 = vcmp.eq.s32.totalorder %v7470_v47, %v1311_v48  ;;  %6632 = vmatmul.mubr.msk.f32.gmra.mrb[48].mxu1 %vm2517_vm1, %v5855_v11  ;;  %vm1370_vm7 = vcmp.eq.s32.totalorder %v7470_v47, %v1314_v49  ;;  %6564 = vmatmul.mubr.msk.f32.gmra.mrb[36].mxu0 %vm2194_vm0, %v841_v42  ;;  %v1700_v44 = vadd.s32 8, %v7334_v34 }
  0xfb   : > { %v842_v51 = vmax.f32 %v708_v16, 0.0  ;;  %v5856_v21 = vsel %vm1369_vm6, 1.0, %v10344_v52  ;;  %v5857_v53 = vsel %vm1370_vm7, 1.0, %v10344_v52  ;;  %v6463_v6 = vpop.f32.mrb[8].mxu0  ;;  %6900 = vmatpush3.bf16.msra.mxu0 %v6897_v37  ;;  %6716 = vmatpush3.msra.mxu1 %v3422_v4  ;;  %v1697_v34 = vadd.s32 8, %v7317_v31 }
  0xfc   : > { %v723_v18 = vadd.f32 %v6463_v6, %v7532_v46  ;;  %v717_v54 = vpop.f32.mrb[9].mxu0  ;;  %1752 = vperm.xlu1 %6946, %v1687_v24   ;;  %6634 = vmatprep.mubr.msk.f32.mxu1 %vm2517_vm1, %v5856_v21 }
  0xfd   : > { %v718_v8 = vadd.f32 %v7532_v46, %v717_v54  ;;  %1767 = vperm.xlu0 %6945, %v1692_v13   ;;  %6566 = vmatprep.mubr.msk.f32.mxu0 %vm2194_vm0, %v842_v51  ;;  %v1317_v55 = vpop.permute.xlu1 %1316  ;;  %v1320_v56 = vpop.permute.xlu0 %1319 }
  0xfe   : > { %v845_v58 = vmax.f32 %v723_v18, 0.0  ;;  %vm1371_vm8 = vcmp.eq.s32.totalorder %v7470_v47, %v1317_v55  ;;  %6635 = vmatmul.mubr.msk.f32.gmra.mrb[50].mxu1 %vm2517_vm1, %v5857_v53  ;;  %vm1372_vm9 = vcmp.eq.s32.totalorder %v7470_v47, %v1320_v56  ;;  %6567 = vmatmul.mubr.msk.f32.gmra.mrb[38].mxu0 %vm2194_vm0, %v843_v50  ;;  %v1702_v53 = vadd.s32 8, %v7348_v36 }
  0xff   : > { %v844_v15 = vmax.f32 %v718_v8, 0.0  ;;  %v5858_v23 = vsel %vm1371_vm8, 1.0, %v10344_v52  ;;  %v5859_v7 = vsel %vm1372_vm9, 1.0, %v10344_v52  ;;  %v6466_v59 = vpop.f32.mrb[10].mxu0  ;;  %v1699_v36 = vadd.s32 8, %v7331_v33 }
 0x100   : > { %v733_v60 = vadd.f32 %v6466_v59, %v7532_v46  ;;  %v727_v20 = vpop.f32.mrb[11].mxu0  ;;  %1758 = vperm.xlu1 %6946, %v1689_v26   ;;  %6637 = vmatprep.mubr.msk.f32.mxu1 %vm2517_vm1, %v5858_v23 }
 0x101   : > { %v728_v10 = vadd.f32 %v7532_v46, %v727_v20  ;;  %1773 = vperm.xlu0 %6945, %v1694_v57   ;;  %6569 = vmatprep.mubr.msk.f32.mxu0 %vm2194_vm0, %v844_v15  ;;  %v1323_v61 = vpop.permute.xlu1 %1322  ;;  %v1326_v62 = vpop.permute.xlu0 %1325  ;;  %v6949_v15 = vld [vmem:[%s7134_s24 + $0x8] sm:$0xff] }
 0x102   : > { %v847_v63 = vmax.f32 %v733_v60, 0.0  ;;  %vm1373_vm10 = vcmp.eq.s32.totalorder %v7470_v47, %v1323_v61  ;;  %6638 = vmatmul.mubr.msk.f32.gmra.mrb[52].mxu1 %vm2517_vm1, %v5859_v7  ;;  %vm1374_vm11 = vcmp.eq.s32.totalorder %v7470_v47, %v1326_v62  ;;  %6570 = vmatmul.mubr.msk.f32.gmra.mrb[40].mxu0 %vm2194_vm0, %v845_v58  ;;  %v1928_v23 = vadd.s32 16, %v6949_v15 }
 0x103   : > { %v846_v12 = vmax.f32 %v728_v10, 0.0  ;;  %v5860_v25 = vsel %vm1373_vm10, 1.0, %v10344_v52  ;;  %v5861_v1 = vsel %vm1374_vm11, 1.0, %v10344_v52  ;;  %v6469_v17 = vpop.f32.mrb[12].mxu0  ;;  %v1701_v61 = vadd.s32 8, %v7345_v35 }
 0x104   : > { %v743_v2 = vadd.f32 %v6469_v17, %v7532_v46  ;;  %v737_v3 = vpop.f32.mrb[13].mxu0  ;;  %1764 = vperm.xlu1 %6946, %v1691_v28   ;;  %6640 = vmatprep.mubr.msk.f32.mxu1 %vm2517_vm1, %v5860_v25  ;;  %v6950_v25 = vld [vmem:[%s7134_s24 + $0x20] sm:$0xff] }
 0x105   : > { %v738_v37 = vadd.f32 %v7532_v46, %v737_v3  ;;  %1779 = vperm.xlu0 %6945, %v1696_v5   ;;  %6572 = vmatprep.mubr.msk.f32.mxu0 %vm2194_vm0, %v846_v12  ;;  %v1329_v22 = vpop.permute.xlu1 %1328  ;;  %v1332_v9 = vpop.permute.xlu0 %1331  ;;  %v7027_v5 = vmov 35  }
 0x106   : > { %v849_v14 = vmax.f32 %v743_v2, 0.0  ;;  %vm1375_vm12 = vcmp.eq.s32.totalorder %v7470_v47, %v1329_v22  ;;  %6641 = vmatmul.mubr.msk.f32.gmra.mrb[54].mxu1 %vm2517_vm1, %v5861_v1  ;;  %vm1376_vm13 = vcmp.eq.s32.totalorder %v7470_v47, %v1332_v9  ;;  %6573 = vmatmul.mubr.msk.f32.gmra.mrb[42].mxu0 %vm2194_vm0, %v847_v63  ;;  %v1931_v1 = vadd.s32 16, %v6950_v25 }
 0x107   : > { %v848_v27 = vmax.f32 %v738_v37, 0.0  ;;  %v5862_v39 = vsel %vm1375_vm12, 1.0, %v10344_v52  ;;  %v5863_v40 = vsel %vm1376_vm13, 1.0, %v10344_v52  ;;  %v6472_v41 = vpop.f32.mrb[14].mxu0  ;;  %v6951_v37 = vld [vmem:[%s7134_s24] sm:$0xff] }
 0x108   : > { %v753_v42 = vadd.f32 %v6472_v41, %v7532_v46  ;;  %v747_v0 = vpop.f32.mrb[15].mxu0  ;;  %1770 = vperm.xlu1 %6946, %v1693_v30   ;;  %6643 = vmatprep.mubr.msk.f32.mxu1 %vm2517_vm1, %v5862_v39  ;;  %v1927_v22 = vadd.s32 16, %v6951_v37 }
 0x109   : > { %v748_v19 = vadd.f32 %v7532_v46, %v747_v0  ;;  %1785 = vperm.xlu0 %6945, %v1698_v38   ;;  %6575 = vmatprep.mubr.msk.f32.mxu0 %vm2194_vm0, %v848_v27  ;;  %v1335_v11 = vpop.permute.xlu1 %1334  ;;  %v1338_v43 = vpop.permute.xlu0 %1337 }
 0x10a   : > { %v851_v45 = vmax.f32 %v753_v42, 0.0  ;;  %vm1377_vm14 = vcmp.eq.s32.totalorder %v7470_v47, %v1335_v11  ;;  %6644 = vmatmul.mubr.msk.f32.gmra.mrb[56].mxu1 %vm2517_vm1, %v5863_v40  ;;  %vm1378_vm15 = vcmp.eq.s32.totalorder %v7470_v47, %v1338_v43  ;;  %6576 = vmatmul.mubr.msk.f32.gmra.mrb[44].mxu0 %vm2194_vm0, %v849_v14  ;;  %v6952_v14 = vld [vmem:[%s7134_s24 + $0x30] sm:$0xff] }
 0x10b   : > { %v850_v24 = vmax.f32 %v748_v19, 0.0  ;;  %v5864_v29 = vsel %vm1377_vm14, 1.0, %v10344_v52  ;;  %v5865_v16 = vsel %vm1378_vm15, 1.0, %v10344_v52  ;;  %v6475_v48 = vpop.f32.mrb[16].mxu0  ;;  %v1933_v27 = vadd.s32 16, %v6952_v14  ;;  %v6953_v19 = vld [vmem:[%s7134_s24 + $0x10] sm:$0xff] }
 0x10c   : > { %v763_v49 = vadd.f32 %v6475_v48, %v7532_v46  ;;  %v757_v13 = vpop.f32.mrb[17].mxu0  ;;  %1776 = vperm.xlu1 %6946, %v1695_v32   ;;  %6646 = vmatprep.mubr.msk.f32.mxu1 %vm2517_vm1, %v5864_v29  ;;  %v1929_v11 = vadd.s32 16, %v6953_v19  ;;  %vm3423_vm15 = vcmask 195584  }
 0x10d   : > { %v758_v50 = vadd.f32 %v7532_v46, %v757_v13  ;;  %1791 = vperm.xlu0 %6945, %v1700_v44   ;;  %6578 = vmatprep.mubr.msk.f32.mxu0 %vm2194_vm0, %v850_v24  ;;  %v1341_v51 = vpop.permute.xlu1 %1340  ;;  %v1344_v21 = vpop.permute.xlu0 %1343 }
 0x10e   : > { %v853_v6 = vmax.f32 %v763_v49, 0.0  ;;  %vm1379_vm2 = vcmp.eq.s32.totalorder %v7470_v47, %v1341_v51  ;;  %6647 = vmatmul.mubr.msk.f32.gmra.mrb[58].mxu1 %vm2517_vm1, %v5865_v16  ;;  %vm1380_vm3 = vcmp.eq.s32.totalorder %v7470_v47, %v1344_v21  ;;  %6579 = vmatmul.mubr.msk.f32.gmra.mrb[46].mxu0 %vm2194_vm0, %v851_v45  ;;  %v6954_v45 = vld [vmem:[%s7134_s24 + $0x40] sm:$0xff] }
 0x10f   : > { %v852_v18 = vmax.f32 %v758_v50, 0.0  ;;  %v5866_v31 = vsel %vm1379_vm2, 1.0, %v10344_v52  ;;  %v5867_v54 = vsel %vm1380_vm3, 1.0, %v10344_v52  ;;  %v6478_v26 = vpop.f32.mrb[18].mxu0  ;;  %v1935_v24 = vadd.s32 16, %v6954_v45  ;;  %v6955_v50 = vld [vmem:[%s7134_s24 + $0x18] sm:$0xff] }
 0x110   : > { %v773_v8 = vadd.f32 %v6478_v26, %v7532_v46  ;;  %v767_v55 = vpop.f32.mrb[19].mxu0  ;;  %1782 = vperm.xlu1 %6946, %v1697_v34   ;;  %6649 = vmatprep.mubr.msk.f32.mxu1 %vm2517_vm1, %v5866_v31  ;;  %v1930_v51 = vadd.s32 16, %v6955_v50 }
 0x111   : > { %v768_v56 = vadd.f32 %v7532_v46, %v767_v55  ;;  %1797 = vperm.xlu0 %6945, %v1702_v53   ;;  %6581 = vmatprep.mubr.msk.f32.mxu0 %vm2194_vm0, %v852_v18  ;;  %v1347_v57 = vpop.permute.xlu1 %1346  ;;  %v1350_v58 = vpop.permute.xlu0 %1349 }
 0x112   : > { %vm1381_vm4 = vcmp.eq.s32.totalorder %v7470_v47, %v1347_v57  ;;  %6650 = vmatmul.mubr.msk.f32.gmra.mrb[60].mxu1 %vm2517_vm1, %v5867_v54  ;;  %vm1382_vm5 = vcmp.eq.s32.totalorder %v7470_v47, %v1350_v58  ;;  %6582 = vmatmul.mubr.msk.f32.gmra.mrb[48].mxu0 %vm2194_vm0, %v853_v6  ;;  %v855_v7 = vmax.f32 %v773_v8, 0.0  ;;  %v6956_v6 = vld [vmem:[%s7134_s24 + $0x50] sm:$0xff] }
 0x113   : > { %v854_v59 = vmax.f32 %v768_v56, 0.0  ;;  %v5868_v33 = vsel %vm1381_vm4, 1.0, %v10344_v52  ;;  %v5869_v60 = vsel %vm1382_vm5, 1.0, %v10344_v52  ;;  %v6481_v20 = vpop.f32.mrb[20].mxu0  ;;  %v1937_v18 = vadd.s32 16, %v6956_v6  ;;  %v6957_v56 = vld [vmem:[%s7134_s24 + $0x28] sm:$0xff] }
 0x114   : > { %v783_v28 = vadd.f32 %v6481_v20, %v7532_v46  ;;  %v777_v10 = vpop.f32.mrb[21].mxu0  ;;  %1788 = vperm.xlu1 %6946, %v1699_v36   ;;  %6652 = vmatprep.mubr.msk.f32.mxu1 %vm2517_vm1, %v5868_v33  ;;  %v1932_v57 = vadd.s32 16, %v6957_v56 }
 0x115   : > { %v778_v62 = vadd.f32 %v7532_v46, %v777_v10  ;;  %6948 = vset.pattern.permute.xlu0 %v7027_v5  ;;  %6584 = vmatprep.mubr.msk.f32.mxu0 %vm2194_vm0, %v854_v59 }
 0x116   : > { %6653 = vmatmul.mubr.msk.f32.gmra.mrb[62].mxu1 %vm2517_vm1, %v5869_v60  ;;  %1963 = vperm.xlu0 %6948, %v1928_v23   ;;  %v7673_v63 = vpop.permute.xlu1 %1448  ;;  %v7675_v12 = vpop.permute.xlu0 %1451  ;;  %v857_v17 = vmax.f32 %v783_v28, 0.0  ;;  %v6958_v23 = vld [vmem:[%s7134_s24 + $0x60] sm:$0xff] }
 0x117   : > { %v856_v2 = vmax.f32 %v778_v62, 0.0  ;;  %6585 = vmatmul.mubr.msk.f32.gmra.mrb[50].mxu0 %vm2194_vm0, %v855_v7  ;;  %v6484_v35 = vpop.f32.mrb[22].mxu0  ;;  %v1939_v7 = vadd.s32 16, %v6958_v23  ;;  %vm1543_vm1 = vcmp.eq.s32.totalorder %v7470_v47, %v7673_v63  ;;  %vm1544_vm6 = vcmp.eq.s32.totalorder %v7470_v47, %v7675_v12 }
 0x118   : > { %v793_v3 = vadd.f32 %v6484_v35, %v7532_v46  ;;  %v787_v30 = vpop.f32.mrb[23].mxu0  ;;  %1794 = vperm.xlu1 %6946, %v1701_v61   ;;  %v6959_v61 = vld [vmem:[%s7134_s24 + $0x38] sm:$0xff] }
 0x119   : > { %v788_v4 = vadd.f32 %v7532_v46, %v787_v30  ;;  %6587 = vmatprep.mubr.msk.f32.mxu0 %vm2194_vm0, %v856_v2  ;;  %v1934_v62 = vadd.s32 16, %v6959_v61  ;;  %v6974_v61 = vld [vmem:[%s7134_s24 + $0xe0] sm:$0xff] }
 0x11a   : > { %1972 = vperm.xlu0 %6948, %v1931_v1   ;;  %v7683_v9 = vpop.permute.xlu1 %1454  ;;  %v7685_v38 = vpop.permute.xlu0 %1460  ;;  %v859_v39 = vmax.f32 %v793_v3, 0.0  ;;  %v6960_v1 = vld [vmem:[%s7134_s24 + $0x70] sm:$0xff]  ;;  %v6961_v3 = vld [vmem:[%s7134_s24 + $0x48] sm:$0xff] }
 0x11b   : > { %v858_v40 = vmax.f32 %v788_v4, 0.0  ;;  %6588 = vmatmul.mubr.msk.f32.gmra.mrb[52].mxu0 %vm2194_vm0, %v857_v17  ;;  %v6487_v41 = vpop.f32.mrb[24].mxu0  ;;  %v1941_v17 = vadd.s32 16, %v6960_v1  ;;  %v1936_v30 = vadd.s32 16, %v6961_v3  ;;  %v6975_v1 = vld [vmem:[%s7134_s24 + $0xb8] sm:$0xff]  ;;  %v6976_v3 = vld [vmem:[%s7134_s24 + $0xf0] sm:$0xff]  ;;  %vm1545_vm7 = vcmp.eq.s32.totalorder %v7470_v47, %v7683_v9 }
 0x11c   : > { %v803_v42 = vadd.f32 %v6487_v41, %v7532_v46  ;;  %v797_v0 = vpop.f32.mrb[25].mxu0  ;;  %6947 = vset.pattern.permute.xlu1 %v7027_v5  ;;  %vm1547_vm8 = vcmp.eq.s32.totalorder %v7470_v47, %v7685_v38  ;;  %v10480_v9 = vmov 0.0  }
 0x11d   : > { %v798_v32 = vadd.f32 %v7532_v46, %v797_v0  ;;  %6590 = vmatprep.mubr.msk.f32.mxu0 %vm2194_vm0, %v858_v40  ;;  %1960 = vperm.xlu1 %6947, %v1927_v22   ;;  %v6962_v22 = vld [vmem:[%s7134_s24 + $0x80] sm:$0xff]  ;;  %v5870_v38 = vsel %vm1543_vm1, 1.0, %v10480_v9 }
 0x11e   : > { %1978 = vperm.xlu0 %6948, %v1933_v27   ;;  %v7693_v43 = vpop.permute.xlu1 %1457  ;;  %v7695_v44 = vpop.permute.xlu0 %1466  ;;  %v861_v29 = vmax.f32 %v803_v42, 0.0  ;;  %v1943_v14 = vadd.s32 16, %v6962_v22  ;;  %v6963_v27 = vld [vmem:[%s7134_s24 + $0x58] sm:$0xff]  ;;  %v6964_v42 = vld [vmem:[%s7134_s24 + $0x90] sm:$0xff]  ;;  %v6977_v22 = vld [vmem:[%s7134_s24 + $0xc8] sm:$0xff] }
 0x11f   : > { %v860_v16 = vmax.f32 %v798_v32, 0.0  ;;  %6591 = vmatmul.mubr.msk.f32.gmra.mrb[54].mxu0 %vm2194_vm0, %v859_v39  ;;  %v6490_v48 = vpop.f32.mrb[26].mxu0  ;;  %v1938_v39 = vadd.s32 16, %v6963_v27  ;;  %v1945_v0 = vadd.s32 16, %v6964_v42  ;;  %v6965_v32 = vld [vmem:[%s7134_s24 + $0x68] sm:$0xff]  ;;  %v6978_v42 = vld [vmem:[%s7134_s24 + $0xd8] sm:$0xff]  ;;  %vm1546_vm9 = vcmp.eq.s32.totalorder %v7470_v47, %v7693_v43 }
 0x120   : > { %v813_v49 = vadd.f32 %v6490_v48, %v7532_v46  ;;  %v807_v13 = vpop.f32.mrb[27].mxu0  ;;  %v1940_v19 = vadd.s32 16, %v6965_v32  ;;  %vm1549_vm10 = vcmp.eq.s32.totalorder %v7470_v47, %v7695_v44 }
 0x121   : > { %v808_v34 = vadd.f32 %v7532_v46, %v807_v13  ;;  %6593 = vmatprep.mubr.msk.f32.mxu0 %vm2194_vm0, %v860_v16  ;;  %1966 = vperm.xlu1 %6947, %v1929_v11   ;;  %v6967_v16 = vld [vmem:[%s7134_s24 + $0x78] sm:$0xff] }
 0x122   : > { %1984 = vperm.xlu0 %6948, %v1935_v24   ;;  %v7703_v21 = vpop.permute.xlu1 %1463  ;;  %v7705_v53 = vpop.permute.xlu0 %1472  ;;  %v863_v31 = vmax.f32 %v813_v49, 0.0  ;;  %v6966_v24 = vld [vmem:[%s7134_s24 + $0xa0] sm:$0xff]  ;;  %v1942_v48 = vadd.s32 16, %v6967_v16 }
 0x123   : > { %v862_v54 = vmax.f32 %v808_v34, 0.0  ;;  %6594 = vmatmul.mubr.msk.f32.gmra.mrb[56].mxu0 %vm2194_vm0, %v861_v29  ;;  %v6493_v26 = vpop.f32.mrb[28].mxu0  ;;  %v1947_v29 = vadd.s32 16, %v6966_v24  ;;  %v6968_v34 = vld [vmem:[%s7134_s24 + $0xb0] sm:$0xff]  ;;  %v6979_v24 = vld [vmem:[%s7134_s24 + $0xe8] sm:$0xff]  ;;  %vm1548_vm11 = vcmp.eq.s32.totalorder %v7470_v47, %v7703_v21  ;;  %vm1551_vm12 = vcmp.eq.s32.totalorder %v7470_v47, %v7705_v53 }
 0x124   : > { %v823_v8 = vadd.f32 %v6493_v26, %v7532_v46  ;;  %v817_v55 = vpop.f32.mrb[29].mxu0  ;;  %v1949_v50 = vadd.s32 16, %v6968_v34  ;;  %v6980_v34 = vld [vmem:[%s7134_s24 + $0xf8] sm:$0xff]  ;;  %v8067_v21 = vsel %vm1546_vm9, 1.0, %v10480_v9 }
 0x125   : > { %v818_v36 = vadd.f32 %v7532_v46, %v817_v55  ;;  %6596 = vmatprep.mubr.msk.f32.mxu0 %vm2194_vm0, %v862_v54  ;;  %1969 = vperm.xlu1 %6947, %v1930_v51   ;;  %v6969_v51 = vld [vmem:[%s7134_s24 + $0x88] sm:$0xff]  ;;  %v6970_v54 = vld [vmem:[%s7134_s24 + $0xc0] sm:$0xff] }
 0x126   : > { %1990 = vperm.xlu0 %6948, %v1937_v18   ;;  %v7713_v58 = vpop.permute.xlu1 %1469  ;;  %v7715_v15 = vpop.permute.xlu0 %1478  ;;  %v865_v59 = vmax.f32 %v823_v8, 0.0  ;;  %v1944_v6 = vadd.s32 16, %v6969_v51  ;;  %v1951_v26 = vadd.s32 16, %v6970_v54  ;;  %v6971_v8 = vld [vmem:[%s7134_s24 + $0x98] sm:$0xff] }
 0x127   : > { %v864_v33 = vmax.f32 %v818_v36, 0.0  ;;  %6597 = vmatmul.mubr.msk.f32.gmra.mrb[58].mxu0 %vm2194_vm0, %v863_v31  ;;  %v6496_v60 = vpop.f32.mrb[30].mxu0  ;;  %v1946_v55 = vadd.s32 16, %v6971_v8  ;;  %vm1550_vm13 = vcmp.eq.s32.totalorder %v7470_v47, %v7713_v58  ;;  %vm1553_vm2 = vcmp.eq.s32.totalorder %v7470_v47, %v7715_v15 }
 0x128   : > { %v833_v20 = vadd.f32 %v6496_v60, %v7532_v46  ;;  %v827_v28 = vpop.f32.mrb[31].mxu0 }
 0x129   : > { %v828_v10 = vadd.f32 %v7532_v46, %v827_v28  ;;  %6599 = vmatprep.mubr.msk.f32.mxu0 %vm2194_vm0, %v864_v33  ;;  %1975 = vperm.xlu1 %6947, %v1932_v57   ;;  %v6972_v57 = vld [vmem:[%s7134_s24 + $0xd0] sm:$0xff]  ;;  %v6973_v33 = vld [vmem:[%s7134_s24 + $0xa8] sm:$0xff] }
 0x12a   : > { %1996 = vperm.xlu0 %6948, %v1939_v7   ;;  %v7723_v5 = vpop.permute.xlu1 %1475  ;;  %v7725_v25 = vpop.permute.xlu0 %1484  ;;  %v867_v2 = vmax.f32 %v833_v20, 0.0  ;;  %v1953_v23 = vadd.s32 16, %v6972_v57  ;;  %v3937_v7 = vld [vmem:[%s10333_s8] sm:$0xff]  ;;  %v1948_v60 = vadd.s32 16, %v6973_v33 }
 0x12b   : > { %v866_v35 = vmax.f32 %v828_v10, 0.0  ;;  %6600 = vmatmul.mubr.msk.f32.gmra.mrb[60].mxu0 %vm2194_vm0, %v865_v59  ;;  %v3938_v59 = vld [vmem:[%s10333_s8 + $0x8] sm:$0xff]  ;;  %vm1552_vm3 = vcmp.eq.s32.totalorder %v7470_v47, %v7723_v5  ;;  %vm1555_vm4 = vcmp.eq.s32.totalorder %v7470_v47, %v7725_v25 }
 0x12c   : > { %v6905_v20 = vpack.c.bf16 %v3938_v59, %v3937_v7  ;;  %v3939_v7 = vld [vmem:[%s10333_s8 + $0x10] sm:$0xff]  ;;  %v3940_v59 = vld [vmem:[%s10333_s8 + $0x18] sm:$0xff]  ;;  %v8131_v53 = vsel %vm1552_vm3, 1.0, %v10480_v9 }
 0x12d   : > { %6602 = vmatprep.mubr.msk.f32.mxu0 %vm2194_vm0, %v866_v35  ;;  %1981 = vperm.xlu1 %6947, %v1934_v62   ;;  %v1955_v62 = vadd.s32 16, %v6974_v61 }
 0x12e   : > { %2002 = vperm.xlu0 %6948, %v1941_v17   ;;  %v7731_v4 = vpop.permute.xlu1 %1481  ;;  %v7733_v37 = vpop.permute.xlu0 %1490  ;;  %6906 = vmatprep.subr.bf16.mxu0 %v6905_v20  ;;  %v1950_v17 = vadd.s32 16, %v6975_v1 }
 0x12f   : > { %6603 = vmatmul.mubr.msk.f32.gmra.mrb[62].mxu0 %vm2194_vm0, %v867_v2  ;;  %vm1554_vm5 = vcmp.eq.s32.totalorder %v7470_v47, %v7731_v4 }
 0x130   : > { %v8149_v5 = vsel %vm1554_vm5, 1.0, %v10480_v9 }
 0x131   : > { %1987 = vperm.xlu1 %6947, %v1936_v30   ;;  %v1957_v30 = vadd.s32 16, %v6976_v3 }
 0x132   : > { %2008 = vperm.xlu0 %6948, %v1943_v14   ;;  %v7738_v40 = vpop.permute.xlu1 %1487  ;;  %v7740_v41 = vpop.permute.xlu0 %1496  ;;  %v1952_v14 = vadd.s32 16, %v6977_v22 }
 0x133   : > { %vm1556_vm9 = vcmp.eq.s32.totalorder %v7470_v47, %v7738_v40 }
 0x135   : > { %1993 = vperm.xlu1 %6947, %v1938_v39  }
 0x136   : > { %2014 = vperm.xlu0 %6948, %v1945_v0   ;;  %v7744_v11 = vpop.permute.xlu1 %1493  ;;  %v7746_v45 = vpop.permute.xlu0 %1502  ;;  %v1954_v0 = vadd.s32 16, %v6978_v42 }
 0x139   : > { %1999 = vperm.xlu1 %6947, %v1940_v19  }
 0x13a   : > { %2020 = vperm.xlu0 %6948, %v1947_v29   ;;  %v7750_v49 = vpop.permute.xlu1 %1499  ;;  %v7752_v13 = vpop.permute.xlu0 %1508  ;;  %v1956_v29 = vadd.s32 16, %v6979_v24 }
 0x13d   : > { %2005 = vperm.xlu1 %6947, %v1942_v48  }
 0x13e   : > { %2026 = vperm.xlu0 %6948, %v1949_v50   ;;  %v7756_v18 = vpop.permute.xlu1 %1505  ;;  %v7758_v31 = vpop.permute.xlu0 %1514  ;;  %v1958_v50 = vadd.s32 16, %v6980_v34 }
 0x141   : > { %2011 = vperm.xlu1 %6947, %v1944_v6  }
 0x142   : > { %2032 = vperm.xlu0 %6948, %v1951_v26   ;;  %v7762_v36 = vpop.permute.xlu1 %1511  ;;  %v7764_v56 = vpop.permute.xlu0 %1520 }
 0x145   : > { %2017 = vperm.xlu1 %6947, %v1946_v55  }
 0x146   : > { %2038 = vperm.xlu0 %6948, %v1953_v23   ;;  %v7774_v28 = vpop.permute.xlu1 %1517  ;;  %v7776_v10 = vpop.permute.xlu0 %1526 }
 0x149   : > { %2023 = vperm.xlu1 %6947, %v1948_v60  }
 0x14a   : > { %2044 = vperm.xlu0 %6948, %v1955_v62   ;;  %v7780_v2 = vpop.permute.xlu1 %1523  ;;  %v7782_v35 = vpop.permute.xlu0 %1532 }
 0x14d   : > { %2029 = vperm.xlu1 %6947, %v1950_v17  }
 0x14e   : > { %2050 = vperm.xlu0 %6948, %v1957_v30   ;;  %v7786_v27 = vpop.permute.xlu1 %1529  ;;  %v7788_v39 = vpop.permute.xlu0 %1538  ;;  %v6909_v30 = vpack.c.bf16 %v3940_v59, %v3939_v7 }
 0x151   : > { %2035 = vperm.xlu1 %6947, %v1952_v14  }
 0x152   : > { %v7791_v32 = vpop.permute.xlu1 %1535 }
 0x153   : > { %10440 = vst [vmem:[#allocation3_spill] sm:$0xff] %v7791_v32  ;;  %v7793_v19 = vpop.permute.xlu0 %1704 }
 0x154   : > { %vm1799_vm14 = vcmp.eq.s32.totalorder %v7470_v47, %v7793_v19 }
 0x155   : > { %2041 = vperm.xlu1 %6947, %v1954_v0   ;;  %v5902_v15 = vsel %vm1799_vm14, 1.0, %v10480_v9 }
 0x156   : > { %v7796_v16 = vpop.permute.xlu1 %1541  ;;  %v1895_v4 = vadd.f32 %v5902_v15, %v5870_v38  ;;  %v8185_v15 = vsel %vm1556_vm9, 1.0, %v10480_v9 }
 0x157   : > { %10441 = vst [vmem:[#allocation4_spill] sm:$0xff] %v7796_v16  ;;  %v7798_v48 = vpop.permute.xlu0 %1713 }
 0x159   : > { %2047 = vperm.xlu1 %6947, %v1956_v29  }
 0x15b   : > { %v7801_v51 = vpop.permute.xlu1 %1707 }
 0x15c   : > { %v7803_v6 = vpop.permute.xlu0 %1719  ;;  %vm1800_vm1 = vcmp.eq.s32.totalorder %v7470_v47, %v7801_v51 }
 0x15d   : > { %2053 = vperm.xlu1 %6947, %v1958_v50  }
 0x15f   : > { %v7805_v54 = vpop.permute.xlu1 %1710 }
 0x160   : > { %v7807_v26 = vpop.permute.xlu0 %1725  ;;  %v6503_v8 = vpop.f32.mrb[0].mxu1 }
 0x161   : > { %v7810_v55 = vadd.f32 %v6503_v8, %v7532_v46  ;;  %v1062_v57 = vpop.f32.mrb[1].mxu1 }
 0x162   : > { %v7813_v23 = vadd.f32 %v7532_v46, %v1062_v57 }
 0x163   : > { %10442 = vst [vmem:[#allocation5_spill] sm:$0xff] %v7810_v55  ;;  %v10342_v33 = vmax.f32 %v7810_v55, 0.0  ;;  %v7822_v60 = vpop.permute.xlu1 %1716 }
 0x164   : > { %10443 = vst [vmem:[#allocation6_spill] sm:$0xff] %v7813_v23  ;;  %v10343_v61 = vmax.f32 %v7813_v23, 0.0  ;;  %v7825_v62 = vpop.permute.xlu0 %1731  ;;  %v6506_v1 = vpop.f32.mrb[2].mxu1  ;;  %vm1803_vm14 = vcmp.eq.s32.totalorder %v7470_v47, %v7822_v60 }
 0x165   : > { %v7828_v17 = vadd.f32 %v6506_v1, %v7532_v46  ;;  %v1072_v3 = vpop.f32.mrb[3].mxu1 }
 0x166   : > { %v7831_v22 = vadd.f32 %v7532_v46, %v1072_v3  ;;  %6663 = vmatprep.mubr.msk.f32.mxu0 %vm2194_vm0, %v10343_v61 }
 0x167   : > { %10444 = vst [vmem:[#allocation7_spill] sm:$0xff] %v7828_v17  ;;  %v7836_v14 = vpop.permute.xlu1 %1722  ;;  %6664 = vmatmul.mubr.msk.f32.vlgmr.msra.gmra.mrb[64].mxu0 %vm2194_vm0, %v10342_v33  ;;  %v10340_v29 = vmax.f32 %v7828_v17, 0.0 }
 0x168   : > { %10445 = vst [vmem:[#allocation8_spill] sm:$0xff] %v7831_v22  ;;  %v10341_v42 = vmax.f32 %v7831_v22, 0.0  ;;  %v7842_v0 = vpop.permute.xlu0 %1737  ;;  %v6509_v24 = vpop.f32.mrb[4].mxu1  ;;  %6908 = vmatpush3.bf16.msra.mxu0 %v6905_v20 }
 0x169   : > { %v7846_v34 = vadd.f32 %v6509_v24, %v7532_v46  ;;  %v1082_v50 = vpop.f32.mrb[5].mxu1  ;;  %6910 = vmatprep.subr.bf16.mxu0 %v6909_v30 }
 0x16a   : > { %v7849_v8 = vadd.f32 %v7532_v46, %v1082_v50  ;;  %6666 = vmatprep.mubr.msk.f32.mxu0 %vm2194_vm0, %v10341_v42 }
 0x16b   : > { %10446 = vst [vmem:[#allocation9_spill] sm:$0xff] %v7846_v34  ;;  %v7854_v57 = vpop.permute.xlu1 %1728  ;;  %6667 = vmatmul.mubr.msk.f32.gmra.mrb[66].mxu0 %vm2194_vm0, %v10340_v29  ;;  %v10347_v1 = vmax.f32 %v7846_v34, 0.0 }
 0x16c   : > { %10447 = vst [vmem:[#allocation10_spill] sm:$0xff] %v7849_v8  ;;  %v10346_v20 = vmax.f32 %v7849_v8, 0.0  ;;  %v7860_v7 = vpop.permute.xlu0 %1743  ;;  %v6512_v59 = vpop.f32.mrb[6].mxu1  ;;  %6912 = vmatpush3.bf16.msra.mxu0 %v6909_v30 }
 0x16d   : > { %v7864_v3 = vadd.f32 %v6512_v59, %v7532_v46  ;;  %v1092_v24 = vpop.f32.mrb[7].mxu1 }
 0x16e   : > { %v7867_v50 = vadd.f32 %v7532_v46, %v1092_v24  ;;  %6669 = vmatprep.mubr.msk.f32.mxu0 %vm2194_vm0, %v10346_v20 }
 0x16f   : > { %10448 = vst [vmem:[#allocation11_spill] sm:$0xff] %v7864_v3  ;;  %v7872_v29 = vpop.permute.xlu1 %1734  ;;  %6670 = vmatmul.mubr.msk.f32.gmra.mrb[68].mxu0 %vm2194_vm0, %v10347_v1  ;;  %v10353_v33 = vmax.f32 %v7864_v3, 0.0 }
 0x170   : > { %10449 = vst [vmem:[#allocation12_spill] sm:$0xff] %v7867_v50  ;;  %v10352_v30 = vmax.f32 %v7867_v50, 0.0  ;;  %v7878_v42 = vpop.permute.xlu0 %1749  ;;  %v6515_v59 = vpop.f32.mrb[8].mxu1 }
 0x171   : > { %v7882_v24 = vadd.f32 %v6515_v59, %v7532_v46  ;;  %v1102_v61 = vpop.f32.mrb[9].mxu1 }
 0x172   : > { %v7885_v52 = vadd.f32 %v7532_v46, %v1102_v61  ;;  %6672 = vmatprep.mubr.msk.f32.mxu0 %vm2194_vm0, %v10352_v30 }
 0x173   : > { %10450 = vst [vmem:[#allocation13_spill] sm:$0xff] %v7882_v24  ;;  %v7890_v20 = vpop.permute.xlu1 %1740  ;;  %6673 = vmatmul.mubr.msk.f32.gmra.mrb[70].mxu0 %vm2194_vm0, %v10353_v33  ;;  %v10359_v8 = vmax.f32 %v7882_v24, 0.0 }
 0x174   : > { %10451 = vst [vmem:[#allocation14_spill] sm:$0xff] %v7885_v52  ;;  %v10358_v1 = vmax.f32 %v7885_v52, 0.0  ;;  %v7896_v34 = vpop.permute.xlu0 %1755  ;;  %v6518_v59 = vpop.f32.mrb[10].mxu1 }
 0x175   : > { %v7900_v61 = vadd.f32 %v6518_v59, %v7532_v46  ;;  %v1112_v17 = vpop.f32.mrb[11].mxu1 }
 0x176   : > { %v7903_v50 = vadd.f32 %v7532_v46, %v1112_v17  ;;  %6675 = vmatprep.mubr.msk.f32.mxu0 %vm2194_vm0, %v10358_v1 }
 0x177   : > { %10452 = vst [vmem:[#allocation15_spill] sm:$0xff] %v7900_v61  ;;  %v7908_v30 = vpop.permute.xlu1 %1746  ;;  %6676 = vmatmul.mubr.msk.f32.gmra.mrb[72].mxu0 %vm2194_vm0, %v10359_v8  ;;  %v10365_v22 = vmax.f32 %v7900_v61, 0.0 }
 0x178   : > { %10453 = vst [vmem:[#allocation16_spill] sm:$0xff] %v7903_v50  ;;  %v10364_v33 = vmax.f32 %v7903_v50, 0.0  ;;  %v7914_v3 = vpop.permute.xlu0 %1761  ;;  %v6521_v59 = vpop.f32.mrb[12].mxu1 }
 0x179   : > { %10454 = vst [vmem:[#allocation17_spill] sm:$0xff] %v7914_v3  ;;  %v7918_v17 = vadd.f32 %v6521_v59, %v7532_v46  ;;  %v1122_v55 = vpop.f32.mrb[13].mxu1 }
 0x17a   : > { %v7921_v52 = vadd.f32 %v7532_v46, %v1122_v55  ;;  %6678 = vmatprep.mubr.msk.f32.mxu0 %vm2194_vm0, %v10364_v33 }
 0x17b   : > { %10455 = vst [vmem:[#allocation18_spill] sm:$0xff] %v7918_v17  ;;  %v7926_v1 = vpop.permute.xlu1 %1752  ;;  %6679 = vmatmul.mubr.msk.f32.gmra.mrb[74].mxu0 %vm2194_vm0, %v10365_v22  ;;  %v10369_v23 = vmax.f32 %v7918_v17, 0.0 }
 0x17c   : > { %10456 = vst [vmem:[#allocation19_spill] sm:$0xff] %v7921_v52  ;;  %v10368_v8 = vmax.f32 %v7921_v52, 0.0  ;;  %v7932_v24 = vpop.permute.xlu0 %1767  ;;  %v6524_v59 = vpop.f32.mrb[14].mxu1 }
 0x17d   : > { %10457 = vst [vmem:[#allocation20_spill] sm:$0xff] %v7932_v24  ;;  %v7936_v55 = vadd.f32 %v6524_v59, %v7532_v46  ;;  %v1132_v16 = vpop.f32.mrb[15].mxu1 }
 0x17e   : > { %v7939_v50 = vadd.f32 %v7532_v46, %v1132_v16  ;;  %6681 = vmatprep.mubr.msk.f32.mxu0 %vm2194_vm0, %v10368_v8 }
 0x17f   : > { %10458 = vst [vmem:[#allocation21_spill] sm:$0xff] %v7936_v55  ;;  %v7944_v33 = vpop.permute.xlu1 %1758  ;;  %6682 = vmatmul.mubr.msk.f32.gmra.mrb[76].mxu0 %vm2194_vm0, %v10369_v23  ;;  %v10375_v24 = vmax.f32 %v7936_v55, 0.0 }
 0x180   : > { %10459 = vst [vmem:[#allocation22_spill] sm:$0xff] %v7939_v50  ;;  %10460 = vst [vmem:[#allocation23_spill] sm:$0xff] %v7944_v33  ;;  %v10374_v22 = vmax.f32 %v7939_v50, 0.0  ;;  %v7950_v61 = vpop.permute.xlu0 %1773  ;;  %v6527_v59 = vpop.f32.mrb[16].mxu1 }
 0x181   : > { %10461 = vst [vmem:[#allocation24_spill] sm:$0xff] %v7950_v61  ;;  %v7954_v16 = vadd.f32 %v6527_v59, %v7532_v46  ;;  %v1142_v3 = vpop.f32.mrb[17].mxu1 }
 0x182   : > { %v7957_v52 = vadd.f32 %v7532_v46, %v1142_v3  ;;  %6684 = vmatprep.mubr.msk.f32.mxu0 %vm2194_vm0, %v10374_v22 }
 0x183   : > { %10462 = vst [vmem:[#allocation25_spill] sm:$0xff] %v7954_v16  ;;  %v7962_v8 = vpop.permute.xlu1 %1764  ;;  %6685 = vmatmul.mubr.msk.f32.gmra.mrb[78].mxu0 %vm2194_vm0, %v10375_v24  ;;  %v10381_v61 = vmax.f32 %v7954_v16, 0.0 }
 0x184   : > { %10463 = vst [vmem:[#allocation26_spill] sm:$0xff] %v7957_v52  ;;  %10464 = vst [vmem:[#allocation27_spill] sm:$0xff] %v7962_v8  ;;  %v10380_v23 = vmax.f32 %v7957_v52, 0.0  ;;  %v7968_v17 = vpop.permute.xlu0 %1779  ;;  %v6530_v59 = vpop.f32.mrb[18].mxu1 }
 0x185   : > { %10465 = vst [vmem:[#allocation28_spill] sm:$0xff] %v7968_v17  ;;  %v7972_v3 = vadd.f32 %v6530_v59, %v7532_v46  ;;  %v1152_v33 = vpop.f32.mrb[19].mxu1 }
 0x186   : > { %v7975_v50 = vadd.f32 %v7532_v46, %v1152_v33  ;;  %6687 = vmatprep.mubr.msk.f32.mxu0 %vm2194_vm0, %v10380_v23 }
 0x187   : > { %10466 = vst [vmem:[#allocation29_spill] sm:$0xff] %v7972_v3  ;;  %v7980_v22 = vpop.permute.xlu1 %1770  ;;  %6688 = vmatmul.mubr.msk.f32.gmra.mrb[80].mxu0 %vm2194_vm0, %v10381_v61  ;;  %v10387_v17 = vmax.f32 %v7972_v3, 0.0 }
 0x188   : > { %10467 = vst [vmem:[#allocation30_spill] sm:$0xff] %v7975_v50  ;;  %10468 = vst [vmem:[#allocation31_spill] sm:$0xff] %v7980_v22  ;;  %v10385_v24 = vmax.f32 %v7975_v50, 0.0  ;;  %v7986_v55 = vpop.permute.xlu0 %1785  ;;  %v6533_v59 = vpop.f32.mrb[20].mxu1 }
 0x189   : > { %10469 = vst [vmem:[#allocation32_spill] sm:$0xff] %v7986_v55  ;;  %v7990_v33 = vadd.f32 %v6533_v59, %v7532_v46  ;;  %v1162_v8 = vpop.f32.mrb[21].mxu1 }
 0x18a   : > { %v7993_v52 = vadd.f32 %v7532_v46, %v1162_v8  ;;  %6690 = vmatprep.mubr.msk.f32.mxu0 %vm2194_vm0, %v10385_v24 }
 0x18b   : > { %10470 = vst [vmem:[#allocation33_spill] sm:$0xff] %v7990_v33  ;;  %v7998_v23 = vpop.permute.xlu1 %1776  ;;  %6691 = vmatmul.mubr.msk.f32.gmra.mrb[82].mxu0 %vm2194_vm0, %v10387_v17  ;;  %v10388_v55 = vmax.f32 %v7990_v33, 0.0  ;;  %v5871_v17 = vsel %vm1544_vm6, 1.0, %v10480_v9  ;;  %vm1557_vm6 = vcmp.eq.s32.totalorder %v7470_v47, %v7733_v37 }
 0x18c   : > { %10471 = vst [vmem:[#allocation34_spill] sm:$0xff] %v7993_v52  ;;  %10472 = vst [vmem:[#allocation35_spill] sm:$0xff] %v7998_v23  ;;  %v10386_v61 = vmax.f32 %v7993_v52, 0.0  ;;  %v8004_v16 = vpop.permute.xlu0 %1791  ;;  %v6536_v59 = vpop.f32.mrb[22].mxu1  ;;  %v8164_v25 = vsel %vm1557_vm6, 1.0, %v10480_v9  ;;  %vm1563_vm6 = vcmp.eq.s32.totalorder %v7470_v47, %v7752_v13 }
 0x18d   : > { %10473 = vst [vmem:[#allocation36_spill] sm:$0xff] %v8004_v16  ;;  %v8008_v8 = vadd.f32 %v6536_v59, %v7532_v46  ;;  %v1172_v22 = vpop.f32.mrb[23].mxu1  ;;  %10492 = vst [vmem:[#allocation49_spill] sm:$0xff] %v8164_v25 }
 0x18e   : > { %v8011_v50 = vadd.f32 %v7532_v46, %v1172_v22  ;;  %6693 = vmatprep.mubr.msk.f32.mxu0 %vm2194_vm0, %v10386_v61 }
 0x18f   : > { %10474 = vst [vmem:[#allocation37_spill] sm:$0xff] %v8008_v8  ;;  %v8016_v24 = vpop.permute.xlu1 %1782  ;;  %6694 = vmatmul.mubr.msk.f32.gmra.mrb[84].mxu0 %vm2194_vm0, %v10388_v55  ;;  %v10482_v44 = vmax.f32 %v8008_v8, 0.0  ;;  %v6981_v8 = vld [vmem:[%s10327_s2] ss:$0 sm:$0xff] }
 0x190   : > { %10475 = vst [vmem:[#allocation38_spill] sm:$0xff] %v8011_v50  ;;  %10476 = vst [vmem:[#allocation39_spill] sm:$0xff] %v8016_v24  ;;  %v10389_v22 = vmax.f32 %v8011_v50, 0.0  ;;  %v8028_v59 = vpop.permute.xlu0 %1797  ;;  %v6539_v61 = vpop.f32.mrb[24].mxu1  ;;  %v8070_v50 = vsel %vm1549_vm10, 1.0, %v10480_v9 }
 0x191   : > { %10477 = vst [vmem:[#allocation40_spill] sm:$0xff] %v8028_v59  ;;  %v8034_v55 = vadd.f32 %v6539_v61, %v7532_v46  ;;  %v1182_v63 = vpop.f32.mrb[25].mxu1  ;;  %v8049_v61 = vsel %vm1545_vm7, 1.0, %v10480_v9 }
 0x192   : > { %v8041_v12 = vadd.f32 %v7532_v46, %v1182_v63  ;;  %6696 = vmatprep.mubr.msk.f32.mxu0 %vm2194_vm0, %v10389_v22  ;;  %v8059_v46 = vsel %vm1547_vm8, 1.0, %v10480_v9  ;;  %vm1801_vm8 = vcmp.eq.s32.totalorder %v7470_v47, %v7805_v54 }
 0x193   : > { %10478 = vst [vmem:[#allocation41_spill] sm:$0xff] %v8034_v55  ;;  %v8053_v43 = vpop.permute.xlu1 %1788  ;;  %6697 = vmatmul.mubr.msk.f32.gmra.mrb[86].mxu0 %vm2194_vm0, %v10482_v44  ;;  %v8098_v44 = vsel %vm1550_vm13, 1.0, %v10480_v9  ;;  %v5904_v32 = vsel %vm1801_vm8, 1.0, %v10480_v9  ;;  %vm1558_vm13 = vcmp.eq.s32.totalorder %v7470_v47, %v7744_v11 }
 0x194   : > { %10479 = vst [vmem:[#allocation42_spill] sm:$0xff] %v8041_v12  ;;  %10481 = vst [vmem:[#allocation43_spill] sm:$0xff] %v8053_v43  ;;  %v6542_v22 = vpop.f32.mrb[26].mxu1  ;;  %v8079_v43 = vsel %vm1548_vm11, 1.0, %v10480_v9  ;;  %v10485_v59 = vmax.f32 %v8041_v12, 0.0  ;;  %vm1559_vm11 = vcmp.eq.s32.totalorder %v7470_v47, %v7740_v41  ;;  %v8234_v41 = vsel %vm1558_vm13, 1.0, %v10480_v9 }
 0x195   : > { %v8076_v33 = vadd.f32 %v6981_v8, %v6542_v22  ;;  %v1964_v52 = vpop.permute.xlu0 %1963  ;;  %v1192_v3 = vpop.f32.mrb[27].mxu1  ;;  %v8092_v22 = vsel %vm1551_vm12, 1.0, %v10480_v9  ;;  %vm1802_vm12 = vcmp.eq.s32.totalorder %v7470_v47, %v7798_v48  ;;  %v1897_v48 = vadd.f32 %v5904_v32, %v8049_v61 }
 0x196   : > { %v8083_v63 = vadd.f32 %v6981_v8, %v1192_v3  ;;  %6699 = vmatprep.mubr.msk.f32.mxu0 %vm2194_vm0, %v10485_v59  ;;  %v10487_v59 = vmax.f32 %v8034_v55, 0.0  ;;  %vm2056_vm7 = vcmp.eq.s32.totalorder %v7470_v47, %v1964_v52  ;;  %v5903_v52 = vsel %vm1800_vm1, 1.0, %v10480_v9 }
 0x197   : > { %10483 = vst [vmem:[#allocation44_spill] sm:$0xff] %v8076_v33  ;;  %v8104_v3 = vpop.permute.xlu1 %1794  ;;  %v5935_v54 = vsel %vm2056_vm7, 1.0, %v10480_v9  ;;  %v1896_v23 = vadd.f32 %v5903_v52, %v5871_v17  ;;  %v8219_v32 = vsel %vm1559_vm11, 1.0, %v10480_v9  ;;  %vm1804_vm1 = vcmp.eq.s32.totalorder %v7470_v47, %v7803_v6 }
 0x198   : > { %10484 = vst [vmem:[#allocation45_spill] sm:$0xff] %v8083_v63  ;;  %10486 = vst [vmem:[#allocation46_spill] sm:$0xff] %v8104_v3  ;;  %6700 = vmatmul.mubr.msk.f32.gmra.mrb[88].mxu0 %vm2194_vm0, %v10487_v59  ;;  %v6545_v58 = vpop.f32.mrb[28].mxu1  ;;  %v8128_v3 = vsel %vm1553_vm2, 1.0, %v10480_v9  ;;  %v10490_v19 = vmax.f32 %v8083_v63, 0.0  ;;  %vm1561_vm2 = vcmp.eq.s32.totalorder %v7470_v47, %v7746_v45  ;;  %v5906_v61 = vsel %vm1803_vm14, 1.0, %v10480_v9 }
 0x199   : > { %v8123_v59 = vadd.f32 %v6981_v8, %v6545_v58  ;;  %v8125_v55 = vpop.permute.xlu0 %1972  ;;  %v1202_v12 = vpop.f32.mrb[29].mxu1  ;;  %v8143_v58 = vsel %vm1555_vm4, 1.0, %v10480_v9  ;;  %v2152_v40 = vadd.f32 %v5935_v54, %v1896_v23  ;;  %vm1560_vm4 = vcmp.eq.s32.totalorder %v7470_v47, %v7750_v49 }
 0x19a   : > { %v8134_v24 = vadd.f32 %v6981_v8, %v1202_v12  ;;  %6702 = vmatprep.mubr.msk.f32.mxu0 %vm2194_vm0, %v10490_v19  ;;  %v10491_v12 = vmax.f32 %v8076_v33, 0.0  ;;  %v5905_v23 = vsel %vm1802_vm12, 1.0, %v10480_v9  ;;  %vm2059_vm5 = vcmp.eq.s32.totalorder %v7470_v47, %v8125_v55 }
 0x19b   : > { %10488 = vst [vmem:[#allocation47_spill] sm:$0xff] %v8123_v59  ;;  %v10408_v33 = vmax.f32 %v8123_v59, 0.0  ;;  %v8240_v6 = vsel %vm1561_vm2, 1.0, %v10480_v9  ;;  %vm1805_vm7 = vcmp.eq.s32.totalorder %v7470_v47, %v7836_v14  ;;  %v8250_v11 = vsel %vm1560_vm4, 1.0, %v10480_v9 }
 0x19c   : > { %10489 = vst [vmem:[#allocation48_spill] sm:$0xff] %v8134_v24  ;;  %6703 = vmatmul.mubr.msk.f32.gmra.mrb[90].mxu0 %vm2194_vm0, %v10491_v12  ;;  %v10409_v51 = vmax.f32 %v8134_v24, 0.0  ;;  %v6548_v19 = vpop.f32.mrb[30].mxu1  ;;  %v1961_v63 = vpop.permute.xlu1 %1960  ;;  %v1898_v54 = vadd.f32 %v5905_v23, %v8067_v21  ;;  %v5938_v45 = vsel %vm2059_vm5, 1.0, %v10480_v9  ;;  %v5907_v14 = vsel %vm1804_vm1, 1.0, %v10480_v9 }
 0x19d   : > { %v8171_v16 = vadd.f32 %v6981_v8, %v6548_v19  ;;  %vm2055_vm10 = vcmp.eq.s32.totalorder %v7470_v47, %v1961_v63  ;;  %v1979_v12 = vpop.permute.xlu0 %1978  ;;  %v1212_v37 = vpop.f32.mrb[31].mxu1  ;;  %v8264_v21 = vsel %vm1563_vm6, 1.0, %v10480_v9  ;;  %v5908_v55 = vsel %vm1805_vm7, 1.0, %v10480_v9 }
 0x19e   : > { %v5934_v25 = vsel %vm2055_vm10, 1.0, %v10480_v9  ;;  %v8176_v38 = vadd.f32 %v6981_v8, %v1212_v37  ;;  %6705 = vmatprep.mubr.msk.f32.mxu0 %vm2194_vm0, %v10409_v51  ;;  %v1899_v37 = vadd.f32 %v5906_v61, %v8059_v46  ;;  %vm2061_vm9 = vcmp.eq.s32.totalorder %v7470_v47, %v1979_v12 }
 0x19f   : > { %10493 = vst [vmem:[#allocation50_spill] sm:$0xff] %v8171_v16  ;;  %v2151_v17 = vadd.f32 %v5934_v25, %v1895_v4  ;;  %v10406_v52 = vmax.f32 %v8171_v16, 0.0  ;;  %vm1806_vm10 = vcmp.eq.s32.totalorder %v7470_v47, %v7807_v26  ;;  %vm1562_vm11 = vcmp.eq.s32.totalorder %v7470_v47, %v7756_v18 }
 0x1a0   : > { %10494 = vst [vmem:[#allocation51_spill] sm:$0xff] %v8176_v38  ;;  %6706 = vmatmul.mubr.msk.f32.gmra.mrb[92].mxu0 %vm2194_vm0, %v10408_v33  ;;  %v10407_v8 = vmax.f32 %v8176_v38, 0.0  ;;  %v1967_v63 = vpop.permute.xlu1 %1966  ;;  %vm1565_vm12 = vcmp.eq.s32.totalorder %v7470_v47, %v7758_v31  ;;  %vm1807_vm13 = vcmp.eq.s32.totalorder %v7470_v47, %v7854_v57  ;;  %v2155_v46 = vadd.f32 %v5938_v45, %v1899_v37 }
 0x1a1   : > { %vm2057_vm3 = vcmp.eq.s32.totalorder %v7470_v47, %v1967_v63  ;;  %v1985_v25 = vpop.permute.xlu0 %1984  ;;  %6717 = vmatprep.mubr.msk.f32.mxu1 %vm3423_vm15, %v2151_v17  ;;  %vm1564_vm14 = vcmp.eq.s32.totalorder %v7470_v47, %v7762_v36  ;;  %v5940_v26 = vsel %vm2061_vm9, 1.0, %v10480_v9  ;;  %v1901_v23 = vadd.f32 %v5908_v55, %v8070_v50 }
 0x1a2   : > { %v5936_v4 = vsel %vm2057_vm3, 1.0, %v10480_v9  ;;  %6708 = vmatprep.mubr.msk.f32.mxu0 %vm2194_vm0, %v10407_v8  ;;  %6718 = vmatmul.mubr.msk.f32.vlgmr.msra.gmra.mrb[64].mxu1 %vm3423_vm15, %v2152_v40  ;;  %v1900_v40 = vadd.f32 %v5907_v14, %v8079_v43  ;;  %vm2063_vm3 = vcmp.eq.s32.totalorder %v7470_v47, %v1985_v25  ;;  %v8292_v43 = vsel %vm1562_vm11, 1.0, %v10480_v9 }
 0x1a3   : > { %v2153_v19 = vadd.f32 %v5936_v4, %v1897_v48  ;;  %v5909_v48 = vsel %vm1806_vm10, 1.0, %v10480_v9  ;;  %vm1808_vm4 = vcmp.eq.s32.totalorder %v7470_v47, %v7825_v62  ;;  %v5910_v50 = vsel %vm1807_vm13, 1.0, %v10480_v9 }
 0x1a4   : > { %6709 = vmatmul.mubr.msk.f32.gmra.mrb[94].mxu0 %vm2194_vm0, %v10406_v52  ;;  %v1970_v60 = vpop.permute.xlu1 %1969  ;;  %v8304_v25 = vsel %vm1565_vm12, 1.0, %v10480_v9  ;;  %vm1567_vm5 = vcmp.eq.s32.totalorder %v7470_v47, %v7764_v56  ;;  %vm1809_vm1 = vcmp.eq.s32.totalorder %v7470_v47, %v7872_v29  ;;  %v2157_v18 = vadd.f32 %v5940_v26, %v1901_v23 }
 0x1a5   : > { %vm2058_vm8 = vcmp.eq.s32.totalorder %v7470_v47, %v1970_v60  ;;  %v1991_v13 = vpop.permute.xlu0 %1990  ;;  %6720 = vmatprep.mubr.msk.f32.mxu1 %vm3423_vm15, %v2153_v19  ;;  %v8316_v57 = vsel %vm1564_vm14, 1.0, %v10480_v9  ;;  %v1902_v31 = vadd.f32 %v5909_v48, %v8098_v44  ;;  %v5911_v37 = vsel %vm1808_vm4, 1.0, %v10480_v9 }
 0x1a6   : > { %v5937_v49 = vsel %vm2058_vm8, 1.0, %v10480_v9  ;;  %v1903_v36 = vadd.f32 %v5910_v50, %v8092_v22  ;;  %vm2065_vm7 = vcmp.eq.s32.totalorder %v7470_v47, %v1991_v13  ;;  %vm1810_vm8 = vcmp.eq.s32.totalorder %v7470_v47, %v7842_v0 }
 0x1a7   : > { %v2154_v17 = vadd.f32 %v5937_v49, %v1898_v54  ;;  %v5942_v54 = vsel %vm2063_vm3, 1.0, %v10480_v9  ;;  %v8338_v49 = vsel %vm1567_vm5, 1.0, %v10480_v9  ;;  %v5912_v62 = vsel %vm1809_vm1, 1.0, %v10480_v9 }
 0x1a8   : > { %v1976_v12 = vpop.permute.xlu1 %1975  ;;  %vm1566_vm9 = vcmp.eq.s32.totalorder %v7470_v47, %v7774_v28  ;;  %vm1569_vm10 = vcmp.eq.s32.totalorder %v7470_v47, %v7776_v10  ;;  %vm1811_vm11 = vcmp.eq.s32.totalorder %v7470_v47, %v7890_v20  ;;  %v2159_v56 = vadd.f32 %v5942_v54, %v1903_v36 }
 0x1a9   : > { %vm2060_vm2 = vcmp.eq.s32.totalorder %v7470_v47, %v1976_v12  ;;  %v8280_v63 = vpop.permute.xlu0 %1996  ;;  %6721 = vmatmul.mubr.msk.f32.gmra.mrb[66].mxu1 %vm3423_vm15, %v2154_v17  ;;  %vm1568_vm12 = vcmp.eq.s32.totalorder %v7470_v47, %v7780_v2  ;;  %v1904_v29 = vadd.f32 %v5911_v37, %v8131_v53  ;;  %v5944_v17 = vsel %vm2065_vm7, 1.0, %v10480_v9 }
 0x1aa   : > { %v5939_v4 = vsel %vm2060_vm2, 1.0, %v10480_v9  ;;  %6723 = vmatprep.mubr.msk.f32.mxu1 %vm3423_vm15, %v2155_v46  ;;  %v1905_v26 = vadd.f32 %v5912_v62, %v8128_v3  ;;  %vm2067_vm14 = vcmp.eq.s32.totalorder %v7470_v47, %v8280_v63  ;;  %v8377_v48 = vsel %vm1566_vm9, 1.0, %v10480_v9 }
 0x1ab   : > { %v2156_v61 = vadd.f32 %v5939_v4, %v1900_v40  ;;  %v5913_v40 = vsel %vm1810_vm8, 1.0, %v10480_v9  ;;  %vm1812_vm2 = vcmp.eq.s32.totalorder %v7470_v47, %v7860_v7  ;;  %v5914_v0 = vsel %vm1811_vm11, 1.0, %v10480_v9 }
 0x1ac   : > { %v8310_v19 = vpop.f32.mrb[32].mxu1  ;;  %v1982_v60 = vpop.permute.xlu1 %1981  ;;  %v8389_v63 = vsel %vm1569_vm10, 1.0, %v10480_v9  ;;  %vm1571_vm3 = vcmp.eq.s32.totalorder %v7470_v47, %v7782_v35  ;;  %vm1813_vm4 = vcmp.eq.s32.totalorder %v7470_v47, %v7908_v30  ;;  %v2161_v28 = vadd.f32 %v5944_v17, %v1905_v26 }
 0x1ad   : > { %vm2062_vm6 = vcmp.eq.s32.totalorder %v7470_v47, %v1982_v60  ;;  %v8321_v45 = vpop.permute.xlu0 %2002  ;;  %v8323_v14 = vpop.f32.mrb[33].mxu1  ;;  %6724 = vmatmul.mubr.msk.f32.gmra.mrb[68].mxu1 %vm3423_vm15, %v2156_v61  ;;  %v8401_v20 = vsel %vm1568_vm12, 1.0, %v10480_v9  ;;  %v1906_v10 = vadd.f32 %v5913_v40, %v8149_v5  ;;  %v5946_v50 = vsel %vm2067_vm14, 1.0, %v10480_v9  ;;  %v10497_v40 = vld [vmem:[#allocation23_spill] sm:$0xff] }
 0x1ae   : > { %v5941_v44 = vsel %vm2062_vm6, 1.0, %v10480_v9  ;;  %6726 = vmatprep.mubr.msk.f32.mxu1 %vm3423_vm15, %v2157_v18  ;;  %v5915_v60 = vsel %vm1812_vm2, 1.0, %v10480_v9  ;;  %v1907_v2 = vadd.f32 %v5914_v0, %v8143_v58  ;;  %vm2069_vm1 = vcmp.eq.s32.totalorder %v7470_v47, %v8321_v45 }
 0x1af   : > { %v2158_v22 = vadd.f32 %v5941_v44, %v1902_v31  ;;  %v8424_v31 = vsel %vm1571_vm3, 1.0, %v10480_v9  ;;  %vm1814_vm6 = vcmp.eq.s32.totalorder %v7470_v47, %v7878_v42  ;;  %v5916_v7 = vsel %vm1813_vm4, 1.0, %v10480_v9 }
 0x1b0   : > { %v1988_v13 = vpop.permute.xlu1 %1987  ;;  %v8352_v55 = vpop.f32.mrb[34].mxu1  ;;  %vm1570_vm7 = vcmp.eq.s32.totalorder %v7470_v47, %v7786_v27  ;;  %vm1573_vm8 = vcmp.eq.s32.totalorder %v7470_v47, %v7788_v39  ;;  %vm1815_vm9 = vcmp.eq.s32.totalorder %v7470_v47, %v7926_v1  ;;  %v2163_v35 = vadd.f32 %v5946_v50, %v1907_v2  ;;  %v10498_v1 = vld [vmem:[#allocation17_spill] sm:$0xff] }
 0x1b1   : > { %vm2064_vm13 = vcmp.eq.s32.totalorder %v7470_v47, %v1988_v13  ;;  %v8359_v46 = vpop.permute.xlu0 %2008  ;;  %6727 = vmatmul.mubr.msk.f32.gmra.mrb[70].mxu1 %vm3423_vm15, %v2158_v22  ;;  %v8362_v12 = vpop.f32.mrb[35].mxu1  ;;  %v1908_v37 = vadd.f32 %v5915_v60, %v8185_v15  ;;  %vm1816_vm10 = vcmp.eq.s32.totalorder %v7470_v47, %v7896_v34  ;;  %v5948_v30 = vsel %vm2069_vm1, 1.0, %v10480_v9  ;;  %v10495_v22 = vld [vmem:[#allocation49_spill] sm:$0xff] }
 0x1b2   : > { %v5943_v53 = vsel %vm2064_vm13, 1.0, %v10480_v9  ;;  %6729 = vmatprep.mubr.msk.f32.mxu1 %vm3423_vm15, %v2159_v56  ;;  %v5917_v62 = vsel %vm1814_vm6, 1.0, %v10480_v9  ;;  %v1909_v15 = vadd.f32 %v5916_v7, %v10495_v22  ;;  %vm2071_vm12 = vcmp.eq.s32.totalorder %v7470_v47, %v8359_v46  ;;  %v10496_v46 = vld [vmem:[#allocation3_spill] sm:$0xff] }
 0x1b3   : > { %v2160_v3 = vadd.f32 %v5943_v53, %v1904_v29  ;;  %v8463_v13 = vsel %vm1570_vm7, 1.0, %v10480_v9  ;;  %v8469_v42 = vsel %vm1573_vm8, 1.0, %v10480_v9  ;;  %v5918_v29 = vsel %vm1815_vm9, 1.0, %v10480_v9  ;;  %v10501_v7 = vld [vmem:[#allocation27_spill] sm:$0xff] }
 0x1b4   : > { %v8395_v23 = vpop.f32.mrb[36].mxu1  ;;  %v1994_v4 = vpop.permute.xlu1 %1993  ;;  %vm1572_vm13 = vcmp.eq.s32.totalorder %v7470_v47, %v10496_v46  ;;  %v5919_v27 = vsel %vm1816_vm10, 1.0, %v10480_v9  ;;  %vm1817_vm14 = vcmp.eq.s32.totalorder %v7470_v47, %v10497_v40  ;;  %v2165_v39 = vadd.f32 %v5948_v30, %v1909_v15 }
 0x1b5   : > { %vm2066_vm5 = vcmp.eq.s32.totalorder %v7470_v47, %v1994_v4  ;;  %v8406_v61 = vpop.permute.xlu0 %2014  ;;  %v8408_v18 = vpop.f32.mrb[37].mxu1  ;;  %6730 = vmatmul.mubr.msk.f32.gmra.mrb[72].mxu1 %vm3423_vm15, %v2160_v3  ;;  %v1910_v0 = vadd.f32 %v5917_v62, %v8234_v41  ;;  %vm1818_vm2 = vcmp.eq.s32.totalorder %v7470_v47, %v10498_v1  ;;  %v5950_v3 = vsel %vm2071_vm12, 1.0, %v10480_v9 }
 0x1b6   : > { %v5945_v5 = vsel %vm2066_vm5, 1.0, %v10480_v9  ;;  %6732 = vmatprep.mubr.msk.f32.mxu1 %vm3423_vm15, %v2161_v28  ;;  %v1911_v4 = vadd.f32 %v5918_v29, %v8219_v32  ;;  %vm2073_vm5 = vcmp.eq.s32.totalorder %v7470_v47, %v8406_v61  ;;  %v8506_v50 = vsel %vm1572_vm13, 1.0, %v10480_v9 }
 0x1b7   : > { %v2162_v58 = vadd.f32 %v5945_v5, %v1906_v10  ;;  %v10499_v10 = vld [vmem:[#allocation20_spill] sm:$0xff]  ;;  %v1912_v60 = vadd.f32 %v5919_v27, %v8250_v11  ;;  %v5920_v32 = vsel %vm1817_vm14, 1.0, %v10480_v9  ;;  %v5921_v61 = vsel %vm1818_vm2, 1.0, %v10480_v9 }
 0x1b8   : > { %v8438_v54 = vpop.f32.mrb[38].mxu1  ;;  %v2000_v45 = vpop.permute.xlu1 %1999  ;;  %vm1820_vm4 = vcmp.eq.s32.totalorder %v7470_v47, %v10499_v10  ;;  %v10500_v5 = vld [vmem:[#allocation24_spill] sm:$0xff]  ;;  %vm1819_vm6 = vcmp.eq.s32.totalorder %v7470_v47, %v10501_v7  ;;  %v5952_v30 = vsel %vm2073_vm5, 1.0, %v10480_v9  ;;  %v1913_v15 = vadd.f32 %v5920_v32, %v8240_v6 }
 0x1b9   : > { %vm2068_vm11 = vcmp.eq.s32.totalorder %v7470_v47, %v2000_v45  ;;  %v8445_v36 = vpop.permute.xlu0 %2020  ;;  %v8447_v44 = vpop.f32.mrb[39].mxu1  ;;  %6733 = vmatmul.mubr.msk.f32.gmra.mrb[74].mxu1 %vm3423_vm15, %v2162_v58  ;;  %vm1822_vm1 = vcmp.eq.s32.totalorder %v7470_v47, %v10500_v5  ;;  %v2167_v58 = vadd.f32 %v5950_v3, %v1911_v4  ;;  %v5923_v11 = vsel %vm1820_vm4, 1.0, %v10480_v9  ;;  %v10505_v3 = vld [vmem:[#allocation35_spill] sm:$0xff] }
 0x1ba   : > { %v5947_v56 = vsel %vm2068_vm11, 1.0, %v10480_v9  ;;  %6735 = vmatprep.mubr.msk.f32.mxu1 %vm3423_vm15, %v2163_v35  ;;  %vm2075_vm10 = vcmp.eq.s32.totalorder %v7470_v47, %v8445_v36  ;;  %v5925_v46 = vsel %vm1822_vm1, 1.0, %v10480_v9  ;;  %v5922_v6 = vsel %vm1819_vm6, 1.0, %v10480_v9 }
 0x1bb   : > { %v2164_v17 = vadd.f32 %v5947_v56, %v1908_v37  ;;  %v10502_v37 = vld [vmem:[#allocation28_spill] sm:$0xff]  ;;  %v10503_v56 = vld [vmem:[#allocation31_spill] sm:$0xff]  ;;  %v1916_v40 = vadd.f32 %v5923_v11, %v8316_v57  ;;  %vm1823_vm12 = vcmp.eq.s32.totalorder %v7470_v47, %v10505_v3  ;;  %v5954_v57 = vsel %vm2075_vm10, 1.0, %v10480_v9 }
 0x1bc   : > { %v8483_v26 = vpop.f32.mrb[40].mxu1  ;;  %v2006_v53 = vpop.permute.xlu1 %2005  ;;  %vm1824_vm7 = vcmp.eq.s32.totalorder %v7470_v47, %v10502_v37  ;;  %vm1821_vm9 = vcmp.eq.s32.totalorder %v7470_v47, %v10503_v56 }
 0x1bd   : > { %vm2070_vm3 = vcmp.eq.s32.totalorder %v7470_v47, %v2006_v53  ;;  %v8490_v28 = vpop.permute.xlu0 %2026  ;;  %v8492_v34 = vpop.f32.mrb[41].mxu1  ;;  %6736 = vmatmul.mubr.msk.f32.gmra.mrb[76].mxu1 %vm3423_vm15, %v2164_v17  ;;  %v1914_v17 = vadd.f32 %v5921_v61, %v8292_v43  ;;  %v5927_v36 = vsel %vm1824_vm7, 1.0, %v10480_v9  ;;  %v2169_v43 = vadd.f32 %v5952_v30, %v1913_v15 }
 0x1be   : > { %v5949_v41 = vsel %vm2070_vm3, 1.0, %v10480_v9  ;;  %6738 = vmatprep.mubr.msk.f32.mxu1 %vm3423_vm15, %v2165_v39  ;;  %v10504_v39 = vld [vmem:[#allocation32_spill] sm:$0xff]  ;;  %v5924_v1 = vsel %vm1821_vm9, 1.0, %v10480_v9  ;;  %vm2077_vm14 = vcmp.eq.s32.totalorder %v7470_v47, %v8490_v28  ;;  %v8577_v5 = vadd.f32 %v5927_v36, %v8401_v20 }
 0x1bf   : > { %v2166_v2 = vadd.f32 %v5949_v41, %v1910_v0  ;;  %vm1826_vm11 = vcmp.eq.s32.totalorder %v7470_v47, %v10504_v39  ;;  %v8556_v0 = vld [vmem:[%s10329_s4] ss:$0 sm:$0xff]  ;;  %v1918_v41 = vadd.f32 %v5925_v46, %v8377_v48  ;;  %v5956_v30 = vsel %vm2077_vm14, 1.0, %v10480_v9  ;;  %v10507_v39 = vld [vmem:[#allocation39_spill] sm:$0xff] }
 0x1c0   : > { %v8518_v35 = vpop.f32.mrb[42].mxu1  ;;  %v2012_v45 = vpop.permute.xlu1 %2011  ;;  %v5929_v48 = vsel %vm1826_vm11, 1.0, %v10480_v9  ;;  %vm1825_vm5 = vcmp.eq.s32.totalorder %v7470_v47, %v10507_v39 }
 0x1c1   : > { %vm2072_vm8 = vcmp.eq.s32.totalorder %v7470_v47, %v2012_v45  ;;  %v8525_v62 = vpop.permute.xlu0 %2032  ;;  %v8527_v22 = vpop.f32.mrb[43].mxu1  ;;  %6739 = vmatmul.mubr.msk.f32.gmra.mrb[78].mxu1 %vm3423_vm15, %v2166_v2  ;;  %v5926_v45 = vsel %vm1823_vm12, 1.0, %v10480_v9 }
 0x1c2   : > { %v5951_v29 = vsel %vm2072_vm8, 1.0, %v10480_v9  ;;  %6741 = vmatprep.mubr.msk.f32.mxu1 %vm3423_vm15, %v2167_v58  ;;  %v1917_v58 = vadd.f32 %v5924_v1, %v8304_v25  ;;  %vm2079_vm2 = vcmp.eq.s32.totalorder %v7470_v47, %v8525_v62  ;;  %v1919_v36 = vadd.f32 %v5926_v45, %v8338_v49  ;;  %v10509_v45 = vld [vmem:[#allocation43_spill] sm:$0xff] }
 0x1c3   : > { %v2168_v27 = vadd.f32 %v5951_v29, %v1912_v60  ;;  %v1915_v60 = vadd.f32 %v5922_v6, %v8264_v21  ;;  %v8606_v29 = vadd.f32 %v5929_v48, %v8463_v13  ;;  %vm1827_vm8 = vcmp.eq.s32.totalorder %v7470_v47, %v10509_v45 }
 0x1c4   : > { %v2018_v53 = vpop.permute.xlu1 %2017  ;;  %v2173_v1 = vadd.f32 %v5956_v30, %v1917_v58  ;;  %v10508_v58 = vld [vmem:[#allocation40_spill] sm:$0xff] }
 0x1c5   : > { %v8562_v4 = vpop.f32.mrb[44].mxu1  ;;  %vm2074_vm13 = vcmp.eq.s32.totalorder %v7470_v47, %v2018_v53  ;;  %v8565_v10 = vpop.permute.xlu0 %2038  ;;  %6742 = vmatmul.mubr.msk.f32.gmra.mrb[80].mxu1 %vm3423_vm15, %v2168_v27  ;;  %v2171_v11 = vadd.f32 %v5954_v57, %v1915_v60  ;;  %vm1830_vm7 = vcmp.eq.s32.totalorder %v7470_v47, %v10508_v58 }
 0x1c6   : > { %v5953_v32 = vsel %vm2074_vm13, 1.0, %v10480_v9  ;;  %v6559_v2 = vpop.f32.mrb[32].mxu0  ;;  %v8573_v61 = vpop.f32.mrb[45].mxu1  ;;  %6744 = vmatprep.mubr.msk.f32.mxu1 %vm3423_vm15, %v2169_v43  ;;  %vm2081_vm1 = vcmp.eq.s32.totalorder %v7470_v47, %v8565_v10 }
 0x1c7   : > { %v2170_v7 = vadd.f32 %v5953_v32, %v1914_v17  ;;  %v8584_v21 = vadd.f32 %v6559_v2, %v8556_v0  ;;  %v2357_v28 = vpop.f32.mrb[33].mxu0  ;;  %v10506_v17 = vld [vmem:[#allocation36_spill] sm:$0xff]  ;;  %v5928_v2 = vsel %vm1825_vm5, 1.0, %v10480_v9 }
 0x1c8   : > { %v8592_v20 = vadd.f32 %v8556_v0, %v2357_v28  ;;  %v2024_v37 = vpop.permute.xlu1 %2023  ;;  %vm1828_vm4 = vcmp.eq.s32.totalorder %v7470_v47, %v10506_v17  ;;  %v1921_v10 = vadd.f32 %v5928_v2, %v8389_v63  ;;  %v5930_v63 = vsel %vm1827_vm8, 1.0, %v10480_v9 }
 0x1c9   : > { %v2840_v15 = vadd.f32 %v8310_v19, %v8584_v21  ;;  %v8599_v56 = vpop.f32.mrb[46].mxu1  ;;  %vm2076_vm3 = vcmp.eq.s32.totalorder %v7470_v47, %v2024_v37  ;;  %v8602_v25 = vpop.permute.xlu0 %2044  ;;  %6745 = vmatmul.mubr.msk.f32.gmra.mrb[82].mxu1 %vm3423_vm15, %v2170_v7  ;;  %v8641_v62 = vsel %vm1828_vm4, 1.0, %v10480_v9  ;;  %vm5675_vm4 = vcmask 80912  }
 0x1ca   : > { %v2839_v46 = vadd.f32 %v8323_v14, %v8592_v20  ;;  %v5955_v6 = vsel %vm2076_vm3, 1.0, %v10480_v9  ;;  %v6562_v19 = vpop.f32.mrb[34].mxu0  ;;  %v8613_v27 = vpop.f32.mrb[47].mxu1  ;;  %6747 = vmatprep.mubr.msk.f32.mxu1 %vm3423_vm15, %v2171_v11  ;;  %v5958_v14 = vsel %vm2079_vm2, 1.0, %v10480_v9  ;;  %vm2083_vm9 = vcmp.eq.s32.totalorder %v7470_v47, %v8602_v25  ;;  %v10511_v25 = vld [vmem:[#allocation4_spill] sm:$0xff] }
 0x1cb   : > { %v2172_v13 = vadd.f32 %v5955_v6, %v1916_v40  ;;  %v8620_v43 = vadd.f32 %v6562_v19, %v8556_v0  ;;  %v2367_v53 = vpop.f32.mrb[35].mxu0  ;;  %v2872_v49 = vmax.f32 %v2840_v15, 0.0  ;;  %v2175_v30 = vadd.f32 %v5958_v14, %v1919_v36 }
 0x1cc   : > { %v2871_v3 = vmax.f32 %v2839_v46, 0.0  ;;  %v8627_v57 = vadd.f32 %v8556_v0, %v2367_v53  ;;  %v2030_v60 = vpop.permute.xlu1 %2029  ;;  %v5960_v15 = vsel %vm2081_vm1, 1.0, %v10480_v9  ;;  %v5962_v2 = vsel %vm2083_vm9, 1.0, %v10480_v9 }
 0x1cd   : > { %v2842_v40 = vadd.f32 %v8352_v55, %v8620_v43  ;;  %v8633_v32 = vpop.f32.mrb[48].mxu1  ;;  %vm2078_vm6 = vcmp.eq.s32.totalorder %v7470_v47, %v2030_v60  ;;  %6748 = vmatmul.mubr.msk.f32.gmra.mrb[84].mxu1 %vm3423_vm15, %v2172_v13  ;;  %v6565_v7 = vpop.f32.mrb[36].mxu0  ;;  %v10510_v60 = vld [vmem:[#allocation46_spill] sm:$0xff]  ;;  %vm1574_vm14 = vcmp.eq.s32.totalorder %v7470_v47, %v10511_v25 }
 0x1ce   : > { %v2841_v55 = vadd.f32 %v8362_v12, %v8627_v57  ;;  %v5957_v48 = vsel %vm2078_vm6, 1.0, %v10480_v9  ;;  %6773 = vmatprep.mubr.msk.f32.mxu0 %vm2194_vm0, %v2871_v3  ;;  %v8651_v28 = vpop.f32.mrb[49].mxu1  ;;  %6750 = vmatprep.mubr.msk.f32.mxu1 %vm3423_vm15, %v2173_v1  ;;  %v8659_v37 = vadd.f32 %v6565_v7, %v8556_v0  ;;  %v2377_v12 = vpop.f32.mrb[37].mxu0  ;;  %vm1829_vm11 = vcmp.eq.s32.totalorder %v7470_v47, %v10510_v60 }
 0x1cf   : > { %v2174_v11 = vadd.f32 %v5957_v48, %v1918_v41  ;;  %6774 = vmatmul.mubr.msk.f32.vlgmr.msra.gmra.mrb[96].mxu0 %vm2194_vm0, %v2872_v49  ;;  %v2051_v46 = vpop.permute.xlu0 %2050  ;;  %v8667_v6 = vadd.f32 %v8556_v0, %v2377_v12  ;;  %v2874_v41 = vmax.f32 %v2842_v40, 0.0  ;;  %v2177_v40 = vadd.f32 %v5960_v15, %v1921_v10 }
 0x1d0   : > { %v2873_v17 = vmax.f32 %v2841_v55, 0.0  ;;  %v2036_v19 = vpop.permute.xlu1 %2035  ;;  %v2844_v39 = vadd.f32 %v8395_v23, %v8659_v37  ;;  %vm2085_vm12 = vcmp.eq.s32.totalorder %v7470_v47, %v2051_v46  ;;  %v5933_v10 = vsel %vm1830_vm7, 1.0, %v10480_v9 }
 0x1d1   : > { %v8673_v13 = vpop.f32.mrb[50].mxu1  ;;  %vm2080_vm10 = vcmp.eq.s32.totalorder %v7470_v47, %v2036_v19  ;;  %v6568_v36 = vpop.f32.mrb[38].mxu0  ;;  %6751 = vmatmul.mubr.msk.f32.gmra.mrb[86].mxu1 %vm3423_vm15, %v2174_v11  ;;  %v2843_v53 = vadd.f32 %v8408_v18, %v8667_v6  ;;  %v5932_v19 = vsel %vm1829_vm11, 1.0, %v10480_v9 }
 0x1d2   : > { %v5959_v1 = vsel %vm2080_vm10, 1.0, %v10480_v9  ;;  %v8682_v14 = vadd.f32 %v6568_v36, %v8556_v0  ;;  %6776 = vmatprep.mubr.msk.f32.mxu0 %vm2194_vm0, %v2873_v17  ;;  %v2387_v23 = vpop.f32.mrb[39].mxu0  ;;  %v8685_v3 = vpop.f32.mrb[51].mxu1  ;;  %6753 = vmatprep.mubr.msk.f32.mxu1 %vm3423_vm15, %v2175_v30  ;;  %v2876_v7 = vmax.f32 %v2844_v39, 0.0  ;;  %v1923_v30 = vadd.f32 %v5930_v63, %v8424_v31 }
 0x1d3   : > { %v2176_v18 = vadd.f32 %v5959_v1, %v8577_v5  ;;  %v8696_v49 = vadd.f32 %v8556_v0, %v2387_v23  ;;  %6777 = vmatmul.mubr.msk.f32.gmra.mrb[98].mxu0 %vm2194_vm0, %v2874_v41  ;;  %v2875_v55 = vmax.f32 %v2843_v53, 0.0  ;;  %v1924_v36 = vadd.f32 %v8641_v62, %v8506_v50 }
 0x1d4   : > { %v2042_v48 = vpop.permute.xlu1 %2041  ;;  %v2846_v45 = vadd.f32 %v8438_v54, %v8682_v14  ;;  %v2179_v53 = vadd.f32 %v5962_v2, %v1923_v30  ;;  %v5964_v1 = vsel %vm2085_vm12, 1.0, %v10480_v9  ;;  %v1925_v62 = vadd.f32 %v5932_v19, %v8469_v42 }
 0x1d5   : > { %v2845_v5 = vadd.f32 %v8447_v44, %v8696_v49  ;;  %v8708_v11 = vpop.f32.mrb[52].mxu1  ;;  %vm2082_vm13 = vcmp.eq.s32.totalorder %v7470_v47, %v2042_v48  ;;  %v6571_v12 = vpop.f32.mrb[40].mxu0  ;;  %6754 = vmatmul.mubr.msk.f32.gmra.mrb[88].mxu1 %vm3423_vm15, %v2176_v18  ;;  %6779 = vmatprep.mubr.msk.f32.mxu0 %vm2194_vm0, %v2875_v55 }
 0x1d6   : > { %v5961_v15 = vsel %vm2082_vm13, 1.0, %v10480_v9  ;;  %v8717_v17 = vadd.f32 %v6571_v12, %v8556_v0  ;;  %v2397_v54 = vpop.f32.mrb[41].mxu0  ;;  %v8720_v44 = vpop.f32.mrb[53].mxu1  ;;  %6756 = vmatprep.mubr.msk.f32.mxu1 %vm3423_vm15, %v2177_v40 }
 0x1d7   : > { %v2877_v41 = vmax.f32 %v2845_v5, 0.0  ;;  %v2178_v31 = vadd.f32 %v5961_v15, %v8606_v29  ;;  %v8729_v39 = vadd.f32 %v8556_v0, %v2397_v54  ;;  %6780 = vmatmul.mubr.msk.f32.gmra.mrb[100].mxu0 %vm2194_vm0, %v2876_v7  ;;  %v2878_v29 = vmax.f32 %v2846_v45, 0.0 }
 0x1d8   : > { %v2048_v23 = vpop.permute.xlu1 %2047  ;;  %v2848_v63 = vadd.f32 %v8483_v26, %v8717_v17  ;;  %v2181_v7 = vadd.f32 %v5964_v1, %v1925_v62 }
 0x1d9   : > { %v2847_v60 = vadd.f32 %v8492_v34, %v8729_v39  ;;  %v8745_v18 = vpop.f32.mrb[54].mxu1  ;;  %vm2084_vm2 = vcmp.eq.s32.totalorder %v7470_v47, %v2048_v23  ;;  %v6574_v50 = vpop.f32.mrb[42].mxu0  ;;  %6782 = vmatprep.mubr.msk.f32.mxu0 %vm2194_vm0, %v2877_v41  ;;  %6757 = vmatmul.mubr.msk.f32.gmra.mrb[90].mxu1 %vm3423_vm15, %v2178_v31  ;;  %v5901_v34 = vsel %vm1574_vm14, 1.0, %v10480_v9 }
 0x1da   : > { %v5963_v58 = vsel %vm2084_vm2, 1.0, %v10480_v9  ;;  %v8753_v46 = vadd.f32 %v6574_v50, %v8556_v0  ;;  %v2407_v26 = vpop.f32.mrb[43].mxu0  ;;  %v8755_v40 = vpop.f32.mrb[55].mxu1  ;;  %6759 = vmatprep.mubr.msk.f32.mxu1 %vm3423_vm15, %v2179_v53  ;;  %v1926_v42 = vadd.f32 %v5933_v10, %v5901_v34  ;;  %v2880_v5 = vmax.f32 %v2848_v63, 0.0 }
 0x1db   : > { %v2879_v2 = vmax.f32 %v2847_v60, 0.0  ;;  %v2180_v55 = vadd.f32 %v5963_v58, %v1924_v36  ;;  %v8763_v48 = vadd.f32 %v8556_v0, %v2407_v26  ;;  %6783 = vmatmul.mubr.msk.f32.gmra.mrb[102].mxu0 %vm2194_vm0, %v2878_v29 }
 0x1dc   : > { %v2054_v45 = vpop.permute.xlu1 %2053  ;;  %v2850_v12 = vadd.f32 %v8518_v35, %v8753_v46 }
 0x1dd   : > { %v2849_v30 = vadd.f32 %v8527_v22, %v8763_v48  ;;  %v8770_v15 = vpop.f32.mrb[56].mxu1  ;;  %vm2086_vm3 = vcmp.eq.s32.totalorder %v7470_v47, %v2054_v45  ;;  %v6577_v25 = vpop.f32.mrb[44].mxu0  ;;  %6785 = vmatprep.mubr.msk.f32.mxu0 %vm2194_vm0, %v2879_v2  ;;  %6760 = vmatmul.mubr.msk.f32.gmra.mrb[92].mxu1 %vm3423_vm15, %v2180_v55 }
 0x1de   : > { %v5965_v54 = vsel %vm2086_vm3, 1.0, %v10480_v9  ;;  %v8777_v19 = vadd.f32 %v6577_v25, %v8556_v0  ;;  %v2417_v41 = vpop.f32.mrb[45].mxu0  ;;  %v8779_v31 = vpop.f32.mrb[57].mxu1  ;;  %6762 = vmatprep.mubr.msk.f32.mxu1 %vm3423_vm15, %v2181_v7  ;;  %v2882_v47 = vmax.f32 %v2850_v12, 0.0 }
 0x1df   : > { %v2881_v35 = vmax.f32 %v2849_v30, 0.0  ;;  %v2182_v22 = vadd.f32 %v5965_v54, %v1926_v42  ;;  %v8783_v36 = vadd.f32 %v8556_v0, %v2417_v41  ;;  %6786 = vmatmul.mubr.msk.f32.gmra.mrb[104].mxu0 %vm2194_vm0, %v2880_v5 }
 0x1e0   : > { %v2852_v10 = vadd.f32 %v8562_v4, %v8777_v19 }
 0x1e1   : > { %v2851_v9 = vadd.f32 %v8573_v61, %v8783_v36  ;;  %v6580_v53 = vpop.f32.mrb[46].mxu0  ;;  %v8790_v1 = vpop.f32.mrb[58].mxu1  ;;  %6788 = vmatprep.mubr.msk.f32.mxu0 %vm2194_vm0, %v2881_v35  ;;  %6763 = vmatmul.mubr.msk.f32.gmra.mrb[94].mxu1 %vm3423_vm15, %v2182_v22  ;;  %vm5353_vm15 = vcmask 7168  }
 0x1e2   : > { %v8795_v23 = vadd.f32 %v6580_v53, %v8556_v0  ;;  %v2427_v29 = vpop.f32.mrb[47].mxu0  ;;  %v8797_v63 = vpop.f32.mrb[59].mxu1  ;;  %v2884_v4 = vmax.f32 %v2852_v10, 0.0 }
 0x1e3   : > { %v2883_v60 = vmax.f32 %v2851_v9, 0.0  ;;  %v8800_v50 = vadd.f32 %v8556_v0, %v2427_v29  ;;  %6789 = vmatmul.mubr.msk.f32.gmra.mrb[106].mxu0 %vm2194_vm0, %v2882_v47 }
 0x1e4   : > { %v2854_v61 = vadd.f32 %v8599_v56, %v8795_v23 }
 0x1e5   : > { %v2853_v62 = vadd.f32 %v8613_v27, %v8800_v50  ;;  %v6583_v58 = vpop.f32.mrb[48].mxu0  ;;  %v8807_v26 = vpop.f32.mrb[60].mxu1  ;;  %6791 = vmatprep.mubr.msk.f32.mxu0 %vm2194_vm0, %v2883_v60 }
 0x1e6   : > { %v8811_v34 = vadd.f32 %v6583_v58, %v8556_v0  ;;  %v2437_v2 = vpop.f32.mrb[49].mxu0  ;;  %v8813_v55 = vpop.f32.mrb[61].mxu1  ;;  %v2886_v56 = vmax.f32 %v2854_v61, 0.0 }
 0x1e7   : > { %v2885_v42 = vmax.f32 %v2853_v62, 0.0  ;;  %v8816_v7 = vadd.f32 %v8556_v0, %v2437_v2  ;;  %6792 = vmatmul.mubr.msk.f32.gmra.mrb[108].mxu0 %vm2194_vm0, %v2884_v4 }
 0x1e8   : > { %v2856_v27 = vadd.f32 %v8633_v32, %v8811_v34 }
 0x1e9   : > { %10512 = vst [vmem:[#allocation49_spill] sm:$0xff] %v8816_v7  ;;  %v2855_v45 = vadd.f32 %v8651_v28, %v8816_v7  ;;  %v8823_v5 = vpop.f32.mrb[62].mxu1  ;;  %6794 = vmatprep.mubr.msk.f32.mxu0 %vm2194_vm0, %v2885_v42 }
 0x1ea   : > { %v6586_v12 = vpop.f32.mrb[50].mxu0  ;;  %v8826_v30 = vpop.f32.mrb[63].mxu1  ;;  %v2888_v32 = vmax.f32 %v2856_v27, 0.0 }
 0x1eb   : > { %v2887_v25 = vmax.f32 %v2855_v45, 0.0  ;;  %v8829_v54 = vadd.f32 %v6586_v12, %v8556_v0  ;;  %v2447_v41 = vpop.f32.mrb[51].mxu0  ;;  %6795 = vmatmul.mubr.msk.f32.gmra.mrb[110].mxu0 %vm2194_vm0, %v2886_v56 }
 0x1ec   : > { %v8833_v35 = vadd.f32 %v8556_v0, %v2447_v41 }
 0x1ed   : > { %10513 = vst [vmem:[#allocation3_spill] sm:$0xff] %v8829_v54  ;;  %v2858_v28 = vadd.f32 %v8673_v13, %v8829_v54  ;;  %6797 = vmatprep.mubr.msk.f32.mxu0 %vm2194_vm0, %v2887_v25 }
 0x1ee   : > { %10514 = vst [vmem:[#allocation23_spill] sm:$0xff] %v8833_v35  ;;  %v2857_v22 = vadd.f32 %v8685_v3, %v8833_v35  ;;  %v6589_v47 = vpop.f32.mrb[52].mxu0  ;;  %v6161_v3 = vld [vmem:[%s10337_s12] ss:$0 sm:$0xff] }
 0x1ef   : > { %v8841_v10 = vadd.f32 %v6589_v47, %v8556_v0  ;;  %v2457_v9 = vpop.f32.mrb[53].mxu0  ;;  %6798 = vmatmul.mubr.msk.f32.gmra.mrb[112].mxu0 %vm2194_vm0, %v2888_v32  ;;  %v2890_v60 = vmax.f32 %v2858_v28, 0.0  ;;  %4671 = vrot.lane.b32.xlu0 %v6161_v3, %s7028_s27 }
 0x1f0   : > { %v2889_v53 = vmax.f32 %v2857_v22, 0.0  ;;  %v8845_v29 = vadd.f32 %v8556_v0, %v2457_v9 }
 0x1f1   : > { %10515 = vst [vmem:[#allocation17_spill] sm:$0xff] %v8841_v10  ;;  %v2860_v13 = vadd.f32 %v8708_v11, %v8841_v10 }
 0x1f2   : > { %10516 = vst [vmem:[#allocation20_spill] sm:$0xff] %v8845_v29  ;;  %v2859_v4 = vadd.f32 %v8720_v44, %v8845_v29  ;;  %v6592_v61 = vpop.f32.mrb[54].mxu0  ;;  %6800 = vmatprep.mubr.msk.f32.mxu0 %vm2194_vm0, %v2889_v53 }
 0x1f3   : > { %v8856_v62 = vadd.f32 %v6592_v61, %v8556_v0  ;;  %v2467_v58 = vpop.f32.mrb[55].mxu0  ;;  %6801 = vmatmul.mubr.msk.f32.gmra.mrb[114].mxu0 %vm2194_vm0, %v2890_v60  ;;  %v2892_v44 = vmax.f32 %v2860_v13, 0.0 }
 0x1f4   : > { %v2891_v11 = vmax.f32 %v2859_v4, 0.0  ;;  %v8861_v2 = vadd.f32 %v8556_v0, %v2467_v58 }
 0x1f5   : > { %10517 = vst [vmem:[#allocation24_spill] sm:$0xff] %v8856_v62  ;;  %v2862_v42 = vadd.f32 %v8745_v18, %v8856_v62 }
 0x1f6   : > { %10518 = vst [vmem:[#allocation27_spill] sm:$0xff] %v8861_v2  ;;  %v2861_v56 = vadd.f32 %v8755_v40, %v8861_v2  ;;  %v6595_v27 = vpop.f32.mrb[56].mxu0  ;;  %6803 = vmatprep.mubr.msk.f32.mxu0 %vm2194_vm0, %v2891_v11 }
 0x1f7   : > { %v8869_v45 = vadd.f32 %v6595_v27, %v8556_v0  ;;  %v2477_v12 = vpop.f32.mrb[57].mxu0  ;;  %6804 = vmatmul.mubr.msk.f32.gmra.mrb[116].mxu0 %vm2194_vm0, %v2892_v44  ;;  %v2894_v32 = vmax.f32 %v2862_v42, 0.0 }
 0x1f8   : > { %v2893_v25 = vmax.f32 %v2861_v56, 0.0  ;;  %v8873_v41 = vadd.f32 %v8556_v0, %v2477_v12 }
 0x1f9   : > { %10519 = vst [vmem:[#allocation28_spill] sm:$0xff] %v8869_v45  ;;  %v2864_v18 = vadd.f32 %v8770_v15, %v8869_v45 }
 0x1fa   : > { %10520 = vst [vmem:[#allocation31_spill] sm:$0xff] %v8873_v41  ;;  %v2863_v40 = vadd.f32 %v8779_v31, %v8873_v41  ;;  %v6598_v28 = vpop.f32.mrb[58].mxu0  ;;  %6806 = vmatprep.mubr.msk.f32.mxu0 %vm2194_vm0, %v2893_v25 }
 0x1fb   : > { %v8881_v22 = vadd.f32 %v6598_v28, %v8556_v0  ;;  %v2487_v47 = vpop.f32.mrb[59].mxu0  ;;  %6807 = vmatmul.mubr.msk.f32.gmra.mrb[118].mxu0 %vm2194_vm0, %v2894_v32  ;;  %v2896_v60 = vmax.f32 %v2864_v18, 0.0 }
 0x1fc   : > { %v2895_v9 = vmax.f32 %v2863_v40, 0.0  ;;  %v8885_v53 = vadd.f32 %v8556_v0, %v2487_v47 }
 0x1fd   : > { %10521 = vst [vmem:[#allocation32_spill] sm:$0xff] %v8881_v22  ;;  %v2866_v15 = vadd.f32 %v8790_v1, %v8881_v22 }
 0x1fe   : > { %10522 = vst [vmem:[#allocation35_spill] sm:$0xff] %v8885_v53  ;;  %v2865_v31 = vadd.f32 %v8797_v63, %v8885_v53  ;;  %v6601_v13 = vpop.f32.mrb[60].mxu0  ;;  %6809 = vmatprep.mubr.msk.f32.mxu0 %vm2194_vm0, %v2895_v9 }
 0x1ff   : > { %v8893_v4 = vadd.f32 %v6601_v13, %v8556_v0  ;;  %v2497_v61 = vpop.f32.mrb[61].mxu0  ;;  %6810 = vmatmul.mubr.msk.f32.gmra.mrb[120].mxu0 %vm2194_vm0, %v2896_v60  ;;  %v2898_v11 = vmax.f32 %v2866_v15, 0.0 }
 0x200   : > { %v2897_v3 = vmax.f32 %v2865_v31, 0.0  ;;  %v8897_v58 = vadd.f32 %v8556_v0, %v2497_v61 }
 0x201   : > { %10523 = vst [vmem:[#allocation36_spill] sm:$0xff] %v8893_v4  ;;  %v2868_v1 = vadd.f32 %v8807_v26, %v8893_v4 }
 0x202   : > { %10524 = vst [vmem:[#allocation39_spill] sm:$0xff] %v8897_v58  ;;  %v2867_v63 = vadd.f32 %v8813_v55, %v8897_v58  ;;  %v6604_v44 = vpop.f32.mrb[62].mxu0  ;;  %6812 = vmatprep.mubr.msk.f32.mxu0 %vm2194_vm0, %v2897_v3 }
 0x203   : > { %v8905_v42 = vadd.f32 %v6604_v44, %v8556_v0  ;;  %v2507_v56 = vpop.f32.mrb[63].mxu0  ;;  %6813 = vmatmul.mubr.msk.f32.gmra.mrb[122].mxu0 %vm2194_vm0, %v2898_v11  ;;  %v2900_v25 = vmax.f32 %v2868_v1, 0.0 }
 0x204   : > { %v2899_v27 = vmax.f32 %v2867_v63, 0.0  ;;  %v8909_v12 = vadd.f32 %v8556_v0, %v2507_v56 }
 0x205   : > { %10525 = vst [vmem:[#allocation40_spill] sm:$0xff] %v8905_v42  ;;  %v2870_v26 = vadd.f32 %v8823_v5, %v8905_v42 }
 0x206   : > { %10526 = vst [vmem:[#allocation43_spill] sm:$0xff] %v8909_v12  ;;  %v2869_v55 = vadd.f32 %v8826_v30, %v8909_v12  ;;  %6815 = vmatprep.mubr.msk.f32.mxu0 %vm2194_vm0, %v2899_v27 }
 0x207   : > { %6816 = vmatmul.mubr.msk.f32.gmra.mrb[124].mxu0 %vm2194_vm0, %v2900_v25  ;;  %v2902_v18 = vmax.f32 %v2870_v26, 0.0 }
 0x208   : > { %v2901_v32 = vmax.f32 %v2869_v55, 0.0 }
 0x20a   : > { %6818 = vmatprep.mubr.msk.f32.mxu0 %vm2194_vm0, %v2901_v32 }
 0x20b   : > { %6819 = vmatmul.mubr.msk.f32.gmra.mrb[126].mxu0 %vm2194_vm0, %v2902_v18 }
 0x23a   : > { %v8919_v40 = vpop.f32.mrb[64].mxu0 }
 0x23b   : > { %v8921_v0 = vpop.f32.mrb[65].mxu0 }
 0x23e   : > { %v8923_v28 = vpop.f32.mrb[66].mxu0 }
 0x23f   : > { %v8925_v5 = vpop.f32.mrb[67].mxu0 }
 0x242   : > { %v8927_v47 = vpop.f32.mrb[68].mxu0 }
 0x243   : > { %v8929_v30 = vpop.f32.mrb[69].mxu0 }
 0x246   : > { %v8931_v9 = vpop.f32.mrb[70].mxu0 }
 0x247   : > { %v8933_v60 = vpop.f32.mrb[71].mxu0 }
 0x24a   : > { %v8935_v15 = vpop.f32.mrb[72].mxu0 }
 0x24b   : > { %v8937_v31 = vpop.f32.mrb[73].mxu0 }
 0x24e   : > { %v8939_v13 = vpop.f32.mrb[74].mxu0 }
 0x24f   : > { %v8941_v61 = vpop.f32.mrb[75].mxu0 }
 0x252   : > { %v8943_v3 = vpop.f32.mrb[76].mxu0 }
 0x253   : > { %v8945_v11 = vpop.f32.mrb[77].mxu0 }
 0x256   : > { %v8947_v1 = vpop.f32.mrb[78].mxu0 }
 0x257   : > { %v8949_v63 = vpop.f32.mrb[79].mxu0 }
 0x25a   : > { %v8951_v44 = vpop.f32.mrb[80].mxu0 }
 0x25b   : > { %v8953_v56 = vpop.f32.mrb[81].mxu0 }
 0x25e   : > { %v8955_v27 = vpop.f32.mrb[82].mxu0 }
 0x25f   : > { %v8957_v25 = vpop.f32.mrb[83].mxu0 }
 0x262   : > { %v8959_v26 = vpop.f32.mrb[84].mxu0 }
 0x263   : > { %v8961_v55 = vpop.f32.mrb[85].mxu0 }
 0x266   : > { %v8963_v32 = vpop.f32.mrb[86].mxu0 }
 0x267   : > { %v8965_v18 = vpop.f32.mrb[87].mxu0 }
 0x26b   : > { %v8967_v52 = vpop.f32.mrb[88].mxu0 }
 0x26c   : > { %v8969_v8 = vpop.f32.mrb[89].mxu0 }
 0x26f   : > { %v8971_v33 = vpop.f32.mrb[90].mxu0 }
 0x270   : > { %v8973_v51 = vpop.f32.mrb[91].mxu0 }
 0x273   : > { %v8975_v16 = vpop.f32.mrb[92].mxu0 }
 0x274   : > { %v8977_v38 = vpop.f32.mrb[93].mxu0 }
 0x275   : > { %v6719_v59 = vpop.f32.mrb[64].mxu1 }
 0x276   : > { %3779 = vrot.lane.b32.xlu1 %v6719_v59, %s7028_s27  ;;  %v3586_v42 = vpop.f32.mrb[65].mxu1 }
 0x277   : > { %v8980_v24 = vpop.f32.mrb[94].mxu0  ;;  %3777 = vrot.lane.b32.xlu0 %v3586_v42, %s7028_s27 }
 0x278   : > { %v8983_v12 = vpop.f32.mrb[95].mxu0 }
 0x27c   : > { %v6722_v4 = vpop.f32.mrb[66].mxu1 }
 0x27d   : > { %3783 = vrot.lane.b32.xlu1 %v6722_v4, %s7028_s27  ;;  %v3596_v58 = vpop.f32.mrb[67].mxu1 }
 0x27e   : > { %3781 = vrot.lane.b32.xlu0 %v3596_v58, %s7028_s27 }
 0x280   : > { %v6725_v22 = vpop.f32.mrb[68].mxu1 }
 0x281   : > { %3787 = vrot.lane.b32.xlu1 %v6725_v22, %s7028_s27  ;;  %v3606_v53 = vpop.f32.mrb[69].mxu1 }
 0x282   : > { %3785 = vrot.lane.b32.xlu0 %v3606_v53, %s7028_s27 }
 0x284   : > { %v6728_v59 = vpop.f32.mrb[70].mxu1 }
 0x285   : > { %3791 = vrot.lane.b32.xlu1 %v6728_v59, %s7028_s27  ;;  %v3616_v45 = vpop.f32.mrb[71].mxu1 }
 0x286   : > { %3789 = vrot.lane.b32.xlu0 %v3616_v45, %s7028_s27 }
 0x288   : > { %v6731_v42 = vpop.f32.mrb[72].mxu1 }
 0x289   : > { %3795 = vrot.lane.b32.xlu1 %v6731_v42, %s7028_s27  ;;  %v3626_v41 = vpop.f32.mrb[73].mxu1 }
 0x28a   : > { %3793 = vrot.lane.b32.xlu0 %v3626_v41, %s7028_s27 }
 0x28c   : > { %v6734_v4 = vpop.f32.mrb[74].mxu1 }
 0x28d   : > { %3799 = vrot.lane.b32.xlu1 %v6734_v4, %s7028_s27  ;;  %v3636_v58 = vpop.f32.mrb[75].mxu1 }
 0x28e   : > { %3797 = vrot.lane.b32.xlu0 %v3636_v58, %s7028_s27 }
 0x290   : > { %v6737_v22 = vpop.f32.mrb[76].mxu1 }
 0x291   : > { %3803 = vrot.lane.b32.xlu1 %v6737_v22, %s7028_s27  ;;  %v3646_v53 = vpop.f32.mrb[77].mxu1 }
 0x292   : > { %3801 = vrot.lane.b32.xlu0 %v3646_v53, %s7028_s27 }
 0x294   : > { %v6740_v59 = vpop.f32.mrb[78].mxu1 }
 0x295   : > { %3807 = vrot.lane.b32.xlu1 %v6740_v59, %s7028_s27  ;;  %v3656_v45 = vpop.f32.mrb[79].mxu1 }
 0x296   : > { %3805 = vrot.lane.b32.xlu0 %v3656_v45, %s7028_s27 }
 0x298   : > { %v6743_v42 = vpop.f32.mrb[80].mxu1 }
 0x299   : > { %3811 = vrot.lane.b32.xlu1 %v6743_v42, %s7028_s27  ;;  %v3666_v41 = vpop.f32.mrb[81].mxu1 }
 0x29a   : > { %3809 = vrot.lane.b32.xlu0 %v3666_v41, %s7028_s27 }
 0x29c   : > { %v6746_v4 = vpop.f32.mrb[82].mxu1 }
 0x29d   : > { %3815 = vrot.lane.b32.xlu1 %v6746_v4, %s7028_s27  ;;  %v3676_v58 = vpop.f32.mrb[83].mxu1 }
 0x29e   : > { %3813 = vrot.lane.b32.xlu0 %v3676_v58, %s7028_s27 }
 0x2a0   : > { %v6749_v22 = vpop.f32.mrb[84].mxu1 }
 0x2a1   : > { %3819 = vrot.lane.b32.xlu1 %v6749_v22, %s7028_s27  ;;  %v3686_v53 = vpop.f32.mrb[85].mxu1 }
 0x2a2   : > { %v9004_v59 = vpop.f32.mrb[96].mxu0  ;;  %3817 = vrot.lane.b32.xlu0 %v3686_v53, %s7028_s27 }
 0x2a3   : > { %10527 = vst [vmem:[#allocation46_spill] sm:$0xff] %v9004_v59  ;;  %v9007_v45 = vpop.f32.mrb[97].mxu0 }
 0x2a4   : > { %10528 = vst [vmem:[#allocation4_spill] sm:$0xff] %v9007_v45  ;;  %v6752_v42 = vpop.f32.mrb[86].mxu1 }
 0x2a5   : > { %3823 = vrot.lane.b32.xlu1 %v6752_v42, %s7028_s27  ;;  %v3696_v41 = vpop.f32.mrb[87].mxu1 }
 0x2a6   : > { %v9010_v62 = vpop.f32.mrb[98].mxu0  ;;  %3821 = vrot.lane.b32.xlu0 %v3696_v41, %s7028_s27  ;;  %v9025_v41 = vld [vmem:[%s10334_s9] ss:$0 sm:$0xff] }
 0x2a7   : > { %10529 = vst [vmem:[#allocation52_spill] sm:$0xff] %v9010_v62  ;;  %v9013_v4 = vpop.f32.mrb[99].mxu0 }
 0x2a8   : > { %10530 = vst [vmem:[#allocation53_spill] sm:$0xff] %v9013_v4  ;;  %v6755_v58 = vpop.f32.mrb[88].mxu1 }
 0x2a9   : > { %3827 = vrot.lane.b32.xlu1 %v6755_v58, %s7028_s27  ;;  %v3706_v22 = vpop.f32.mrb[89].mxu1 }
 0x2aa   : > { %v9016_v2 = vpop.f32.mrb[100].mxu0  ;;  %3825 = vrot.lane.b32.xlu0 %v3706_v22, %s7028_s27 }
 0x2ab   : > { %10531 = vst [vmem:[#allocation54_spill] sm:$0xff] %v9016_v2  ;;  %v9019_v53 = vpop.f32.mrb[101].mxu0 }
 0x2ac   : > { %10532 = vst [vmem:[#allocation55_spill] sm:$0xff] %v9019_v53  ;;  %v6758_v59 = vpop.f32.mrb[90].mxu1 }
 0x2ad   : > { %3831 = vrot.lane.b32.xlu1 %v6758_v59, %s7028_s27  ;;  %v3716_v42 = vpop.f32.mrb[91].mxu1 }
 0x2ae   : > { %v6784_v62 = vpop.f32.mrb[102].mxu0  ;;  %3829 = vrot.lane.b32.xlu0 %v3716_v42, %s7028_s27 }
 0x2af   : > { %v9029_v58 = vadd.f32 %v6784_v62, %v9025_v41  ;;  %v4140_v2 = vpop.f32.mrb[103].mxu0 }
 0x2b0   : > { %v9032_v22 = vadd.f32 %v9025_v41, %v4140_v2  ;;  %v6761_v53 = vpop.f32.mrb[92].mxu1 }
 0x2b1   : > { %10533 = vst [vmem:[#allocation56_spill] sm:$0xff] %v9029_v58  ;;  %3835 = vrot.lane.b32.xlu1 %v6761_v53, %s7028_s27  ;;  %v3726_v59 = vpop.f32.mrb[93].mxu1 }
 0x2b2   : > { %10534 = vst [vmem:[#allocation57_spill] sm:$0xff] %v9032_v22  ;;  %v6787_v4 = vpop.f32.mrb[104].mxu0  ;;  %3833 = vrot.lane.b32.xlu0 %v3726_v59, %s7028_s27 }
 0x2b3   : > { %v9037_v45 = vadd.f32 %v6787_v4, %v9025_v41  ;;  %v4150_v10 = vpop.f32.mrb[105].mxu0 }
 0x2b4   : > { %v9040_v42 = vadd.f32 %v9025_v41, %v4150_v10  ;;  %v6764_v62 = vpop.f32.mrb[94].mxu1 }
 0x2b5   : > { %3839 = vrot.lane.b32.xlu1 %v6764_v62, %s7028_s27  ;;  %v3736_v58 = vpop.f32.mrb[95].mxu1 }
 0x2b6   : > { %v6790_v2 = vpop.f32.mrb[106].mxu0  ;;  %3837 = vrot.lane.b32.xlu0 %v3736_v58, %s7028_s27 }
 0x2b7   : > { %v9045_v53 = vadd.f32 %v6790_v2, %v9025_v41  ;;  %v4160_v22 = vpop.f32.mrb[107].mxu0 }
 0x2b8   : > { %v9048_v59 = vadd.f32 %v9025_v41, %v4160_v22 }
 0x2b9   : > { %3262 = vrot.lane.b32.xlu1 %v8919_v40, %s7029_s30 }
 0x2ba   : > { %v6793_v10 = vpop.f32.mrb[108].mxu0  ;;  %3260 = vrot.lane.b32.xlu0 %v8921_v0, %s7029_s30 }
 0x2bb   : > { %v9055_v4 = vadd.f32 %v6793_v10, %v9025_v41  ;;  %v4170_v62 = vpop.f32.mrb[109].mxu0 }
 0x2bc   : > { %v9058_v58 = vadd.f32 %v9025_v41, %v4170_v62 }
 0x2bd   : > { %3266 = vrot.lane.b32.xlu1 %v8923_v28, %s7029_s30 }
 0x2be   : > { %v6796_v22 = vpop.f32.mrb[110].mxu0  ;;  %3264 = vrot.lane.b32.xlu0 %v8925_v5, %s7029_s30 }
 0x2bf   : > { %v9065_v40 = vadd.f32 %v6796_v22, %v9025_v41  ;;  %v4180_v2 = vpop.f32.mrb[111].mxu0 }
 0x2c0   : > { %v9068_v0 = vadd.f32 %v9025_v41, %v4180_v2 }
 0x2c1   : > { %3270 = vrot.lane.b32.xlu1 %v8927_v47, %s7029_s30 }
 0x2c2   : > { %v6799_v10 = vpop.f32.mrb[112].mxu0  ;;  %3268 = vrot.lane.b32.xlu0 %v8929_v30, %s7029_s30 }
 0x2c3   : > { %v9075_v28 = vadd.f32 %v6799_v10, %v9025_v41  ;;  %v4190_v62 = vpop.f32.mrb[113].mxu0 }
 0x2c4   : > { %v9078_v5 = vadd.f32 %v9025_v41, %v4190_v62 }
 0x2c5   : > { %3274 = vrot.lane.b32.xlu1 %v8931_v9, %s7029_s30 }
 0x2c6   : > { %v6802_v22 = vpop.f32.mrb[114].mxu0  ;;  %3272 = vrot.lane.b32.xlu0 %v8933_v60, %s7029_s30 }
 0x2c7   : > { %v9085_v47 = vadd.f32 %v6802_v22, %v9025_v41  ;;  %v4200_v2 = vpop.f32.mrb[115].mxu0 }
 0x2c8   : > { %v9088_v30 = vadd.f32 %v9025_v41, %v4200_v2 }
 0x2c9   : > { %3278 = vrot.lane.b32.xlu1 %v8935_v15, %s7029_s30 }
 0x2ca   : > { %v6805_v10 = vpop.f32.mrb[116].mxu0  ;;  %3276 = vrot.lane.b32.xlu0 %v8937_v31, %s7029_s30 }
 0x2cb   : > { %v9095_v9 = vadd.f32 %v6805_v10, %v9025_v41  ;;  %v4210_v62 = vpop.f32.mrb[117].mxu0 }
 0x2cc   : > { %v9098_v60 = vadd.f32 %v9025_v41, %v4210_v62 }
 0x2cd   : > { %10535 = vst [vmem:[#allocation58_spill] sm:$0xff] %v9095_v9  ;;  %3282 = vrot.lane.b32.xlu1 %v8939_v13, %s7029_s30 }
 0x2ce   : > { %10536 = vst [vmem:[#allocation59_spill] sm:$0xff] %v9098_v60  ;;  %v6808_v22 = vpop.f32.mrb[118].mxu0  ;;  %3280 = vrot.lane.b32.xlu0 %v8941_v61, %s7029_s30 }
 0x2cf   : > { %v9105_v15 = vadd.f32 %v6808_v22, %v9025_v41  ;;  %v4220_v2 = vpop.f32.mrb[119].mxu0 }
 0x2d0   : > { %v9108_v31 = vadd.f32 %v9025_v41, %v4220_v2 }
 0x2d1   : > { %10537 = vst [vmem:[#allocation60_spill] sm:$0xff] %v9105_v15  ;;  %3286 = vrot.lane.b32.xlu1 %v8943_v3, %s7029_s30 }
 0x2d2   : > { %10538 = vst [vmem:[#allocation61_spill] sm:$0xff] %v9108_v31  ;;  %v6811_v10 = vpop.f32.mrb[120].mxu0  ;;  %3284 = vrot.lane.b32.xlu0 %v8945_v11, %s7029_s30 }
 0x2d3   : > { %v9115_v13 = vadd.f32 %v6811_v10, %v9025_v41  ;;  %v4230_v62 = vpop.f32.mrb[121].mxu0 }
 0x2d4   : > { %v9118_v61 = vadd.f32 %v9025_v41, %v4230_v62 }
 0x2d5   : > { %10539 = vst [vmem:[#allocation62_spill] sm:$0xff] %v9115_v13  ;;  %3290 = vrot.lane.b32.xlu1 %v8947_v1, %s7029_s30 }
 0x2d6   : > { %10540 = vst [vmem:[#allocation63_spill] sm:$0xff] %v9118_v61  ;;  %v6814_v22 = vpop.f32.mrb[122].mxu0  ;;  %3288 = vrot.lane.b32.xlu0 %v8949_v63, %s7029_s30 }
 0x2d7   : > { %v9125_v3 = vadd.f32 %v6814_v22, %v9025_v41  ;;  %v4240_v2 = vpop.f32.mrb[123].mxu0 }
 0x2d8   : > { %v9128_v11 = vadd.f32 %v9025_v41, %v4240_v2  ;;  %v9144_v2 = vpop.permute.xlu0 %4671 }
 0x2d9   : > { %10541 = vst [vmem:[#allocation64_spill] sm:$0xff] %v9125_v3  ;;  %3294 = vrot.lane.b32.xlu1 %v8951_v44, %s7029_s30 }
 0x2da   : > { %10542 = vst [vmem:[#allocation65_spill] sm:$0xff] %v9128_v11  ;;  %v6817_v10 = vpop.f32.mrb[124].mxu0 }
 0x2db   : > { %v9133_v62 = vadd.f32 %v6817_v10, %v9025_v41  ;;  %v4250_v13 = vpop.f32.mrb[125].mxu0 }
 0x2dc   : > { %v9136_v1 = vadd.f32 %v9025_v41, %v4250_v13 }
 0x2dd   : > { %10543 = vst [vmem:[#allocation66_spill] sm:$0xff] %v9133_v62 }
 0x2de   : > { %10544 = vst [vmem:[#allocation67_spill] sm:$0xff] %v9136_v1  ;;  %v6820_v61 = vpop.f32.mrb[126].mxu0 }
 0x2df   : > { %v9139_v63 = vadd.f32 %v6820_v61, %v9025_v41  ;;  %v4260_v22 = vpop.f32.mrb[127].mxu0 }
 0x2e0   : > { %v9142_v3 = vadd.f32 %v9025_v41, %v4260_v22 }
 0x2e1   : > { %10545 = vst [vmem:[#allocation68_spill] sm:$0xff] %v9139_v63 }
 0x2e2   : > { %10546 = vst [vmem:[#allocation69_spill] sm:$0xff] %v9142_v3 }
 0x2e8   : > { %v3780_v11 = vpop.permute.xlu1 %3779 }
 0x2e9   : > { %v3874_v44 = vadd.f32 %v3780_v11, %v8584_v21  ;;  %v3778_v15 = vpop.permute.xlu0 %3777 }
 0x2ea   : > { %v3873_v10 = vadd.f32 %v3778_v15, %v8592_v20 }
 0x2eb   : > { %v3906_v62 = vmax.f32 %v3874_v44, 0.0 }
 0x2ec   : > { %v3905_v31 = vmax.f32 %v3873_v10, 0.0 }
 0x2ed   : > { %v4675_v13 = vmul.f32 %v9144_v2, %v3906_v62 }
 0x2ee   : > { %v4674_v1 = vmul.f32 %v9144_v2, %v3905_v31 }
 0x2ef   : > { %v3784_v61 = vpop.permute.xlu1 %3783  ;;  %4740 = vrot.lane.b32.xlu0 %v4675_v13, %s7028_s27 }
 0x2f0   : > { %v3876_v22 = vadd.f32 %v3784_v61, %v8620_v43  ;;  %v3782_v63 = vpop.permute.xlu0 %3781  ;;  %4738 = vrot.lane.b32.xlu1 %v4674_v1, %s7028_s27 }
 0x2f1   : > { %v3875_v3 = vadd.f32 %v3782_v63, %v8627_v57 }
 0x2f2   : > { %v3908_v11 = vmax.f32 %v3876_v22, 0.0 }
 0x2f3   : > { %v3907_v9 = vmax.f32 %v3875_v3, 0.0  ;;  %v3788_v60 = vpop.permute.xlu1 %3787  ;;  %3292 = vrot.lane.b32.xlu0 %v8953_v56, %s7029_s30 }
 0x2f4   : > { %v4677_v15 = vmul.f32 %v9144_v2, %v3908_v11  ;;  %v3786_v62 = vpop.permute.xlu0 %3785  ;;  %3298 = vrot.lane.b32.xlu1 %v8955_v27, %s7029_s30  ;;  %v3878_v44 = vadd.f32 %v3788_v60, %v8659_v37 }
 0x2f5   : > { %v4676_v31 = vmul.f32 %v9144_v2, %v3907_v9  ;;  %v3877_v1 = vadd.f32 %v3786_v62, %v8667_v6 }
 0x2f6   : > { %v3910_v63 = vmax.f32 %v3878_v44, 0.0 }
 0x2f7   : > { %v3792_v10 = vpop.permute.xlu1 %3791  ;;  %4744 = vrot.lane.b32.xlu0 %v4677_v15, %s7028_s27  ;;  %v3909_v56 = vmax.f32 %v3877_v1, 0.0 }
 0x2f8   : > { %v3790_v3 = vpop.permute.xlu0 %3789  ;;  %4742 = vrot.lane.b32.xlu1 %v4676_v31, %s7028_s27  ;;  %v4679_v27 = vmul.f32 %v9144_v2, %v3910_v63  ;;  %v3880_v9 = vadd.f32 %v3792_v10, %v8682_v14 }
 0x2f9   : > { %v4678_v60 = vmul.f32 %v9144_v2, %v3909_v56  ;;  %v3879_v22 = vadd.f32 %v3790_v3, %v8696_v49 }
 0x2fa   : > { %v3912_v62 = vmax.f32 %v3880_v9, 0.0 }
 0x2fb   : > { %v3796_v13 = vpop.permute.xlu1 %3795  ;;  %3296 = vrot.lane.b32.xlu0 %v8957_v25, %s7029_s30  ;;  %v3911_v25 = vmax.f32 %v3879_v22, 0.0 }
 0x2fc   : > { %v3794_v61 = vpop.permute.xlu0 %3793  ;;  %3302 = vrot.lane.b32.xlu1 %v8959_v26, %s7029_s30  ;;  %v4681_v44 = vmul.f32 %v9144_v2, %v3912_v62  ;;  %v3882_v1 = vadd.f32 %v3796_v13, %v8717_v17 }
 0x2fd   : > { %v4680_v10 = vmul.f32 %v9144_v2, %v3911_v25  ;;  %v3881_v3 = vadd.f32 %v3794_v61, %v8729_v39 }
 0x2ff   : > { %v3800_v11 = vpop.permute.xlu1 %3799  ;;  %4748 = vrot.lane.b32.xlu0 %v4679_v27, %s7028_s27  ;;  %v3914_v27 = vmax.f32 %v3882_v1, 0.0 }
 0x300   : > { %v3798_v15 = vpop.permute.xlu0 %3797  ;;  %4746 = vrot.lane.b32.xlu1 %v4678_v60, %s7028_s27  ;;  %v3884_v9 = vadd.f32 %v3800_v11, %v8753_v46 }
 0x301   : > { %v4683_v13 = vmul.f32 %v9144_v2, %v3914_v27  ;;  %v3883_v22 = vadd.f32 %v3798_v15, %v8763_v48 }
 0x302   : > { %v3916_v62 = vmax.f32 %v3884_v9, 0.0 }
 0x303   : > { %v3804_v31 = vpop.permute.xlu1 %3803  ;;  %3300 = vrot.lane.b32.xlu0 %v8961_v55, %s7029_s30  ;;  %v3913_v55 = vmax.f32 %v3881_v3, 0.0 }
 0x304   : > { %v3802_v26 = vpop.permute.xlu0 %3801  ;;  %3306 = vrot.lane.b32.xlu1 %v8963_v32, %s7029_s30  ;;  %v3886_v11 = vadd.f32 %v3804_v31, %v8777_v19 }
 0x305   : > { %v4682_v60 = vmul.f32 %v9144_v2, %v3913_v55  ;;  %v3885_v1 = vadd.f32 %v3802_v26, %v8783_v36 }
 0x306   : > { %v3918_v3 = vmax.f32 %v3886_v11, 0.0 }
 0x307   : > { %v3808_v63 = vpop.permute.xlu1 %3807  ;;  %4752 = vrot.lane.b32.xlu0 %v4681_v44, %s7028_s27  ;;  %v3917_v55 = vmax.f32 %v3885_v1, 0.0 }
 0x308   : > { %v3806_v56 = vpop.permute.xlu0 %3805  ;;  %4750 = vrot.lane.b32.xlu1 %v4680_v10, %s7028_s27 }
 0x309   : > { %v4686_v26 = vmul.f32 %v9144_v2, %v3917_v55 }
 0x30b   : > { %3304 = vrot.lane.b32.xlu0 %v8965_v18, %s7029_s30  ;;  %v3812_v61 = vpop.permute.xlu1 %3811  ;;  %v3915_v18 = vmax.f32 %v3883_v22, 0.0 }
 0x30c   : > { %v3810_v32 = vpop.permute.xlu0 %3809  ;;  %3310 = vrot.lane.b32.xlu1 %v8967_v52, %s7029_s30  ;;  %v4685_v52 = vmul.f32 %v9144_v2, %v3916_v62 }
 0x30d   : > { %v4684_v15 = vmul.f32 %v9144_v2, %v3915_v18 }
 0x30f   : > { %4756 = vrot.lane.b32.xlu0 %v4683_v13, %s7028_s27  ;;  %v3816_v44 = vpop.permute.xlu1 %3815  ;;  %v3887_v13 = vadd.f32 %v3806_v56, %v8800_v50 }
 0x310   : > { %4754 = vrot.lane.b32.xlu1 %v4682_v60, %s7028_s27  ;;  %v3814_v25 = vpop.permute.xlu0 %3813 }
 0x311   : > { %v3919_v22 = vmax.f32 %v3887_v13, 0.0  ;;  %v3891_v11 = vadd.f32 %v3814_v25, %v8833_v35  ;;  %v10548_v13 = vld [vmem:[#allocation27_spill] sm:$0xff] }
 0x313   : > { %3308 = vrot.lane.b32.xlu0 %v8969_v8, %s7029_s30  ;;  %v3820_v27 = vpop.permute.xlu1 %3819  ;;  %v3888_v8 = vadd.f32 %v3808_v63, %v8795_v23  ;;  %v3890_v63 = vadd.f32 %v3812_v61, %v8811_v34  ;;  %v4688_v18 = vmul.f32 %v9144_v2, %v3919_v22  ;;  %v3923_v1 = vmax.f32 %v3891_v11, 0.0 }
 0x314   : > { %3314 = vrot.lane.b32.xlu1 %v8971_v33, %s7029_s30  ;;  %v3818_v10 = vpop.permute.xlu0 %3817  ;;  %v4687_v33 = vmul.f32 %v9144_v2, %v3918_v3 }
 0x315   : > { %v3920_v60 = vmax.f32 %v3888_v8, 0.0  ;;  %v3893_v3 = vadd.f32 %v3818_v10, %v8845_v29 }
 0x317   : > { %4760 = vrot.lane.b32.xlu0 %v4685_v52, %s7028_s27  ;;  %v3824_v9 = vpop.permute.xlu1 %3823 }
 0x318   : > { %4758 = vrot.lane.b32.xlu1 %v4684_v15, %s7028_s27  ;;  %v3822_v31 = vpop.permute.xlu0 %3821 }
 0x31b   : > { %3312 = vrot.lane.b32.xlu0 %v8973_v51, %s7029_s30  ;;  %v3889_v51 = vadd.f32 %v3810_v32, %v8816_v7  ;;  %v3828_v56 = vpop.permute.xlu1 %3827  ;;  %v3922_v32 = vmax.f32 %v3890_v63, 0.0 }
 0x31c   : > { %3318 = vrot.lane.b32.xlu1 %v8975_v16, %s7029_s30  ;;  %v3826_v62 = vpop.permute.xlu0 %3825  ;;  %v4689_v16 = vmul.f32 %v9144_v2, %v3920_v60  ;;  %v3895_v60 = vadd.f32 %v3822_v31, %v10548_v13 }
 0x31d   : > { %v3921_v52 = vmax.f32 %v3889_v51, 0.0  ;;  %v4691_v25 = vmul.f32 %v9144_v2, %v3922_v32  ;;  %v10549_v51 = vld [vmem:[#allocation24_spill] sm:$0xff] }
 0x31f   : > { %4764 = vrot.lane.b32.xlu0 %v4687_v33, %s7028_s27  ;;  %v3832_v61 = vpop.permute.xlu1 %3831  ;;  %v10547_v33 = vld [vmem:[#allocation17_spill] sm:$0xff] }
 0x320   : > { %4762 = vrot.lane.b32.xlu1 %v4686_v26, %s7028_s27  ;;  %v3830_v15 = vpop.permute.xlu0 %3829  ;;  %v3894_v8 = vadd.f32 %v3820_v27, %v10547_v33  ;;  %v4692_v26 = vmul.f32 %v9144_v2, %v3923_v1  ;;  %v10550_v27 = vld [vmem:[#allocation31_spill] sm:$0xff] }
 0x321   : > { %v3897_v11 = vadd.f32 %v3826_v62, %v10550_v27 }
 0x323   : > { %3316 = vrot.lane.b32.xlu0 %v8977_v38, %s7029_s30  ;;  %v3892_v38 = vadd.f32 %v3816_v44, %v8829_v54  ;;  %v3925_v44 = vmax.f32 %v3893_v3, 0.0  ;;  %v3836_v63 = vpop.permute.xlu1 %3835 }
 0x324   : > { %3322 = vrot.lane.b32.xlu1 %v8980_v24, %s7029_s30  ;;  %v4690_v24 = vmul.f32 %v9144_v2, %v3921_v52  ;;  %v3834_v22 = vpop.permute.xlu0 %3833  ;;  %v3927_v52 = vmax.f32 %v3895_v60, 0.0 }
 0x325   : > { %v3924_v55 = vmax.f32 %v3892_v38, 0.0  ;;  %v10551_v38 = vld [vmem:[#allocation28_spill] sm:$0xff] }
 0x326   : > { %v4696_v3 = vmul.f32 %v9144_v2, %v3927_v52 }
 0x327   : > { %4768 = vrot.lane.b32.xlu0 %v4689_v16, %s7028_s27  ;;  %v4693_v10 = vmul.f32 %v9144_v2, %v3924_v55  ;;  %v3896_v16 = vadd.f32 %v3824_v9, %v10549_v51  ;;  %v10552_v9 = vld [vmem:[#allocation35_spill] sm:$0xff]  ;;  %v10566_v51 = vld [vmem:[#allocation8_spill] sm:$0xff] }
 0x328   : > { %4766 = vrot.lane.b32.xlu1 %v4688_v18, %s7028_s27  ;;  %v4694_v18 = vmul.f32 %v9144_v2, %v3925_v44  ;;  %v3838_v1 = vpop.permute.xlu0 %3837  ;;  %v3899_v55 = vadd.f32 %v3830_v15, %v10552_v9  ;;  %v10553_v44 = vld [vmem:[#allocation32_spill] sm:$0xff]  ;;  %v10563_v9 = vld [vmem:[#allocation5_spill] sm:$0xff]  ;;  %v10567_v29 = vmax.f32 %v10566_v51, 0.0 }
 0x329   : > { %v3928_v32 = vmax.f32 %v3896_v16, 0.0  ;;  %v3900_v60 = vadd.f32 %v3832_v61, %v10553_v44  ;;  %v10564_v44 = vmax.f32 %v10563_v9, 0.0 }
 0x32b   : > { %3320 = vrot.lane.b32.xlu0 %v8983_v12, %s7029_s30  ;;  %v3926_v12 = vmax.f32 %v3894_v8, 0.0  ;;  %v3840_v8 = vpop.permute.xlu1 %3839  ;;  %v4697_v62 = vmul.f32 %v9144_v2, %v3928_v32  ;;  %v3932_v52 = vmax.f32 %v3900_v60, 0.0 }
 0x32c   : > { %4770 = vrot.lane.b32.xlu1 %v4690_v24, %s7028_s27  ;;  %v3898_v24 = vadd.f32 %v3828_v56, %v10551_v38  ;;  %v10554_v56 = vld [vmem:[#allocation39_spill] sm:$0xff]  ;;  %v10565_v38 = vld [vmem:[#allocation52_spill] sm:$0xff] }
 0x32d   : > { %v4695_v31 = vmul.f32 %v9144_v2, %v3926_v12  ;;  %v3931_v12 = vmax.f32 %v3899_v55, 0.0  ;;  %v3901_v16 = vadd.f32 %v3834_v22, %v10554_v56  ;;  %v4701_v22 = vmul.f32 %v9144_v2, %v3932_v52 }
 0x32e   : > { %v4126_v13 = vadd.f32 %v10565_v38, %v9025_v41 }
 0x32f   : > { %4772 = vrot.lane.b32.xlu0 %v4691_v25, %s7028_s27  ;;  %v3929_v25 = vmax.f32 %v3897_v11, 0.0  ;;  %v10555_v11 = vld [vmem:[#allocation36_spill] sm:$0xff]  ;;  %v9259_v32 = vpop.permute.xlu1 %3262  ;;  %v4700_v61 = vmul.f32 %v9144_v2, %v3931_v12 }
 0x330   : > { %4774 = vrot.lane.b32.xlu1 %v4692_v26, %s7028_s27  ;;  %v3930_v26 = vmax.f32 %v3898_v24, 0.0  ;;  %v3933_v24 = vmax.f32 %v3901_v16, 0.0 }
 0x332   : > { %v4699_v15 = vmul.f32 %v9144_v2, %v3930_v26 }
 0x333   : > { %4776 = vrot.lane.b32.xlu0 %v4693_v10, %s7028_s27  ;;  %v4698_v10 = vmul.f32 %v9144_v2, %v3929_v25  ;;  %v9270_v56 = vpop.permute.xlu1 %3266 }
 0x334   : > { %4778 = vrot.lane.b32.xlu1 %v4694_v18, %s7028_s27  ;;  %v9253_v18 = vpop.permute.xlu0 %3260 }
 0x337   : > { %4780 = vrot.lane.b32.xlu0 %v4695_v31, %s7028_s27  ;;  %v3902_v31 = vadd.f32 %v3836_v63, %v10555_v11  ;;  %v4702_v63 = vmul.f32 %v9144_v2, %v3933_v24  ;;  %v9281_v52 = vpop.permute.xlu1 %3270 }
 0x338   : > { %4782 = vrot.lane.b32.xlu1 %v4696_v3, %s7028_s27  ;;  %v10556_v3 = vld [vmem:[#allocation43_spill] sm:$0xff]  ;;  %v9267_v26 = vpop.permute.xlu0 %3264 }
 0x339   : > { %v3903_v25 = vadd.f32 %v3838_v1, %v10556_v3  ;;  %v3934_v55 = vmax.f32 %v3902_v31, 0.0  ;;  %v10562_v3 = vld [vmem:[#allocation53_spill] sm:$0xff] }
 0x33b   : > { %4784 = vrot.lane.b32.xlu0 %v4697_v62, %s7028_s27  ;;  %v10557_v62 = vld [vmem:[#allocation40_spill] sm:$0xff]  ;;  %v3935_v60 = vmax.f32 %v3903_v25, 0.0  ;;  %v4703_v1 = vmul.f32 %v9144_v2, %v3934_v55 }
 0x33c   : > { %4786 = vrot.lane.b32.xlu1 %v4698_v10, %s7028_s27  ;;  %v3904_v10 = vadd.f32 %v3840_v8, %v10557_v62  ;;  %v4121_v62 = vadd.f32 %v9025_v41, %v10562_v3 }
 0x33d   : > { %v4704_v16 = vmul.f32 %v9144_v2, %v3935_v60 }
 0x33e   : > { %v3936_v12 = vmax.f32 %v3904_v10, 0.0  ;;  %v10558_v10 = vld [vmem:[#allocation4_spill] sm:$0xff] }
 0x33f   : > { %4788 = vrot.lane.b32.xlu0 %v4699_v15, %s7028_s27  ;;  %v9276_v15 = vpop.permute.xlu0 %3268 }
 0x340   : > { %4790 = vrot.lane.b32.xlu1 %v4700_v61, %s7028_s27  ;;  %v4705_v8 = vmul.f32 %v9144_v2, %v3936_v12  ;;  %v9286_v61 = vpop.permute.xlu1 %3274  ;;  %v10559_v2 = vld [vmem:[#allocation46_spill] sm:$0xff] }
 0x341   : > { %v4116_v60 = vadd.f32 %v10559_v2, %v9025_v41  ;;  %v10560_v12 = vld [vmem:[#allocation6_spill] sm:$0xff]  ;;  %v4971_v2 = vsub.f32 %v4121_v62, %v10567_v29 }
 0x343   : > { %4792 = vrot.lane.b32.xlu0 %v4701_v22, %s7028_s27  ;;  %v9284_v31 = vpop.permute.xlu0 %3272  ;;  %v4970_v27 = vsub.f32 %v4116_v60, %v10564_v44  ;;  %v5003_v3 = vmul.f32 %v4971_v2, %v4971_v2 }
 0x344   : > { %4794 = vrot.lane.b32.xlu1 %v4702_v63, %s7028_s27  ;;  %v9290_v25 = vpop.permute.xlu1 %3278  ;;  %v4111_v63 = vadd.f32 %v9025_v41, %v10558_v10 }
 0x345   : > { %v5002_v35 = vmul.f32 %v4970_v27, %v4970_v27  ;;  %v5039_v29 = vsel %vm2194_vm0, %v5003_v3, 0.0  ;;  %v4271_v3 = vld [vmem:[%s10335_s10 + $0x10] sm:$0xff] }
 0x347   : > { %4796 = vrot.lane.b32.xlu0 %v4703_v1, %s7028_s27  ;;  %v9288_v24 = vpop.permute.xlu0 %3276  ;;  %v5036_v38 = vsel %vm2194_vm0, %v5002_v35, 0.0  ;;  %v4269_v35 = vld [vmem:[%s10335_s10] sm:$0xff] }
 0x348   : > { %4798 = vrot.lane.b32.xlu1 %v4704_v16, %s7028_s27  ;;  %v9294_v55 = vpop.permute.xlu1 %3282  ;;  %v10561_v16 = vmax.f32 %v10560_v12, 0.0  ;;  %v10568_v12 = vld [vmem:[#allocation7_spill] sm:$0xff] }
 0x34b   : > { %4800 = vrot.lane.b32.xlu0 %v4705_v8, %s7028_s27  ;;  %v9292_v22 = vpop.permute.xlu0 %3280  ;;  %v4969_v8 = vsub.f32 %v4111_v63, %v10561_v16  ;;  %v10569_v63 = vmax.f32 %v10568_v12, 0.0  ;;  %v3357_v12 = vadd.f32 %v9259_v32, %v8584_v21 }
 0x34c   : > { %v9306_v11 = vpop.permute.xlu1 %3286 }
 0x34d   : > { %v5001_v10 = vmul.f32 %v4969_v8, %v4969_v8  ;;  %v4972_v16 = vsub.f32 %v4126_v13, %v10569_v63 }
 0x34f   : > { %v9300_v1 = vpop.permute.xlu0 %3284  ;;  %v5033_v9 = vsel %vm2194_vm0, %v5001_v10, 0.0  ;;  %v5004_v44 = vmul.f32 %v4972_v16, %v4972_v16  ;;  %v4270_v10 = vld [vmem:[%s10335_s10 + $0x8] sm:$0xff] }
 0x350   : > { %v9318_v54 = vpop.permute.xlu1 %3290  ;;  %v6913_v2 = vpack.c.bf16 %v4270_v10, %v4269_v35 }
 0x351   : > { %v5042_v13 = vsel %vm2194_vm0, %v5004_v44, 0.0  ;;  %v3356_v44 = vadd.f32 %v9253_v18, %v8592_v20 }
 0x352   : > { %6914 = vmatprep.subr.bf16.mxu1 %v6913_v2 }
 0x353   : > { %v9314_v33 = vpop.permute.xlu0 %3288  ;;  %6916 = vmatpush3.bf16.msra.mxu1 %v6913_v2  ;;  %v3388_v32 = vmax.f32 %v3356_v44, 0.0  ;;  %v10581_v44 = vld [vmem:[#allocation54_spill] sm:$0xff] }
 0x354   : > { %v9324_v51 = vpop.permute.xlu1 %3294 }
 0x361   : > { %v9320_v7 = vpop.permute.xlu0 %4740 }
 0x362   : > { %v9330_v62 = vpop.permute.xlu1 %4738 }
 0x365   : > { %v9327_v27 = vpop.permute.xlu0 %3292 }
 0x366   : > { %v9334_v8 = vpop.permute.xlu1 %3298 }
 0x367   : > { %10570 = vst [vmem:[#allocation4_spill] sm:$0xff] %v9334_v8 }
 0x369   : > { %v9332_v60 = vpop.permute.xlu0 %4744 }
 0x36a   : > { %5034 = vadd.xlane.f32.xlu0 %v5033_v9  ;;  %v9346_v16 = vpop.permute.xlu1 %4742  ;;  %v4272_v9 = vld [vmem:[%s10335_s10 + $0x18] sm:$0xff] }
 0x36c   : > { %5037 = vadd.xlane.f32.xlu1 %v5036_v38  ;;  %v6917_v38 = vpack.c.bf16 %v4272_v9, %v4271_v3  ;;  %v10580_v3 = vld [vmem:[#allocation55_spill] sm:$0xff] }
 0x36d   : > { %v9344_v63 = vpop.permute.xlu0 %3296  ;;  %v4131_v9 = vadd.f32 %v9025_v41, %v10580_v3 }
 0x36e   : > { %5040 = vadd.xlane.f32.xlu0 %v5039_v29  ;;  %10571 = vst [vmem:[#allocation46_spill] sm:$0xff] %v9344_v63  ;;  %v3389_v29 = vmax.f32 %v3357_v12, 0.0  ;;  %6918 = vmatprep.subr.bf16.mxu1 %v6917_v38 }
 0x36f   : > { %6920 = vmatpush3.bf16.msra.mxu1 %v6917_v38  ;;  %v4136_v38 = vadd.f32 %v10581_v44, %v9025_v41 }
 0x370   : > { %5043 = vadd.xlane.f32.xlu1 %v5042_v13  ;;  %v9359_v13 = vpop.permute.xlu1 %3302 }
 0x371   : > { %v9356_v21 = vpop.permute.xlu0 %4748  ;;  %10573 = vst [vmem:[#allocation53_spill] sm:$0xff] %v9359_v13 }
 0x372   : > { %10572 = vst [vmem:[#allocation6_spill] sm:$0xff] %v9356_v21 }
 0x374   : > { %v9364_v10 = vpop.permute.xlu1 %4746 }
 0x375   : > { %v9362_v35 = vpop.permute.xlu0 %3300  ;;  %10575 = vst [vmem:[#allocation52_spill] sm:$0xff] %v9364_v10 }
 0x376   : > { %10574 = vst [vmem:[#allocation5_spill] sm:$0xff] %v9362_v35 }
 0x378   : > { %v9368_v20 = vpop.permute.xlu1 %3306 }
 0x379   : > { %v9366_v2 = vpop.permute.xlu0 %4752  ;;  %10577 = vst [vmem:[#allocation7_spill] sm:$0xff] %v9368_v20 }
 0x37a   : > { %10576 = vst [vmem:[#allocation8_spill] sm:$0xff] %v9366_v2  ;;  %v10584_v2 = vld [vmem:[#allocation9_spill] sm:$0xff] }
 0x37b   : > { %v10585_v10 = vmax.f32 %v10584_v2, 0.0 }
 0x37c   : > { %v9372_v12 = vpop.permute.xlu1 %4750 }
 0x37d   : > { %v9370_v18 = vpop.permute.xlu0 %3304  ;;  %10579 = vst [vmem:[#allocation71_spill] sm:$0xff] %v9372_v12  ;;  %v4974_v20 = vsub.f32 %v4136_v38, %v10585_v10 }
 0x37e   : > { %10578 = vst [vmem:[#allocation70_spill] sm:$0xff] %v9370_v18 }
 0x37f   : > { %v5006_v12 = vmul.f32 %v4974_v20, %v4974_v20 }
 0x380   : > { %v9382_v21 = vpop.permute.xlu1 %3310 }
 0x381   : > { %4314 = vrot.lane.b32.xlu1 %v3389_v29, %s7030_s26  ;;  %v9378_v29 = vpop.permute.xlu0 %4756  ;;  %v5048_v41 = vsel %vm2194_vm0, %v5006_v12, 0.0 }
 0x384   : > { %4312 = vrot.lane.b32.xlu0 %v3388_v32, %s7030_s26  ;;  %v10582_v32 = vld [vmem:[#allocation10_spill] sm:$0xff]  ;;  %v9388_v8 = vpop.permute.xlu1 %4754 }
 0x385   : > { %v10583_v35 = vmax.f32 %v10582_v32, 0.0  ;;  %v9386_v18 = vpop.permute.xlu0 %3308 }
 0x387   : > { %v4973_v13 = vsub.f32 %v4131_v9, %v10583_v35 }
 0x388   : > { %v9394_v35 = vpop.permute.xlu1 %3314 }
 0x389   : > { %v5005_v63 = vmul.f32 %v4973_v13, %v4973_v13  ;;  %v9392_v44 = vpop.permute.xlu0 %4760  ;;  %10587 = vst [vmem:[#allocation54_spill] sm:$0xff] %v9394_v35  ;;  %v3359_v13 = vadd.f32 %v9270_v56, %v8620_v43 }
 0x38a   : > { %10586 = vst [vmem:[#allocation55_spill] sm:$0xff] %v9392_v44 }
 0x38b   : > { %v5045_v3 = vsel %vm2194_vm0, %v5005_v63, 0.0  ;;  %v3358_v63 = vadd.f32 %v9267_v26, %v8627_v57  ;;  %v3391_v12 = vmax.f32 %v3359_v13, 0.0  ;;  %v10598_v13 = vld [vmem:[#allocation12_spill] sm:$0xff] }
 0x38c   : > { %v9398_v2 = vpop.permute.xlu1 %4758 }
 0x38d   : > { %v9396_v9 = vpop.permute.xlu0 %3312  ;;  %v3390_v38 = vmax.f32 %v3358_v63, 0.0  ;;  %v10599_v63 = vmax.f32 %v10598_v13, 0.0 }
 0x38e   : > { %10588 = vst [vmem:[#allocation10_spill] sm:$0xff] %v9396_v9  ;;  %v10603_v9 = vld [vmem:[#allocation56_spill] sm:$0xff] }
 0x390   : > { %v9406_v20 = vpop.permute.xlu1 %3318 }
 0x391   : > { %v9402_v10 = vpop.permute.xlu0 %4764  ;;  %10590 = vst [vmem:[#allocation72_spill] sm:$0xff] %v9406_v20 }
 0x392   : > { %10589 = vst [vmem:[#allocation9_spill] sm:$0xff] %v9402_v10 }
 0x395   : > { %v9409_v32 = vpop.permute.xlu0 %3316 }
 0x396   : > { %10591 = vst [vmem:[#allocation73_spill] sm:$0xff] %v9409_v32 }
 0x3a3   : > { %5046 = vadd.xlane.f32.xlu0 %v5045_v3  ;;  %v9411_v3 = vpop.permute.xlu1 %4762 }
 0x3a4   : > { %10592 = vst [vmem:[#allocation74_spill] sm:$0xff] %v9411_v3  ;;  %v10601_v3 = vld [vmem:[#allocation11_spill] sm:$0xff] }
 0x3a5   : > { %5049 = vadd.xlane.f32.xlu1 %v5048_v41  ;;  %v9414_v41 = vpop.permute.xlu0 %4768 }
 0x3a6   : > { %10593 = vst [vmem:[#allocation75_spill] sm:$0xff] %v9414_v41 }
 0x3a7   : > { %v9416_v43 = vpop.permute.xlu1 %3322 }
 0x3a8   : > { %10594 = vst [vmem:[#allocation76_spill] sm:$0xff] %v9416_v43 }
 0x3a9   : > { %v9418_v56 = vpop.permute.xlu0 %3320 }
 0x3aa   : > { %10595 = vst [vmem:[#allocation77_spill] sm:$0xff] %v9418_v56 }
 0x3ab   : > { %v9420_v10 = vpop.permute.xlu1 %4766 }
 0x3ac   : > { %10596 = vst [vmem:[#allocation78_spill] sm:$0xff] %v9420_v10 }
 0x3ad   : > { %v9422_v57 = vpop.permute.xlu0 %4772 }
 0x3af   : > { %v9424_v26 = vpop.permute.xlu1 %4770 }
 0x3b0   : > { %10597 = vst [vmem:[#allocation79_spill] sm:$0xff] %v9424_v26 }
 0x3b1   : > { %v9429_v20 = vpop.permute.xlu0 %4776 }
 0x3b3   : > { %v9434_v35 = vpop.permute.xlu1 %4774 }
 0x3b5   : > { %v9436_v44 = vpop.permute.xlu0 %4780 }
 0x3b6   : > { %4318 = vrot.lane.b32.xlu1 %v3391_v12, %s7030_s26  ;;  %v10600_v12 = vld [vmem:[#allocation57_spill] sm:$0xff] }
 0x3b7   : > { %v4975_v32 = vsub.f32 %v10600_v12, %v10599_v63  ;;  %v9438_v10 = vpop.permute.xlu1 %4778 }
 0x3b9   : > { %4316 = vrot.lane.b32.xlu0 %v3390_v38, %s7030_s26  ;;  %v10602_v38 = vmax.f32 %v10601_v3, 0.0  ;;  %v5007_v43 = vmul.f32 %v4975_v32, %v4975_v32  ;;  %v9442_v63 = vpop.permute.xlu0 %4784  ;;  %v3361_v32 = vadd.f32 %v9281_v52, %v8659_v37 }
 0x3ba   : > { %10604 = vst [vmem:[#allocation12_spill] sm:$0xff] %v9442_v63 }
 0x3bb   : > { %v4976_v41 = vsub.f32 %v10603_v9, %v10602_v38  ;;  %v5051_v26 = vsel %vm2194_vm0, %v5007_v43, 0.0  ;;  %v9444_v3 = vpop.permute.xlu1 %4782  ;;  %v3360_v43 = vadd.f32 %v9276_v15, %v8667_v6 }
 0x3bd   : > { %v5008_v56 = vmul.f32 %v4976_v41, %v4976_v41  ;;  %v9446_v9 = vpop.permute.xlu0 %4788  ;;  %v3392_v38 = vmax.f32 %v3360_v43, 0.0 }
 0x3be   : > { %10605 = vst [vmem:[#allocation57_spill] sm:$0xff] %v9446_v9 }
 0x3bf   : > { %v5054_v13 = vsel %vm2194_vm0, %v5008_v56, 0.0  ;;  %v9448_v12 = vpop.permute.xlu1 %4786 }
 0x3c1   : > { %v9452_v41 = vpop.permute.xlu0 %4792 }
 0x3c2   : > { %10606 = vst [vmem:[#allocation11_spill] sm:$0xff] %v9452_v41 }
 0x3c3   : > { %v9456_v56 = vpop.permute.xlu1 %4790 }
 0x3c7   : > { %v9462_v9 = vpop.permute.xlu1 %4794 }
 0x3c8   : > { %10608 = vst [vmem:[#allocation80_spill] sm:$0xff] %v9462_v9 }
 0x3cb   : > { %v9466_v37 = vpop.permute.xlu1 %4798 }
 0x3cc   : > { %10610 = vst [vmem:[#allocation82_spill] sm:$0xff] %v9466_v37 }
 0x3d8   : > { %5052 = vadd.xlane.f32.xlu0 %v5051_v26  ;;  %v3393_v26 = vmax.f32 %v3361_v32, 0.0 }
 0x3da   : > { %5055 = vadd.xlane.f32.xlu1 %v5054_v13  ;;  %v9459_v13 = vpop.permute.xlu0 %4796 }
 0x3db   : > { %10607 = vst [vmem:[#allocation56_spill] sm:$0xff] %v9459_v13 }
 0x3de   : > { %v9464_v63 = vpop.permute.xlu0 %4800 }
 0x3df   : > { %10609 = vst [vmem:[#allocation81_spill] sm:$0xff] %v9464_v63 }
 0x3eb   : > { %4322 = vrot.lane.b32.xlu1 %v3393_v26, %s7030_s26 }
 0x3ee   : > { %4320 = vrot.lane.b32.xlu0 %v3392_v38, %s7030_s26 }
 0x3f7   : > { %v5035_v6 = vpop.xlane.xlu0 %5034 }
 0x3f8   : > { %v5129_v15 = vmul.f32 0.5, %v5035_v6  ;;  %v10611_v6 = vld [vmem:[#allocation14_spill] sm:$0xff] }
 0x3f9   : > { %v5038_v52 = vpop.xlane.xlu1 %5037  ;;  %v10612_v41 = vmax.f32 %v10611_v6, 0.0 }
 0x3fa   : > { %5354 = vst.msk [vmem:[%s9473_s29] sm:$0xff] %vm5353_vm15, %v5129_v15  ;;  %v5130_v32 = vmul.f32 0.5, %v5038_v52  ;;  %v10613_v52 = vld [vmem:[#allocation13_spill] sm:$0xff] }
 0x3fb   : > { %v5041_v43 = vpop.xlane.xlu0 %5040  ;;  %v4977_v15 = vsub.f32 %v9040_v42, %v10612_v41  ;;  %v10614_v9 = vmax.f32 %v10613_v52, 0.0  ;;  %v3362_v42 = vadd.f32 %v9284_v31, %v8696_v49  ;;  %v10615_v49 = vld [vmem:[#allocation16_spill] sm:$0xff] }
 0x3fc   : > { %5355 = vst.msk [vmem:[%s9473_s29 + $0x8] sm:$0xff] %vm5353_vm15, %v5130_v32  ;;  %v5131_v26 = vmul.f32 0.5, %v5041_v43  ;;  %v10616_v31 = vmax.f32 %v10615_v49, 0.0 }
 0x3fd   : > { %v5044_v38 = vpop.xlane.xlu1 %5043  ;;  %v4978_v32 = vsub.f32 %v9037_v45, %v10614_v9  ;;  %v5009_v43 = vmul.f32 %v4977_v15, %v4977_v15  ;;  %v3394_v45 = vmax.f32 %v3362_v42, 0.0 }
 0x3fe   : > { %5356 = vst.msk [vmem:[%s9473_s29 + $0x10] sm:$0xff] %vm5353_vm15, %v5131_v26  ;;  %v5132_v63 = vmul.f32 0.5, %v5044_v38 }
 0x3ff   : > { %v4313_v13 = vpop.permute.xlu0 %4312  ;;  %v5010_v26 = vmul.f32 %v4978_v32, %v4978_v32  ;;  %v5057_v38 = vsel %vm2194_vm0, %v5009_v43, 0.0  ;;  %v10617_v32 = vld [vmem:[#allocation15_spill] sm:$0xff] }
 0x400   : > { %5357 = vst.msk [vmem:[%s9473_s29 + $0x18] sm:$0xff] %vm5353_vm15, %v5132_v63  ;;  %6829 = vmatprep.mubr.msk.f32.mxu1 %vm2194_vm0, %v4313_v13  ;;  %v3363_v13 = vadd.f32 %v9286_v61, %v8682_v14  ;;  %v4979_v61 = vsub.f32 %v9048_v59, %v10616_v31  ;;  %v10618_v43 = vmax.f32 %v10617_v32, 0.0  ;;  %v3364_v59 = vadd.f32 %v9288_v24, %v8729_v39  ;;  %v10619_v39 = vld [vmem:[#allocation19_spill] sm:$0xff] }
 0x401   : > { %v4315_v37 = vpop.permute.xlu1 %4314  ;;  %v5060_v63 = vsel %vm2194_vm0, %v5010_v26, 0.0  ;;  %v10620_v24 = vmax.f32 %v10619_v39, 0.0  ;;  %v3369_v39 = vadd.f32 %v9306_v11, %v8777_v19 }
 0x402   : > { %6830 = vmatmul.mubr.msk.f32.vlgmr.msra.gmra.mrb[96].mxu1 %vm2194_vm0, %v4315_v37  ;;  %v3395_v41 = vmax.f32 %v3363_v13, 0.0  ;;  %v4980_v26 = vsub.f32 %v9045_v53, %v10618_v43  ;;  %v3396_v53 = vmax.f32 %v3364_v59, 0.0 }
 0x40d   : > { %5058 = vadd.xlane.f32.xlu0 %v5057_v38  ;;  %v5011_v38 = vmul.f32 %v4979_v61, %v4979_v61 }
 0x40f   : > { %5061 = vadd.xlane.f32.xlu1 %v5060_v63  ;;  %v5012_v63 = vmul.f32 %v4980_v26, %v4980_v26  ;;  %v5063_v13 = vsel %vm2194_vm0, %v5011_v38, 0.0  ;;  %v3367_v38 = vadd.f32 %v9294_v55, %v8753_v46 }
 0x411   : > { %v5066_v42 = vsel %vm2194_vm0, %v5012_v63, 0.0  ;;  %v3399_v63 = vmax.f32 %v3367_v38, 0.0 }
 0x420   : > { %4326 = vrot.lane.b32.xlu1 %v3395_v41, %s7030_s26  ;;  %v3365_v41 = vadd.f32 %v9290_v25, %v8717_v17  ;;  %v4981_v25 = vsub.f32 %v9058_v58, %v10620_v24  ;;  %v3366_v58 = vadd.f32 %v9292_v22, %v8763_v48  ;;  %v10623_v48 = vld [vmem:[#allocation22_spill] sm:$0xff]  ;;  %v3401_v24 = vmax.f32 %v3369_v39, 0.0 }
 0x421   : > { %v10624_v22 = vmax.f32 %v10623_v48, 0.0  ;;  %v4834_v39 = vsel %vm2194_vm0, %v9330_v62, 0.0 }
 0x422   : > { %v5013_v61 = vmul.f32 %v4981_v25, %v4981_v25 }
 0x423   : > { %4324 = vrot.lane.b32.xlu0 %v3394_v45, %s7030_s26  ;;  %v3397_v45 = vmax.f32 %v3365_v41, 0.0  ;;  %v4983_v55 = vsub.f32 %v9068_v0, %v10624_v22  ;;  %v3368_v0 = vadd.f32 %v9300_v1, %v8783_v36  ;;  %v10627_v1 = vld [vmem:[#allocation26_spill] sm:$0xff] }
 0x424   : > { %v5069_v43 = vsel %vm2194_vm0, %v5013_v61, 0.0 }
 0x430   : > { %v5047_v9 = vpop.xlane.xlu0 %5046 }
 0x431   : > { %v5133_v37 = vmul.f32 0.5, %v5047_v9 }
 0x432   : > { %v5050_v6 = vpop.xlane.xlu1 %5049 }
 0x433   : > { %5358 = vst.msk [vmem:[%s9473_s29 + $0x20] sm:$0xff] %vm5353_vm15, %v5133_v37  ;;  %v5134_v15 = vmul.f32 0.5, %v5050_v6 }
 0x434   : > { %v4317_v52 = vpop.permute.xlu0 %4316 }
 0x435   : > { %5359 = vst.msk [vmem:[%s9473_s29 + $0x28] sm:$0xff] %vm5353_vm15, %v5134_v15  ;;  %6832 = vmatprep.mubr.msk.f32.mxu1 %vm2194_vm0, %v4317_v52 }
 0x436   : > { %v4319_v14 = vpop.permute.xlu1 %4318 }
 0x437   : > { %6833 = vmatmul.mubr.msk.f32.gmra.mrb[98].mxu1 %vm2194_vm0, %v4319_v14  ;;  %v10621_v14 = vld [vmem:[#allocation18_spill] sm:$0xff] }
 0x438   : > { %v10622_v49 = vmax.f32 %v10621_v14, 0.0 }
 0x43a   : > { %v4982_v31 = vsub.f32 %v9055_v4, %v10622_v49  ;;  %v3398_v4 = vmax.f32 %v3366_v58, 0.0 }
 0x43c   : > { %v5014_v32 = vmul.f32 %v4982_v31, %v4982_v31 }
 0x43e   : > { %v5072_v26 = vsel %vm2194_vm0, %v5014_v32, 0.0  ;;  %v10628_v32 = vmax.f32 %v10627_v1, 0.0  ;;  %v10636_v1 = vld [vmem:[#allocation34_spill] sm:$0xff] }
 0x442   : > { %5064 = vadd.xlane.f32.xlu0 %v5063_v13 }
 0x444   : > { %5067 = vadd.xlane.f32.xlu1 %v5066_v42 }
 0x455   : > { %4330 = vrot.lane.b32.xlu1 %v3397_v45, %s7030_s26 }
 0x458   : > { %4328 = vrot.lane.b32.xlu0 %v3396_v53, %s7030_s26  ;;  %v10625_v53 = vld [vmem:[#allocation21_spill] sm:$0xff] }
 0x465   : > { %v5053_v9 = vpop.xlane.xlu0 %5052 }
 0x466   : > { %v5135_v37 = vmul.f32 0.5, %v5053_v9  ;;  %v10626_v9 = vmax.f32 %v10625_v53, 0.0 }
 0x467   : > { %v5056_v6 = vpop.xlane.xlu1 %5055 }
 0x468   : > { %5360 = vst.msk [vmem:[%s9473_s29 + $0x30] sm:$0xff] %vm5353_vm15, %v5135_v37  ;;  %v5136_v15 = vmul.f32 0.5, %v5056_v6  ;;  %v4984_v37 = vsub.f32 %v9065_v40, %v10626_v9  ;;  %v5015_v6 = vmul.f32 %v4983_v55, %v4983_v55  ;;  %v3400_v40 = vmax.f32 %v3368_v0, 0.0 }
 0x469   : > { %v4321_v52 = vpop.permute.xlu0 %4320 }
 0x46a   : > { %5361 = vst.msk [vmem:[%s9473_s29 + $0x38] sm:$0xff] %vm5353_vm15, %v5136_v15  ;;  %6835 = vmatprep.mubr.msk.f32.mxu1 %vm2194_vm0, %v4321_v52  ;;  %v5016_v15 = vmul.f32 %v4984_v37, %v4984_v37  ;;  %v5075_v52 = vsel %vm2194_vm0, %v5015_v6, 0.0  ;;  %v10633_v37 = vld [vmem:[#allocation29_spill] sm:$0xff] }
 0x46b   : > { %v4323_v17 = vpop.permute.xlu1 %4322  ;;  %v10634_v6 = vmax.f32 %v10633_v37, 0.0 }
 0x46c   : > { %6836 = vmatmul.mubr.msk.f32.gmra.mrb[100].mxu1 %vm2194_vm0, %v4323_v17  ;;  %v5078_v17 = vsel %vm2194_vm0, %v5016_v15, 0.0 }
 0x46d   : > { %v4988_v15 = vsub.f32 %v9085_v47, %v10634_v6 }
 0x477   : > { %5070 = vadd.xlane.f32.xlu0 %v5069_v43  ;;  %v4985_v43 = vsub.f32 %v9078_v5, %v10628_v32  ;;  %v3371_v5 = vadd.f32 %v9318_v54, %v8795_v23  ;;  %v10637_v32 = vmax.f32 %v10636_v1, 0.0 }
 0x479   : > { %5073 = vadd.xlane.f32.xlu1 %v5072_v26  ;;  %v10629_v26 = vld [vmem:[#allocation25_spill] sm:$0xff] }
 0x47a   : > { %v10630_v38 = vmax.f32 %v10629_v26, 0.0 }
 0x47c   : > { %v4986_v58 = vsub.f32 %v9075_v28, %v10630_v38  ;;  %v3370_v28 = vadd.f32 %v9314_v33, %v8800_v50  ;;  %v10631_v50 = vld [vmem:[#allocation30_spill] sm:$0xff]  ;;  %v10639_v38 = vld [vmem:[#allocation33_spill] sm:$0xff] }
 0x47d   : > { %v10632_v33 = vmax.f32 %v10631_v50, 0.0 }
 0x47f   : > { %v4987_v9 = vsub.f32 %v9088_v30, %v10632_v33  ;;  %v3373_v30 = vadd.f32 %v9324_v51, %v8811_v34 }
 0x48a   : > { %4334 = vrot.lane.b32.xlu1 %v3399_v63, %s7030_s26  ;;  %v5017_v63 = vmul.f32 %v4985_v43, %v4985_v43  ;;  %v10638_v43 = vld [vmem:[#allocation59_spill] sm:$0xff] }
 0x48b   : > { %v4989_v26 = vsub.f32 %v10638_v43, %v10637_v32  ;;  %v10654_v43 = vld [vmem:[#allocation17_spill] sm:$0xff] }
 0x48d   : > { %4332 = vrot.lane.b32.xlu0 %v3398_v4, %s7030_s26  ;;  %v5018_v4 = vmul.f32 %v4986_v58, %v4986_v58  ;;  %v10640_v58 = vmax.f32 %v10639_v38, 0.0 }
 0x49a   : > { %v5059_v13 = vpop.xlane.xlu0 %5058 }
 0x49b   : > { %v5137_v42 = vmul.f32 0.5, %v5059_v13  ;;  %v5081_v13 = vsel %vm2194_vm0, %v5017_v63, 0.0  ;;  %v10641_v63 = vld [vmem:[#allocation58_spill] sm:$0xff] }
 0x49c   : > { %v5062_v41 = vpop.xlane.xlu1 %5061 }
 0x49d   : > { %5362 = vst.msk [vmem:[%s9473_s29 + $0x40] sm:$0xff] %vm5353_vm15, %v5137_v42  ;;  %v5138_v59 = vmul.f32 0.5, %v5062_v41  ;;  %v5084_v42 = vsel %vm2194_vm0, %v5018_v4, 0.0  ;;  %v4837_v41 = vsel %vm2194_vm0, %v9320_v7, 0.0  ;;  %v4990_v4 = vsub.f32 %v10641_v63, %v10640_v58  ;;  %v10656_v58 = vld [vmem:[#allocation20_spill] sm:$0xff]  ;;  %v10657_v63 = vld [vmem:[#allocation5_spill] sm:$0xff] }
 0x49e   : > { %v4325_v45 = vpop.permute.xlu0 %4324 }
 0x49f   : > { %5363 = vst.msk [vmem:[%s9473_s29 + $0x48] sm:$0xff] %vm5353_vm15, %v5138_v59  ;;  %6838 = vmatprep.mubr.msk.f32.mxu1 %vm2194_vm0, %v4325_v45  ;;  %v3403_v59 = vmax.f32 %v3371_v5, 0.0  ;;  %v3402_v45 = vmax.f32 %v3370_v28, 0.0  ;;  %v4843_v5 = vsel %vm2194_vm0, %v9332_v60, 0.0 }
 0x4a0   : > { %v4327_v46 = vpop.permute.xlu1 %4326 }
 0x4a1   : > { %6839 = vmatmul.mubr.msk.f32.gmra.mrb[102].mxu1 %vm2194_vm0, %v4327_v46 }
 0x4ac   : > { %5076 = vadd.xlane.f32.xlu0 %v5075_v52  ;;  %v5019_v52 = vmul.f32 %v4987_v9, %v4987_v9 }
 0x4ae   : > { %5079 = vadd.xlane.f32.xlu1 %v5078_v17  ;;  %v5020_v17 = vmul.f32 %v4988_v15, %v4988_v15  ;;  %v5087_v0 = vsel %vm2194_vm0, %v5019_v52, 0.0 }
 0x4bf   : > { %4338 = vrot.lane.b32.xlu1 %v3401_v24, %s7030_s26  ;;  %v5090_v24 = vsel %vm2194_vm0, %v5020_v17, 0.0 }
 0x4c2   : > { %4336 = vrot.lane.b32.xlu0 %v3400_v40, %s7030_s26  ;;  %v10635_v40 = vld [vmem:[#allocation49_spill] sm:$0xff] }
 0x4c3   : > { %v3372_v47 = vadd.f32 %v9327_v27, %v10635_v40  ;;  %v10649_v40 = vld [vmem:[#allocation37_spill] sm:$0xff] }
 0x4cf   : > { %v5065_v25 = vpop.xlane.xlu0 %5064 }
 0x4d0   : > { %v5139_v14 = vmul.f32 0.5, %v5065_v25  ;;  %v3405_v25 = vmax.f32 %v3373_v30, 0.0 }
 0x4d1   : > { %v5068_v49 = vpop.xlane.xlu1 %5067 }
 0x4d2   : > { %5364 = vst.msk [vmem:[%s9473_s29 + $0x50] sm:$0xff] %vm5353_vm15, %v5139_v14  ;;  %v5140_v31 = vmul.f32 0.5, %v5068_v49  ;;  %v3404_v14 = vmax.f32 %v3372_v47, 0.0  ;;  %v10650_v47 = vmax.f32 %v10649_v40, 0.0 }
 0x4d3   : > { %v4329_v61 = vpop.permute.xlu0 %4328 }
 0x4d4   : > { %5365 = vst.msk [vmem:[%s9473_s29 + $0x58] sm:$0xff] %vm5353_vm15, %v5140_v31  ;;  %6841 = vmatprep.mubr.msk.f32.mxu1 %vm2194_vm0, %v4329_v61 }
 0x4d5   : > { %v4331_v19 = vpop.permute.xlu1 %4330  ;;  %v9564_v11 = vpop.f32.mrb[96].mxu1 }
 0x4d6   : > { %v9566_v36 = vpop.f32.mrb[97].mxu1  ;;  %6842 = vmatmul.mubr.msk.f32.gmra.mrb[104].mxu1 %vm2194_vm0, %v4331_v19 }
 0x4e1   : > { %5082 = vadd.xlane.f32.xlu0 %v5081_v13  ;;  %v5021_v13 = vmul.f32 %v4989_v26, %v4989_v26  ;;  %v10655_v26 = vld [vmem:[#allocation53_spill] sm:$0xff] }
 0x4e2   : > { %v3377_v38 = vadd.f32 %v10655_v26, %v10654_v43 }
 0x4e3   : > { %5085 = vadd.xlane.f32.xlu1 %v5084_v42  ;;  %v4840_v42 = vsel %vm2194_vm0, %v9346_v16, 0.0 }
 0x4e5   : > { %4838 = vadd.xlane.f32.xlu0 %v4837_v41  ;;  %v5022_v41 = vmul.f32 %v4990_v4, %v4990_v4  ;;  %v3376_v4 = vadd.f32 %v10657_v63, %v10656_v58 }
 0x4e7   : > { %v5096_v28 = vsel %vm2194_vm0, %v5022_v41, 0.0 }
 0x4f4   : > { %4342 = vrot.lane.b32.xlu1 %v3403_v59, %s7030_s26  ;;  %v5093_v59 = vsel %vm2194_vm0, %v5021_v13, 0.0  ;;  %v3409_v13 = vmax.f32 %v3377_v38, 0.0 }
 0x4fb   : > { %4340 = vrot.lane.b32.xlu0 %v3402_v45, %s7030_s26  ;;  %v10642_v45 = vld [vmem:[#allocation3_spill] sm:$0xff] }
 0x504   : > { %v5071_v46 = vpop.xlane.xlu0 %5070 }
 0x505   : > { %v5141_v48 = vmul.f32 0.5, %v5071_v46  ;;  %v10643_v46 = vld [vmem:[#allocation4_spill] sm:$0xff] }
 0x506   : > { %v5074_v22 = vpop.xlane.xlu1 %5073 }
 0x507   : > { %5366 = vst.msk [vmem:[%s9473_s29 + $0x60] sm:$0xff] %vm5353_vm15, %v5141_v48  ;;  %v5142_v55 = vmul.f32 0.5, %v5074_v22  ;;  %v3375_v48 = vadd.f32 %v10643_v46, %v10642_v45  ;;  %v10644_v22 = vld [vmem:[#allocation23_spill] sm:$0xff] }
 0x508   : > { %v4333_v7 = vpop.permute.xlu0 %4332 }
 0x509   : > { %5367 = vst.msk [vmem:[%s9473_s29 + $0x68] sm:$0xff] %vm5353_vm15, %v5142_v55  ;;  %6844 = vmatprep.mubr.msk.f32.mxu1 %vm2194_vm0, %v4333_v7  ;;  %v10645_v55 = vld [vmem:[#allocation46_spill] sm:$0xff]  ;;  %v3407_v7 = vmax.f32 %v3375_v48, 0.0 }
 0x50a   : > { %v4335_v23 = vpop.permute.xlu1 %4334  ;;  %v9590_v54 = vpop.f32.mrb[98].mxu1  ;;  %v3374_v16 = vadd.f32 %v10645_v55, %v10644_v22 }
 0x50b   : > { %v9592_v53 = vpop.f32.mrb[99].mxu1  ;;  %6845 = vmatmul.mubr.msk.f32.gmra.mrb[106].mxu1 %vm2194_vm0, %v4335_v23 }
 0x50c   : > { %v3406_v23 = vmax.f32 %v3374_v16, 0.0  ;;  %v10658_v16 = vld [vmem:[#allocation42_spill] sm:$0xff] }
 0x518   : > { %4835 = vadd.xlane.f32.xlu1 %v4834_v39  ;;  %v10646_v39 = vld [vmem:[#allocation38_spill] sm:$0xff] }
 0x51a   : > { %5088 = vadd.xlane.f32.xlu0 %v5087_v0  ;;  %v10647_v0 = vmax.f32 %v10646_v39, 0.0  ;;  %v10664_v39 = vld [vmem:[#allocation71_spill] sm:$0xff] }
 0x51c   : > { %5091 = vadd.xlane.f32.xlu1 %v5090_v24  ;;  %v10648_v24 = vld [vmem:[#allocation61_spill] sm:$0xff] }
 0x51d   : > { %v4991_v30 = vsub.f32 %v10648_v24, %v10647_v0  ;;  %v4852_v0 = vsel %vm2194_vm0, %v10664_v39, 0.0  ;;  %v10676_v39 = vld [vmem:[#allocation28_spill] sm:$0xff] }
 0x52d   : > { %4346 = vrot.lane.b32.xlu1 %v3405_v25, %s7030_s26  ;;  %v10651_v25 = vld [vmem:[#allocation60_spill] sm:$0xff] }
 0x530   : > { %4344 = vrot.lane.b32.xlu0 %v3404_v14, %s7030_s26  ;;  %v4992_v14 = vsub.f32 %v10651_v25, %v10650_v47 }
 0x539   : > { %v5077_v62 = vpop.xlane.xlu0 %5076 }
 0x53a   : > { %v5143_v49 = vmul.f32 0.5, %v5077_v62  ;;  %v5023_v62 = vmul.f32 %v4991_v30, %v4991_v30  ;;  %v10665_v30 = vld [vmem:[#allocation8_spill] sm:$0xff] }
 0x53b   : > { %v5080_v31 = vpop.xlane.xlu1 %5079  ;;  %v4855_v40 = vsel %vm2194_vm0, %v10665_v30, 0.0 }
 0x53c   : > { %5368 = vst.msk [vmem:[%s9473_s29 + $0x70] sm:$0xff] %vm5353_vm15, %v5143_v49  ;;  %v5144_v61 = vmul.f32 0.5, %v5080_v31  ;;  %v10652_v49 = vld [vmem:[#allocation52_spill] sm:$0xff]  ;;  %v5099_v1 = vsel %vm2194_vm0, %v5023_v62, 0.0  ;;  %v10667_v62 = vld [vmem:[#allocation7_spill] sm:$0xff] }
 0x53d   : > { %v4337_v19 = vpop.permute.xlu0 %4336  ;;  %v4846_v31 = vsel %vm2194_vm0, %v10652_v49, 0.0 }
 0x53e   : > { %5369 = vst.msk [vmem:[%s9473_s29 + $0x78] sm:$0xff] %vm5353_vm15, %v5144_v61  ;;  %6847 = vmatprep.mubr.msk.f32.mxu1 %vm2194_vm0, %v4337_v19  ;;  %v5024_v61 = vmul.f32 %v4992_v14, %v4992_v14  ;;  %v10653_v19 = vld [vmem:[#allocation6_spill] sm:$0xff]  ;;  %v10666_v14 = vld [vmem:[#allocation24_spill] sm:$0xff] }
 0x53f   : > { %v4339_v34 = vpop.permute.xlu1 %4338  ;;  %v9616_v51 = vpop.f32.mrb[100].mxu1  ;;  %v3379_v49 = vadd.f32 %v10667_v62, %v10666_v14 }
 0x540   : > { %v9618_v27 = vpop.f32.mrb[101].mxu1  ;;  %6848 = vmatmul.mubr.msk.f32.gmra.mrb[108].mxu1 %vm2194_vm0, %v4339_v34  ;;  %v4849_v34 = vsel %vm2194_vm0, %v10653_v19, 0.0  ;;  %v5102_v32 = vsel %vm2194_vm0, %v5024_v61, 0.0  ;;  %v10669_v61 = vld [vmem:[#allocation70_spill] sm:$0xff] }
 0x54f   : > { %4841 = vadd.xlane.f32.xlu0 %v4840_v42  ;;  %v3408_v42 = vmax.f32 %v3376_v4, 0.0 }
 0x551   : > { %4844 = vadd.xlane.f32.xlu1 %v4843_v5 }
 0x553   : > { %5094 = vadd.xlane.f32.xlu0 %v5093_v59 }
 0x555   : > { %5097 = vadd.xlane.f32.xlu1 %v5096_v28 }
 0x566   : > { %4350 = vrot.lane.b32.xlu1 %v3407_v7, %s7030_s26  ;;  %v10659_v7 = vmax.f32 %v10658_v16, 0.0 }
 0x569   : > { %4348 = vrot.lane.b32.xlu0 %v3406_v23, %s7030_s26  ;;  %v10660_v23 = vld [vmem:[#allocation63_spill] sm:$0xff] }
 0x56e   : > { %v5083_v60 = vpop.xlane.xlu0 %5082 }
 0x56f   : > { %v5145_v50 = vmul.f32 0.5, %v5083_v60  ;;  %v4993_v60 = vsub.f32 %v10660_v23, %v10659_v7  ;;  %v10675_v7 = vld [vmem:[#allocation64_spill] sm:$0xff] }
 0x570   : > { %v5086_v33 = vpop.xlane.xlu1 %5085 }
 0x571   : > { %5370 = vst.msk [vmem:[%s9473_s29 + $0x80] sm:$0xff] %vm5353_vm15, %v5145_v50  ;;  %v5146_v9 = vmul.f32 0.5, %v5086_v33  ;;  %v10661_v50 = vld [vmem:[#allocation41_spill] sm:$0xff] }
 0x572   : > { %v9641_v37 = vpop.xlane.xlu0 %4838  ;;  %v10662_v33 = vmax.f32 %v10661_v50, 0.0  ;;  %v4858_v50 = vsel %vm2194_vm0, %v9388_v8, 0.0 }
 0x573   : > { %5371 = vst.msk [vmem:[%s9473_s29 + $0x88] sm:$0xff] %vm5353_vm15, %v5146_v9  ;;  %v10663_v9 = vld [vmem:[#allocation62_spill] sm:$0xff] }
 0x574   : > { %v9645_v6 = vpop.f32.mrb[102].mxu1  ;;  %v4343_v17 = vpop.permute.xlu1 %4342 }
 0x575   : > { %v9647_v15 = vpop.f32.mrb[103].mxu1 }
 0x576   : > { %v4341_v52 = vpop.permute.xlu0 %4340 }
 0x577   : > { %6850 = vmatprep.mubr.msk.f32.mxu1 %vm2194_vm0, %v4341_v52  ;;  %v4994_v52 = vsub.f32 %v10663_v9, %v10662_v33  ;;  %v4861_v9 = vsel %vm2194_vm0, %v9378_v29, 0.0 }
 0x578   : > { %6851 = vmatmul.mubr.msk.f32.gmra.mrb[110].mxu1 %vm2194_vm0, %v4343_v17  ;;  %v5025_v17 = vmul.f32 %v4993_v60, %v4993_v60 }
 0x579   : > { %v5026_v24 = vmul.f32 %v4994_v52, %v4994_v52 }
 0x57a   : > { %v5105_v47 = vsel %vm2194_vm0, %v5025_v17, 0.0 }
 0x57b   : > { %v5108_v25 = vsel %vm2194_vm0, %v5026_v24, 0.0  ;;  %v10677_v24 = vld [vmem:[#allocation31_spill] sm:$0xff] }
 0x57c   : > { %v3380_v8 = vadd.f32 %v9386_v18, %v10677_v24 }
 0x588   : > { %4847 = vadd.xlane.f32.xlu0 %v4846_v31  ;;  %v10668_v31 = vld [vmem:[#allocation27_spill] sm:$0xff] }
 0x589   : > { %v3378_v19 = vadd.f32 %v10669_v61, %v10668_v31 }
 0x58a   : > { %4850 = vadd.xlane.f32.xlu1 %v4849_v34  ;;  %v3411_v34 = vmax.f32 %v3379_v49, 0.0 }
 0x58c   : > { %5100 = vadd.xlane.f32.xlu0 %v5099_v1  ;;  %v3410_v1 = vmax.f32 %v3378_v19, 0.0  ;;  %v10678_v19 = vld [vmem:[#allocation48_spill] sm:$0xff] }
 0x58e   : > { %5103 = vadd.xlane.f32.xlu1 %v5102_v32 }
 0x59f   : > { %4354 = vrot.lane.b32.xlu1 %v3409_v13, %s7030_s26 }
 0x5a2   : > { %4352 = vrot.lane.b32.xlu0 %v3408_v42, %s7030_s26 }
 0x5a5   : > { %v9669_v41 = vpop.xlane.xlu1 %4835 }
 0x5a7   : > { %v5089_v5 = vpop.xlane.xlu0 %5088 }
 0x5a8   : > { %v5147_v59 = vmul.f32 0.5, %v5089_v5 }
 0x5a9   : > { %v5092_v28 = vpop.xlane.xlu1 %5091  ;;  %v9671_v45 = vpop.f32.mrb[104].mxu1 }
 0x5aa   : > { %5372 = vst.msk [vmem:[%s9473_s29 + $0x90] sm:$0xff] %vm5353_vm15, %v5147_v59  ;;  %v5148_v46 = vmul.f32 0.5, %v5092_v28  ;;  %v9675_v48 = vpop.f32.mrb[105].mxu1  ;;  %v10670_v59 = vld [vmem:[#allocation45_spill] sm:$0xff] }
 0x5ab   : > { %v4345_v22 = vpop.permute.xlu0 %4344  ;;  %v10671_v28 = vmax.f32 %v10670_v59, 0.0  ;;  %v4864_v59 = vsel %vm2194_vm0, %v9398_v2, 0.0 }
 0x5ac   : > { %5373 = vst.msk [vmem:[%s9473_s29 + $0x98] sm:$0xff] %vm5353_vm15, %v5148_v46  ;;  %6853 = vmatprep.mubr.msk.f32.mxu1 %vm2194_vm0, %v4345_v22  ;;  %v10672_v46 = vld [vmem:[#allocation65_spill] sm:$0xff] }
 0x5ad   : > { %v4347_v55 = vpop.permute.xlu1 %4346  ;;  %v4995_v22 = vsub.f32 %v10672_v46, %v10671_v28  ;;  %v10684_v46 = vld [vmem:[#allocation55_spill] sm:$0xff] }
 0x5ae   : > { %6854 = vmatmul.mubr.msk.f32.gmra.mrb[112].mxu1 %vm2194_vm0, %v4347_v55  ;;  %v10673_v55 = vld [vmem:[#allocation44_spill] sm:$0xff] }
 0x5af   : > { %v10674_v16 = vmax.f32 %v10673_v55, 0.0  ;;  %v5027_v60 = vmul.f32 %v4995_v22, %v4995_v22  ;;  %v4867_v22 = vsel %vm2194_vm0, %v10684_v46, 0.0 }
 0x5b1   : > { %v4996_v23 = vsub.f32 %v10675_v7, %v10674_v16  ;;  %v5111_v52 = vsel %vm2194_vm0, %v5027_v60, 0.0  ;;  %v10685_v7 = vld [vmem:[#allocation32_spill] sm:$0xff] }
 0x5b3   : > { %v5028_v33 = vmul.f32 %v4996_v23, %v4996_v23  ;;  %v10686_v23 = vld [vmem:[#allocation54_spill] sm:$0xff] }
 0x5b4   : > { %v3383_v60 = vadd.f32 %v10686_v23, %v10685_v7 }
 0x5b5   : > { %v5114_v17 = vsel %vm2194_vm0, %v5028_v33, 0.0  ;;  %v10688_v33 = vld [vmem:[#allocation10_spill] sm:$0xff] }
 0x5c1   : > { %4853 = vadd.xlane.f32.xlu0 %v4852_v0  ;;  %v3381_v0 = vadd.f32 %v9382_v21, %v10676_v39 }
 0x5c3   : > { %4856 = vadd.xlane.f32.xlu1 %v4855_v40  ;;  %v3413_v30 = vmax.f32 %v3381_v0, 0.0  ;;  %v3412_v40 = vmax.f32 %v3380_v8, 0.0 }
 0x5c5   : > { %5106 = vadd.xlane.f32.xlu0 %v5105_v47 }
 0x5c7   : > { %5109 = vadd.xlane.f32.xlu1 %v5108_v25 }
 0x5d8   : > { %4358 = vrot.lane.b32.xlu1 %v3411_v34, %s7030_s26  ;;  %v10679_v34 = vmax.f32 %v10678_v19, 0.0 }
 0x5db   : > { %4356 = vrot.lane.b32.xlu0 %v3410_v1, %s7030_s26  ;;  %v10680_v1 = vld [vmem:[#allocation67_spill] sm:$0xff] }
 0x5dc   : > { %v9699_v32 = vpop.xlane.xlu0 %4841 }
 0x5de   : > { %v9701_v43 = vpop.xlane.xlu1 %4844  ;;  %v9703_v26 = vpop.f32.mrb[106].mxu1 }
 0x5df   : > { %v9705_v38 = vpop.f32.mrb[107].mxu1 }
 0x5e0   : > { %v5095_v58 = vpop.xlane.xlu0 %5094 }
 0x5e1   : > { %v5149_v63 = vmul.f32 0.5, %v5095_v58  ;;  %v4997_v58 = vsub.f32 %v10680_v1, %v10679_v34  ;;  %v10691_v34 = vld [vmem:[#allocation36_spill] sm:$0xff] }
 0x5e2   : > { %v5098_v4 = vpop.xlane.xlu1 %5097  ;;  %v10692_v1 = vld [vmem:[#allocation72_spill] sm:$0xff] }
 0x5e3   : > { %5374 = vst.msk [vmem:[%s9473_s29 + $0xa0] sm:$0xff] %vm5353_vm15, %v5149_v63  ;;  %v5150_v13 = vmul.f32 0.5, %v5098_v4  ;;  %v10681_v63 = vld [vmem:[#allocation47_spill] sm:$0xff] }
 0x5e4   : > { %v4349_v42 = vpop.permute.xlu0 %4348  ;;  %v10682_v4 = vmax.f32 %v10681_v63, 0.0  ;;  %v10693_v63 = vld [vmem:[#allocation39_spill] sm:$0xff] }
 0x5e5   : > { %5375 = vst.msk [vmem:[%s9473_s29 + $0xa8] sm:$0xff] %vm5353_vm15, %v5150_v13  ;;  %6856 = vmatprep.mubr.msk.f32.mxu1 %vm2194_vm0, %v4349_v42  ;;  %v10683_v13 = vld [vmem:[#allocation66_spill] sm:$0xff] }
 0x5e6   : > { %v4351_v5 = vpop.permute.xlu1 %4350  ;;  %v4998_v42 = vsub.f32 %v10683_v13, %v10682_v4  ;;  %v10694_v4 = vld [vmem:[#allocation73_spill] sm:$0xff] }
 0x5e7   : > { %6857 = vmatmul.mubr.msk.f32.gmra.mrb[114].mxu1 %vm2194_vm0, %v4351_v5  ;;  %v5029_v5 = vmul.f32 %v4997_v58, %v4997_v58  ;;  %v3385_v58 = vadd.f32 %v10692_v1, %v10691_v34  ;;  %v3384_v13 = vadd.f32 %v10694_v4, %v10693_v63 }
 0x5e8   : > { %v5030_v28 = vmul.f32 %v4998_v42, %v4998_v42 }
 0x5e9   : > { %v5117_v55 = vsel %vm2194_vm0, %v5029_v5, 0.0  ;;  %v3417_v42 = vmax.f32 %v3385_v58, 0.0  ;;  %v3416_v5 = vmax.f32 %v3384_v13, 0.0 }
 0x5ea   : > { %v5120_v16 = vsel %vm2194_vm0, %v5030_v28, 0.0 }
 0x5fa   : > { %4859 = vadd.xlane.f32.xlu0 %v4858_v50  ;;  %v10687_v50 = vld [vmem:[#allocation35_spill] sm:$0xff] }
 0x5fb   : > { %v3382_v2 = vadd.f32 %v10688_v33, %v10687_v50  ;;  %v10695_v33 = vld [vmem:[#allocation78_spill] sm:$0xff] }
 0x5fc   : > { %4862 = vadd.xlane.f32.xlu1 %v4861_v9  ;;  %v3415_v9 = vmax.f32 %v3383_v60, 0.0 }
 0x5fe   : > { %5112 = vadd.xlane.f32.xlu0 %v5111_v52  ;;  %v3414_v52 = vmax.f32 %v3382_v2, 0.0  ;;  %v4876_v2 = vsel %vm2194_vm0, %v10695_v33, 0.0 }
 0x600   : > { %5115 = vadd.xlane.f32.xlu1 %v5114_v17 }
 0x611   : > { %4362 = vrot.lane.b32.xlu1 %v3413_v30, %s7030_s26 }
 0x613   : > { %v9730_v29 = vpop.f32.mrb[108].mxu1 }
 0x614   : > { %4360 = vrot.lane.b32.xlu0 %v3412_v40, %s7030_s26  ;;  %v9733_v47 = vpop.f32.mrb[109].mxu1 }
 0x615   : > { %v9735_v25 = vpop.xlane.xlu0 %4847 }
 0x617   : > { %v9737_v14 = vpop.xlane.xlu1 %4850 }
 0x619   : > { %v5101_v62 = vpop.xlane.xlu0 %5100 }
 0x61a   : > { %v5151_v21 = vmul.f32 0.5, %v5101_v62 }
 0x61b   : > { %v5104_v49 = vpop.xlane.xlu1 %5103 }
 0x61c   : > { %5376 = vst.msk [vmem:[%s9473_s29 + $0xb0] sm:$0xff] %vm5353_vm15, %v5151_v21  ;;  %v5152_v18 = vmul.f32 0.5, %v5104_v49 }
 0x61d   : > { %v4353_v31 = vpop.permute.xlu0 %4352 }
 0x61e   : > { %5377 = vst.msk [vmem:[%s9473_s29 + $0xb8] sm:$0xff] %vm5353_vm15, %v5152_v18  ;;  %6859 = vmatprep.mubr.msk.f32.mxu1 %vm2194_vm0, %v4353_v31  ;;  %v10689_v18 = vld [vmem:[#allocation74_spill] sm:$0xff] }
 0x61f   : > { %v4355_v61 = vpop.permute.xlu1 %4354  ;;  %v4870_v31 = vsel %vm2194_vm0, %v10689_v18, 0.0 }
 0x620   : > { %6860 = vmatmul.mubr.msk.f32.gmra.mrb[116].mxu1 %vm2194_vm0, %v4355_v61  ;;  %v10690_v61 = vld [vmem:[#allocation9_spill] sm:$0xff] }
 0x621   : > { %v4873_v19 = vsel %vm2194_vm0, %v10690_v61, 0.0 }
 0x633   : > { %4865 = vadd.xlane.f32.xlu0 %v4864_v59 }
 0x635   : > { %4868 = vadd.xlane.f32.xlu1 %v4867_v22 }
 0x637   : > { %5118 = vadd.xlane.f32.xlu0 %v5117_v55 }
 0x639   : > { %5121 = vadd.xlane.f32.xlu1 %v5120_v16 }
 0x64a   : > { %4366 = vrot.lane.b32.xlu1 %v3415_v9, %s7030_s26  ;;  %v10696_v9 = vld [vmem:[#allocation75_spill] sm:$0xff] }
 0x64b   : > { %v9762_v17 = vpop.f32.mrb[110].mxu1 }
 0x64c   : > { %v9764_v39 = vpop.f32.mrb[111].mxu1 }
 0x64d   : > { %4364 = vrot.lane.b32.xlu0 %v3414_v52, %s7030_s26  ;;  %v4879_v52 = vsel %vm2194_vm0, %v10696_v9, 0.0 }
 0x64e   : > { %v9767_v0 = vpop.xlane.xlu0 %4853 }
 0x650   : > { %v9769_v24 = vpop.xlane.xlu1 %4856 }
 0x652   : > { %v5107_v8 = vpop.xlane.xlu0 %5106 }
 0x653   : > { %v5153_v30 = vmul.f32 0.5, %v5107_v8  ;;  %v10697_v8 = vld [vmem:[#allocation40_spill] sm:$0xff] }
 0x654   : > { %v5110_v40 = vpop.xlane.xlu1 %5109 }
 0x655   : > { %5378 = vst.msk [vmem:[%s9473_s29 + $0xc0] sm:$0xff] %vm5353_vm15, %v5153_v30  ;;  %v5154_v62 = vmul.f32 0.5, %v5110_v40  ;;  %v10698_v30 = vld [vmem:[#allocation76_spill] sm:$0xff] }
 0x656   : > { %v4357_v21 = vpop.permute.xlu0 %4356  ;;  %v3387_v40 = vadd.f32 %v10698_v30, %v10697_v8  ;;  %v4885_v30 = vsel %vm2194_vm0, %v9422_v57, 0.0 }
 0x657   : > { %5379 = vst.msk [vmem:[%s9473_s29 + $0xc8] sm:$0xff] %vm5353_vm15, %v5154_v62  ;;  %6862 = vmatprep.mubr.msk.f32.mxu1 %vm2194_vm0, %v4357_v21  ;;  %v10699_v62 = vld [vmem:[#allocation43_spill] sm:$0xff]  ;;  %v10700_v21 = vld [vmem:[#allocation77_spill] sm:$0xff] }
 0x658   : > { %v4359_v49 = vpop.permute.xlu1 %4358  ;;  %v3419_v18 = vmax.f32 %v3387_v40, 0.0 }
 0x659   : > { %6863 = vmatmul.mubr.msk.f32.gmra.mrb[118].mxu1 %vm2194_vm0, %v4359_v49  ;;  %v3386_v49 = vadd.f32 %v10700_v21, %v10699_v62  ;;  %v6982_v62 = vld [vmem:[%s7134_s24] sm:$0xff]  ;;  %v6983_v21 = vld [vmem:[%s7134_s24 + $0x8] sm:$0xff] }
 0x66c   : > { %4871 = vadd.xlane.f32.xlu0 %v4870_v31  ;;  %v3418_v31 = vmax.f32 %v3386_v49, 0.0  ;;  %v6984_v49 = vld [vmem:[%s7134_s24 + $0x10] sm:$0xff] }
 0x66e   : > { %4874 = vadd.xlane.f32.xlu1 %v4873_v19 }
 0x67f   : > { %4370 = vrot.lane.b32.xlu1 %v3417_v42, %s7030_s26 }
 0x681   : > { %v9786_v59 = vpop.f32.mrb[112].mxu1 }
 0x682   : > { %4368 = vrot.lane.b32.xlu0 %v3416_v5, %s7030_s26  ;;  %v9789_v28 = vpop.f32.mrb[113].mxu1 }
 0x687   : > { %v9791_v46 = vpop.xlane.xlu0 %4859 }
 0x689   : > { %v9793_v22 = vpop.xlane.xlu1 %4862 }
 0x68b   : > { %v5113_v55 = vpop.xlane.xlu0 %5112 }
 0x68c   : > { %v5155_v16 = vmul.f32 0.5, %v5113_v55  ;;  %v10701_v55 = vld [vmem:[#allocation51_spill] sm:$0xff] }
 0x68d   : > { %v5116_v7 = vpop.xlane.xlu1 %5115 }
 0x68e   : > { %5380 = vst.msk [vmem:[%s9473_s29 + $0xd0] sm:$0xff] %vm5353_vm15, %v5155_v16  ;;  %v5156_v23 = vmul.f32 0.5, %v5116_v7  ;;  %v10702_v16 = vmax.f32 %v10701_v55, 0.0  ;;  %v10703_v7 = vld [vmem:[#allocation69_spill] sm:$0xff]  ;;  %v4894_v55 = vsel %vm2194_vm0, %v9438_v10, 0.0 }
 0x68f   : > { %v4361_v60 = vpop.permute.xlu0 %4360 }
 0x690   : > { %5381 = vst.msk [vmem:[%s9473_s29 + $0xd8] sm:$0xff] %vm5353_vm15, %v5156_v23  ;;  %6865 = vmatprep.mubr.msk.f32.mxu1 %vm2194_vm0, %v4361_v60  ;;  %v4999_v23 = vsub.f32 %v10703_v7, %v10702_v16  ;;  %v4891_v16 = vsel %vm2194_vm0, %v9429_v20, 0.0  ;;  %v4900_v7 = vsel %vm2194_vm0, %v9444_v3, 0.0  ;;  %v4912_v20 = vsel %vm2194_vm0, %v9456_v56, 0.0  ;;  %v10715_v56 = vld [vmem:[#allocation56_spill] sm:$0xff] }
 0x691   : > { %v4363_v50 = vpop.permute.xlu1 %4362 }
 0x692   : > { %6866 = vmatmul.mubr.msk.f32.gmra.mrb[120].mxu1 %vm2194_vm0, %v4363_v50  ;;  %v5031_v60 = vmul.f32 %v4999_v23, %v4999_v23  ;;  %v10704_v50 = vld [vmem:[#allocation50_spill] sm:$0xff]  ;;  %v4897_v23 = vsel %vm2194_vm0, %v9436_v44, 0.0 }
 0x693   : > { %v10705_v33 = vmax.f32 %v10704_v50, 0.0  ;;  %v10711_v50 = vld [vmem:[#allocation57_spill] sm:$0xff] }
 0x694   : > { %v4909_v3 = vsel %vm2194_vm0, %v10711_v50, 0.0  ;;  %v6995_v50 = vld [vmem:[%s7134_s24 + $0x68] sm:$0xff] }
 0x6a1   : > { %4877 = vadd.xlane.f32.xlu0 %v4876_v2  ;;  %v10706_v2 = vld [vmem:[#allocation68_spill] sm:$0xff] }
 0x6a2   : > { %v5000_v9 = vsub.f32 %v10706_v2, %v10705_v33  ;;  %v10712_v33 = vld [vmem:[#allocation80_spill] sm:$0xff]  ;;  %v10713_v2 = vld [vmem:[#allocation11_spill] sm:$0xff] }
 0x6a3   : > { %4880 = vadd.xlane.f32.xlu1 %v4879_v52  ;;  %v5123_v52 = vsel %vm2194_vm0, %v5031_v60, 0.0  ;;  %v10710_v60 = vld [vmem:[#allocation12_spill] sm:$0xff]  ;;  %v4918_v44 = vsel %vm2194_vm0, %v10712_v33, 0.0  ;;  %v6997_v33 = vld [vmem:[%s7134_s24 + $0x78] sm:$0xff] }
 0x6a4   : > { %v5032_v8 = vmul.f32 %v5000_v9, %v5000_v9  ;;  %v4903_v10 = vsel %vm2194_vm0, %v10710_v60, 0.0  ;;  %v10714_v9 = vld [vmem:[#allocation82_spill] sm:$0xff]  ;;  %v6992_v60 = vld [vmem:[%s7134_s24 + $0x50] sm:$0xff] }
 0x6a6   : > { %v5126_v40 = vsel %vm2194_vm0, %v5032_v8, 0.0  ;;  %v4921_v8 = vsel %vm2194_vm0, %v10715_v56, 0.0  ;;  %v7003_v56 = vld [vmem:[%s7134_s24 + $0xa8] sm:$0xff] }
 0x6b4   : > { %4374 = vrot.lane.b32.xlu1 %v3419_v18, %s7030_s26 }
 0x6b7   : > { %4372 = vrot.lane.b32.xlu0 %v3418_v31, %s7030_s26 }
 0x6ba   : > { %v9811_v61 = vpop.f32.mrb[114].mxu1 }
 0x6bb   : > { %v9813_v19 = vpop.f32.mrb[115].mxu1 }
 0x6c0   : > { %v9815_v34 = vpop.xlane.xlu0 %4865 }
 0x6c2   : > { %v9817_v1 = vpop.xlane.xlu1 %4868 }
 0x6c4   : > { %v5119_v58 = vpop.xlane.xlu0 %5118 }
 0x6c5   : > { %v5157_v63 = vmul.f32 0.5, %v5119_v58 }
 0x6c6   : > { %v5122_v4 = vpop.xlane.xlu1 %5121 }
 0x6c7   : > { %5382 = vst.msk [vmem:[%s9473_s29 + $0xe0] sm:$0xff] %vm5353_vm15, %v5157_v63  ;;  %v5158_v13 = vmul.f32 0.5, %v5122_v4 }
 0x6c8   : > { %v4365_v42 = vpop.permute.xlu0 %4364 }
 0x6c9   : > { %5383 = vst.msk [vmem:[%s9473_s29 + $0xe8] sm:$0xff] %vm5353_vm15, %v5158_v13  ;;  %6868 = vmatprep.mubr.msk.f32.mxu1 %vm2194_vm0, %v4365_v42  ;;  %v10709_v13 = vld [vmem:[#allocation79_spill] sm:$0xff] }
 0x6ca   : > { %v4367_v5 = vpop.permute.xlu1 %4366  ;;  %v4882_v42 = vsel %vm2194_vm0, %v10709_v13, 0.0 }
 0x6cb   : > { %6869 = vmatmul.mubr.msk.f32.gmra.mrb[122].mxu1 %vm2194_vm0, %v4367_v5  ;;  %v4888_v5 = vsel %vm2194_vm0, %v9434_v35, 0.0  ;;  %v4906_v35 = vsel %vm2194_vm0, %v9448_v12, 0.0  ;;  %v4915_v12 = vsel %vm2194_vm0, %v10713_v2, 0.0  ;;  %v6999_v2 = vld [vmem:[%s7134_s24 + $0x88] sm:$0xff] }
 0x6d6   : > { %5124 = vadd.xlane.f32.xlu0 %v5123_v52  ;;  %v4924_v52 = vsel %vm2194_vm0, %v10714_v9, 0.0  ;;  %v7001_v9 = vld [vmem:[%s7134_s24 + $0x98] sm:$0xff] }
 0x6d8   : > { %4886 = vadd.xlane.f32.xlu1 %v4885_v30 }
 0x6dc   : > { %5127 = vadd.xlane.f32.xlu1 %v5126_v40  ;;  %v10717_v40 = vld [vmem:[#allocation81_spill] sm:$0xff] }
 0x6ec   : > { %5161 = vrot.lane.b32.xlu0 %v6982_v62, %s7031_s20  ;;  %v4927_v62 = vsel %vm2194_vm0, %v10717_v40, 0.0 }
 0x6ed   : > { %5163 = vrot.lane.b32.xlu1 %v6983_v21, %s7031_s20 }
 0x6f1   : > { %5165 = vrot.lane.b32.xlu1 %v6984_v49, %s7031_s20 }
 0x6f3   : > { %v9841_v18 = vpop.f32.mrb[116].mxu1 }
 0x6f4   : > { %10707 = vst [vmem:[#allocation14_spill] sm:$0xff] %v9841_v18  ;;  %v9843_v31 = vpop.f32.mrb[117].mxu1 }
 0x6f5   : > { %10708 = vst [vmem:[#allocation13_spill] sm:$0xff] %v9843_v31 }
 0x6f9   : > { %v9845_v58 = vpop.xlane.xlu0 %4871 }
 0x6fb   : > { %v9847_v57 = vpop.xlane.xlu1 %4874 }
 0x6fd   : > { %v4369_v63 = vpop.permute.xlu0 %4368 }
 0x6fe   : > { %6871 = vmatprep.mubr.msk.f32.mxu1 %vm2194_vm0, %v4369_v63 }
 0x6ff   : > { %v4371_v4 = vpop.permute.xlu1 %4370 }
 0x700   : > { %6872 = vmatmul.mubr.msk.f32.gmra.mrb[124].mxu1 %vm2194_vm0, %v4371_v4 }
 0x70b   : > { %4883 = vadd.xlane.f32.xlu0 %v4882_v42  ;;  %v6985_v42 = vld [vmem:[%s7134_s24 + $0x18] sm:$0xff] }
 0x70f   : > { %4889 = vadd.xlane.f32.xlu0 %v4888_v5  ;;  %v6986_v5 = vld [vmem:[%s7134_s24 + $0x20] sm:$0xff] }
 0x713   : > { %4895 = vadd.xlane.f32.xlu0 %v4894_v55  ;;  %v6987_v55 = vld [vmem:[%s7134_s24 + $0x28] sm:$0xff] }
 0x715   : > { %4892 = vadd.xlane.f32.xlu1 %v4891_v16  ;;  %v6988_v16 = vld [vmem:[%s7134_s24 + $0x30] sm:$0xff] }
 0x717   : > { %4901 = vadd.xlane.f32.xlu0 %v4900_v7  ;;  %v6989_v7 = vld [vmem:[%s7134_s24 + $0x38] sm:$0xff] }
 0x719   : > { %4898 = vadd.xlane.f32.xlu1 %v4897_v23  ;;  %v6990_v23 = vld [vmem:[%s7134_s24 + $0x40] sm:$0xff] }
 0x71b   : > { %4907 = vadd.xlane.f32.xlu0 %v4906_v35  ;;  %v6991_v35 = vld [vmem:[%s7134_s24 + $0x48] sm:$0xff] }
 0x71d   : > { %4904 = vadd.xlane.f32.xlu1 %v4903_v10  ;;  %v6993_v10 = vld [vmem:[%s7134_s24 + $0x58] sm:$0xff] }
 0x71f   : > { %4913 = vadd.xlane.f32.xlu0 %v4912_v20  ;;  %v6994_v20 = vld [vmem:[%s7134_s24 + $0x60] sm:$0xff] }
 0x721   : > { %4910 = vadd.xlane.f32.xlu1 %v4909_v3  ;;  %v6996_v3 = vld [vmem:[%s7134_s24 + $0x70] sm:$0xff] }
 0x723   : > { %4919 = vadd.xlane.f32.xlu0 %v4918_v44  ;;  %v6998_v44 = vld [vmem:[%s7134_s24 + $0x80] sm:$0xff] }
 0x725   : > { %4916 = vadd.xlane.f32.xlu1 %v4915_v12  ;;  %v7000_v12 = vld [vmem:[%s7134_s24 + $0x90] sm:$0xff] }
 0x727   : > { %4925 = vadd.xlane.f32.xlu0 %v4924_v52  ;;  %v7002_v52 = vld [vmem:[%s7134_s24 + $0xa0] sm:$0xff] }
 0x729   : > { %4922 = vadd.xlane.f32.xlu1 %v4921_v8  ;;  %v7004_v8 = vld [vmem:[%s7134_s24 + $0xb0] sm:$0xff] }
 0x72c   : > { %v9879_v30 = vpop.f32.mrb[118].mxu1 }
 0x72d   : > { %10716 = vst [vmem:[#allocation16_spill] sm:$0xff] %v9879_v30  ;;  %4928 = vadd.xlane.f32.xlu1 %v4927_v62  ;;  %v9883_v21 = vpop.f32.mrb[119].mxu1 }
 0x72e   : > { %10718 = vst [vmem:[#allocation15_spill] sm:$0xff] %v9883_v21  ;;  %v9885_v49 = vpop.xlane.xlu0 %4877 }
 0x730   : > { %v9887_v63 = vpop.xlane.xlu1 %4880 }
 0x732   : > { %v4373_v4 = vpop.permute.xlu0 %4372 }
 0x733   : > { %6874 = vmatprep.mubr.msk.f32.mxu1 %vm2194_vm0, %v4373_v4 }
 0x734   : > { %v4375_v13 = vpop.permute.xlu1 %4374 }
 0x735   : > { %6875 = vmatmul.mubr.msk.f32.gmra.mrb[126].mxu1 %vm2194_vm0, %v4375_v13  ;;  %v7005_v13 = vld [vmem:[%s7134_s24 + $0xb8] sm:$0xff]  ;;  %vm5514_vm0 = vcmask 15368  }
 0x73d   : > { %5167 = vrot.lane.b32.xlu0 %v6985_v42, %s7031_s20 }
 0x73e   : > { %5169 = vrot.lane.b32.xlu1 %v6986_v5, %s7031_s20  ;;  %v7006_v5 = vld [vmem:[%s7134_s24 + $0xc0] sm:$0xff] }
 0x741   : > { %5171 = vrot.lane.b32.xlu0 %v6987_v55, %s7031_s20 }
 0x742   : > { %5173 = vrot.lane.b32.xlu1 %v6988_v16, %s7031_s20  ;;  %v9943_v16 = vld [vmem:[#allocation2] ss:$0 sm:$0xff] }
 0x743   : > { %v4944_v21 = vadd.f32 %v9943_v16, %v9769_v24 }
 0x745   : > { %5175 = vrot.lane.b32.xlu0 %v6989_v7, %s7031_s20 }
 0x746   : > { %5177 = vrot.lane.b32.xlu1 %v6990_v23, %s7031_s20 }
 0x749   : > { %5179 = vrot.lane.b32.xlu0 %v6991_v35, %s7031_s20  ;;  %v7007_v35 = vld [vmem:[%s7134_s24 + $0xc8] sm:$0xff] }
 0x74a   : > { %5181 = vrot.lane.b32.xlu1 %v6992_v60, %s7031_s20  ;;  %v4937_v60 = vadd.f32 %v9943_v16, %v9669_v41 }
 0x74d   : > { %5183 = vrot.lane.b32.xlu0 %v6993_v10, %s7031_s20 }
 0x74e   : > { %5185 = vrot.lane.b32.xlu1 %v6994_v20, %s7031_s20  ;;  %v7008_v20 = vld [vmem:[%s7134_s24 + $0xd0] sm:$0xff] }
 0x751   : > { %5187 = vrot.lane.b32.xlu0 %v6995_v50, %s7031_s20 }
 0x752   : > { %5189 = vrot.lane.b32.xlu1 %v6996_v3, %s7031_s20  ;;  %v4938_v3 = vadd.f32 %v9943_v16, %v9641_v37 }
 0x755   : > { %5191 = vrot.lane.b32.xlu0 %v6997_v33, %s7031_s20 }
 0x756   : > { %5193 = vrot.lane.b32.xlu1 %v6998_v44, %s7031_s20  ;;  %v7009_v44 = vld [vmem:[%s7134_s24 + $0xd8] sm:$0xff] }
 0x759   : > { %5195 = vrot.lane.b32.xlu0 %v6999_v2, %s7031_s20  ;;  %v7010_v2 = vld [vmem:[%s7134_s24 + $0xe0] sm:$0xff] }
 0x75a   : > { %5197 = vrot.lane.b32.xlu1 %v7000_v12, %s7031_s20  ;;  %v4939_v12 = vadd.f32 %v9943_v16, %v9699_v32 }
 0x75d   : > { %5199 = vrot.lane.b32.xlu0 %v7001_v9, %s7031_s20 }
 0x75e   : > { %5201 = vrot.lane.b32.xlu1 %v7002_v52, %s7031_s20 }
 0x761   : > { %5203 = vrot.lane.b32.xlu0 %v7003_v56, %s7031_s20  ;;  %v7011_v56 = vld [vmem:[%s7134_s24 + $0xe8] sm:$0xff] }
 0x762   : > { %5205 = vrot.lane.b32.xlu1 %v7004_v8, %s7031_s20 }
 0x763   : > { %v5125_v40 = vpop.xlane.xlu0 %5124 }
 0x764   : > { %v5159_v62 = vmul.f32 0.5, %v5125_v40  ;;  %v7012_v40 = vld [vmem:[%s7134_s24 + $0xf0] sm:$0xff] }
 0x765   : > { %v9931_v4 = vpop.xlane.xlu1 %4886  ;;  %5207 = vrot.lane.b32.xlu0 %v7005_v13, %s7031_s20  ;;  %v9935_v42 = vpop.f32.mrb[120].mxu1 }
 0x766   : > { %10719 = vst [vmem:[#allocation19_spill] sm:$0xff] %v9935_v42  ;;  %5384 = vst.msk [vmem:[%s9473_s29 + $0xf0] sm:$0xff] %vm5353_vm15, %v5159_v62  ;;  %5209 = vrot.lane.b32.xlu1 %v7006_v5, %s7031_s20  ;;  %v9941_v55 = vpop.f32.mrb[121].mxu1  ;;  %v7013_v5 = vld [vmem:[%s7134_s24 + $0xf8] sm:$0xff] }
 0x767   : > { %10720 = vst [vmem:[#allocation18_spill] sm:$0xff] %v9941_v55  ;;  %v5162_v7 = vpop.permute.xlu0 %5161 }
 0x768   : > { %v5257_v50 = vsub.f32 %v4937_v60, %v5162_v7 }
 0x769   : > { %v5128_v23 = vpop.xlane.xlu1 %5127  ;;  %5211 = vrot.lane.b32.xlu0 %v7007_v35, %s7031_s20 }
 0x76a   : > { %v5160_v10 = vmul.f32 0.5, %v5128_v23  ;;  %5213 = vrot.lane.b32.xlu1 %v7008_v20, %s7031_s20  ;;  %v5289_v9 = vmul.f32 %v5257_v50, %v5257_v50 }
 0x76c   : > { %5385 = vst.msk [vmem:[%s9473_s29 + $0xf8] sm:$0xff] %vm5353_vm15, %v5160_v10  ;;  %v5321_v62 = vmul.f32 0.5, %v5289_v9 }
 0x76d   : > { %v5164_v33 = vpop.permute.xlu1 %5163  ;;  %5215 = vrot.lane.b32.xlu0 %v7009_v44, %s7031_s20 }
 0x76e   : > { %5217 = vrot.lane.b32.xlu1 %v7010_v2, %s7031_s20  ;;  %v5258_v41 = vsub.f32 %v4938_v3, %v5164_v33 }
 0x770   : > { %v5290_v37 = vmul.f32 %v5258_v41, %v5258_v41 }
 0x771   : > { %v5166_v52 = vpop.permute.xlu1 %5165  ;;  %5219 = vrot.lane.b32.xlu0 %v7011_v56, %s7031_s20 }
 0x772   : > { %v5259_v8 = vsub.f32 %v4939_v12, %v5166_v52  ;;  %5221 = vrot.lane.b32.xlu1 %v7012_v40, %s7031_s20  ;;  %v5322_v7 = vmul.f32 0.5, %v5290_v37  ;;  %v4940_v40 = vadd.f32 %v9943_v16, %v9701_v43 }
 0x774   : > { %v5291_v13 = vmul.f32 %v5259_v8, %v5259_v8 }
 0x775   : > { %5223 = vrot.lane.b32.xlu0 %v7013_v5, %s7031_s20  ;;  %v4942_v5 = vadd.f32 %v9943_v16, %v9737_v14 }
 0x776   : > { %5418 = vrot.lane.b32.xlu1 %v5321_v62, %s7032_s21  ;;  %v5323_v32 = vmul.f32 0.5, %v5291_v13 }
 0x779   : > { %5420 = vrot.lane.b32.xlu0 %v5322_v7, %s7032_s21 }
 0x77a   : > { %5422 = vrot.lane.b32.xlu1 %v5323_v32, %s7032_s21 }
 0x798   : > { %v9970_v23 = vpop.xlane.xlu0 %4883 }
 0x79c   : > { %v9972_v35 = vpop.xlane.xlu0 %4889 }
 0x79e   : > { %v9974_v60 = vpop.f32.mrb[122].mxu1 }
 0x79f   : > { %10721 = vst [vmem:[#allocation22_spill] sm:$0xff] %v9974_v60  ;;  %v9976_v10 = vpop.f32.mrb[123].mxu1 }
 0x7a0   : > { %10722 = vst [vmem:[#allocation21_spill] sm:$0xff] %v9976_v10  ;;  %v9978_v20 = vpop.xlane.xlu0 %4895  ;;  %v4941_v10 = vadd.f32 %v9943_v16, %v9735_v25  ;;  %v4946_v25 = vadd.f32 %v9943_v16, %v9793_v22 }
 0x7a2   : > { %v9980_v50 = vpop.xlane.xlu1 %4892 }
 0x7a4   : > { %v9982_v3 = vpop.xlane.xlu0 %4901 }
 0x7a6   : > { %v9984_v33 = vpop.xlane.xlu1 %4898 }
 0x7a8   : > { %v9986_v44 = vpop.xlane.xlu0 %4907 }
 0x7aa   : > { %v9988_v2 = vpop.xlane.xlu1 %4904 }
 0x7ac   : > { %v9990_v41 = vpop.xlane.xlu0 %4913 }
 0x7ae   : > { %v9992_v12 = vpop.xlane.xlu1 %4910 }
 0x7b0   : > { %v9994_v9 = vpop.xlane.xlu0 %4919 }
 0x7b2   : > { %v9996_v52 = vpop.xlane.xlu1 %4916 }
 0x7b4   : > { %v9998_v56 = vpop.xlane.xlu0 %4925 }
 0x7b6   : > { %v10000_v8 = vpop.xlane.xlu1 %4922 }
 0x7b8   : > { %v5168_v37 = vpop.permute.xlu0 %5167 }
 0x7b9   : > { %v5260_v62 = vsub.f32 %v4940_v40, %v5168_v37  ;;  %v4943_v37 = vadd.f32 %v9943_v16, %v9767_v0 }
 0x7ba   : > { %v10004_v13 = vpop.xlane.xlu1 %4928 }
 0x7bb   : > { %v5292_v7 = vmul.f32 %v5260_v62, %v5260_v62 }
 0x7bc   : > { %v5172_v32 = vpop.permute.xlu0 %5171 }
 0x7bd   : > { %v5324_v60 = vmul.f32 0.5, %v5292_v7  ;;  %v5262_v55 = vsub.f32 %v4942_v5, %v5172_v32 }
 0x7be   : > { %v5170_v42 = vpop.permute.xlu1 %5169 }
 0x7bf   : > { %v5294_v30 = vmul.f32 %v5262_v55, %v5262_v55  ;;  %v5261_v43 = vsub.f32 %v4941_v10, %v5170_v42  ;;  %5424 = vrot.lane.b32.xlu0 %v5324_v60, %s7032_s21  ;;  %v4945_v42 = vadd.f32 %v9943_v16, %v9791_v46 }
 0x7c0   : > { %v5176_v40 = vpop.permute.xlu0 %5175 }
 0x7c1   : > { %v5326_v14 = vmul.f32 0.5, %v5294_v30  ;;  %v5293_v62 = vmul.f32 %v5261_v43, %v5261_v43  ;;  %v5264_v31 = vsub.f32 %v4944_v21, %v5176_v40  ;;  %v4948_v30 = vadd.f32 %v9943_v16, %v9817_v1 }
 0x7c2   : > { %v5174_v18 = vpop.permute.xlu1 %5173 }
 0x7c3   : > { %v5325_v5 = vmul.f32 0.5, %v5293_v62  ;;  %v5296_v7 = vmul.f32 %v5264_v31, %v5264_v31  ;;  %v5263_v32 = vsub.f32 %v4943_v37, %v5174_v18  ;;  %5428 = vrot.lane.b32.xlu0 %v5326_v14, %s7032_s21  ;;  %v4947_v31 = vadd.f32 %v9943_v16, %v9815_v34 }
 0x7c4   : > { %v5180_v24 = vpop.permute.xlu0 %5179  ;;  %v4950_v62 = vadd.f32 %v9943_v16, %v9847_v57 }
 0x7c5   : > { %v5328_v55 = vmul.f32 0.5, %v5296_v7  ;;  %v5295_v60 = vmul.f32 %v5263_v32, %v5263_v32  ;;  %v5266_v10 = vsub.f32 %v4946_v25, %v5180_v24  ;;  %5426 = vrot.lane.b32.xlu1 %v5325_v5, %s7032_s21  ;;  %v4949_v32 = vadd.f32 %v9943_v16, %v9845_v58 }
 0x7c6   : > { %v5178_v0 = vpop.permute.xlu1 %5177 }
 0x7c7   : > { %v5327_v21 = vmul.f32 0.5, %v5295_v60  ;;  %v5298_v22 = vmul.f32 %v5266_v10, %v5266_v10  ;;  %v5265_v43 = vsub.f32 %v4945_v42, %v5178_v0  ;;  %5432 = vrot.lane.b32.xlu0 %v5328_v55, %s7032_s21  ;;  %v4952_v60 = vadd.f32 %v9943_v16, %v9887_v63 }
 0x7c8   : > { %v5184_v18 = vpop.permute.xlu0 %5183 }
 0x7c9   : > { %v5330_v40 = vmul.f32 0.5, %v5298_v22  ;;  %v5297_v46 = vmul.f32 %v5265_v43, %v5265_v43  ;;  %v5268_v37 = vsub.f32 %v4948_v30, %v5184_v18  ;;  %5430 = vrot.lane.b32.xlu1 %v5327_v21, %s7032_s21  ;;  %v4951_v21 = vadd.f32 %v9943_v16, %v9885_v49 }
 0x7ca   : > { %v5182_v14 = vpop.permute.xlu1 %5181  ;;  %v4953_v49 = vadd.f32 %v9943_v16, %v9970_v23 }
 0x7cb   : > { %v5329_v25 = vmul.f32 0.5, %v5297_v46  ;;  %v5300_v1 = vmul.f32 %v5268_v37, %v5268_v37  ;;  %v5267_v5 = vsub.f32 %v4947_v31, %v5182_v14  ;;  %5436 = vrot.lane.b32.xlu0 %v5330_v40, %s7032_s21  ;;  %v4954_v31 = vadd.f32 %v9943_v16, %v9931_v4 }
 0x7cc   : > { %v5188_v7 = vpop.permute.xlu0 %5187  ;;  %v4956_v4 = vadd.f32 %v9943_v16, %v9980_v50 }
 0x7cd   : > { %v5332_v24 = vmul.f32 0.5, %v5300_v1  ;;  %v5299_v34 = vmul.f32 %v5267_v5, %v5267_v5  ;;  %v5270_v42 = vsub.f32 %v4950_v62, %v5188_v7  ;;  %5434 = vrot.lane.b32.xlu1 %v5329_v25, %s7032_s21 }
 0x7ce   : > { %v5186_v55 = vpop.permute.xlu1 %5185 }
 0x7cf   : > { %v5331_v10 = vmul.f32 0.5, %v5299_v34  ;;  %v5302_v57 = vmul.f32 %v5270_v42, %v5270_v42  ;;  %v5269_v0 = vsub.f32 %v4949_v32, %v5186_v55  ;;  %5440 = vrot.lane.b32.xlu0 %v5332_v24, %s7032_s21  ;;  %v4955_v55 = vadd.f32 %v9943_v16, %v9972_v35 }
 0x7d0   : > { %v5192_v30 = vpop.permute.xlu0 %5191 }
 0x7d1   : > { %v5334_v22 = vmul.f32 0.5, %v5302_v57  ;;  %v5301_v58 = vmul.f32 %v5269_v0, %v5269_v0  ;;  %v5272_v43 = vsub.f32 %v4952_v60, %v5192_v30  ;;  %5438 = vrot.lane.b32.xlu1 %v5331_v10, %s7032_s21  ;;  %v4958_v0 = vadd.f32 %v9943_v16, %v9984_v33 }
 0x7d2   : > { %v5190_v18 = vpop.permute.xlu1 %5189 }
 0x7d3   : > { %v5333_v40 = vmul.f32 0.5, %v5301_v58  ;;  %v5304_v63 = vmul.f32 %v5272_v43, %v5272_v43  ;;  %v5271_v46 = vsub.f32 %v4951_v21, %v5190_v18  ;;  %v10041_v37 = vpop.f32.mrb[124].mxu1  ;;  %5444 = vrot.lane.b32.xlu0 %v5334_v22, %s7032_s21  ;;  %v4957_v58 = vadd.f32 %v9943_v16, %v9978_v20 }
 0x7d4   : > { %v10044_v14 = vpop.f32.mrb[125].mxu1  ;;  %v5196_v62 = vpop.permute.xlu0 %5195 }
 0x7d5   : > { %v5336_v25 = vmul.f32 0.5, %v5304_v63  ;;  %v5303_v1 = vmul.f32 %v5271_v46, %v5271_v46  ;;  %v5274_v5 = vsub.f32 %v4954_v31, %v5196_v62  ;;  %5442 = vrot.lane.b32.xlu1 %v5333_v40, %s7032_s21  ;;  %v4960_v40 = vadd.f32 %v9943_v16, %v9988_v2 }
 0x7d6   : > { %v5194_v7 = vpop.permute.xlu1 %5193 }
 0x7d7   : > { %v5335_v32 = vmul.f32 0.5, %v5303_v1  ;;  %v5306_v24 = vmul.f32 %v5274_v5, %v5274_v5  ;;  %v5273_v34 = vsub.f32 %v4953_v49, %v5194_v7  ;;  %5448 = vrot.lane.b32.xlu0 %v5336_v25, %s7032_s21  ;;  %v4959_v49 = vadd.f32 %v9943_v16, %v9982_v3 }
 0x7d8   : > { %v5200_v42 = vpop.permute.xlu0 %5199  ;;  %v4962_v7 = vadd.f32 %v9943_v16, %v9992_v12 }
 0x7d9   : > { %v5338_v60 = vmul.f32 0.5, %v5306_v24  ;;  %v5305_v23 = vmul.f32 %v5273_v34, %v5273_v34  ;;  %v5276_v10 = vsub.f32 %v4956_v4, %v5200_v42  ;;  %5446 = vrot.lane.b32.xlu1 %v5335_v32, %s7032_s21  ;;  %v4961_v34 = vadd.f32 %v9943_v16, %v9986_v44 }
 0x7da   : > { %v5198_v57 = vpop.permute.xlu1 %5197 }
 0x7db   : > { %v5337_v30 = vmul.f32 0.5, %v5305_v23  ;;  %v5308_v50 = vmul.f32 %v5276_v10, %v5276_v10  ;;  %v5275_v21 = vsub.f32 %v4955_v55, %v5198_v57  ;;  %5452 = vrot.lane.b32.xlu0 %v5338_v60, %s7032_s21  ;;  %v4964_v23 = vadd.f32 %v9943_v16, %v9996_v52 }
 0x7dc   : > { %v5204_v22 = vpop.permute.xlu0 %5203 }
 0x7dd   : > { %v5340_v43 = vmul.f32 0.5, %v5308_v50  ;;  %v5307_v35 = vmul.f32 %v5275_v21, %v5275_v21  ;;  %v5278_v18 = vsub.f32 %v4958_v0, %v5204_v22  ;;  %5450 = vrot.lane.b32.xlu1 %v5337_v30, %s7032_s21  ;;  %v4963_v30 = vadd.f32 %v9943_v16, %v9990_v41 }
 0x7de   : > { %v5202_v31 = vpop.permute.xlu1 %5201 }
 0x7df   : > { %v5339_v63 = vmul.f32 0.5, %v5307_v35  ;;  %v5310_v33 = vmul.f32 %v5278_v18, %v5278_v18  ;;  %v5277_v46 = vsub.f32 %v4957_v58, %v5202_v31  ;;  %5456 = vrot.lane.b32.xlu0 %v5340_v43, %s7032_s21  ;;  %v4966_v58 = vadd.f32 %v9943_v16, %v10000_v8 }
 0x7e0   : > { %v5208_v62 = vpop.permute.xlu0 %5207  ;;  %v4965_v31 = vadd.f32 %v9943_v16, %v9994_v9 }
 0x7e1   : > { %v5342_v25 = vmul.f32 0.5, %v5310_v33  ;;  %v5309_v20 = vmul.f32 %v5277_v46, %v5277_v46  ;;  %v5280_v1 = vsub.f32 %v4960_v40, %v5208_v62  ;;  %5454 = vrot.lane.b32.xlu1 %v5339_v63, %s7032_s21  ;;  %v4968_v46 = vadd.f32 %v9943_v16, %v10004_v13 }
 0x7e2   : > { %v5206_v5 = vpop.permute.xlu1 %5205 }
 0x7e3   : > { %v5341_v4 = vmul.f32 0.5, %v5309_v20  ;;  %v5312_v2 = vmul.f32 %v5280_v1, %v5280_v1  ;;  %v5279_v32 = vsub.f32 %v4959_v49, %v5206_v5  ;;  %5460 = vrot.lane.b32.xlu0 %v5342_v25, %s7032_s21  ;;  %v4967_v20 = vadd.f32 %v9943_v16, %v9998_v56  ;;  %v10098_v16 = vld [vmem:[%s10336_s11] ss:$0 sm:$0xff] }
 0x7e4   : > { %v5212_v24 = vpop.permute.xlu0 %5211 }
 0x7e5   : > { %v5344_v42 = vmul.f32 0.5, %v5312_v2  ;;  %v5311_v3 = vmul.f32 %v5279_v32, %v5279_v32  ;;  %v5282_v55 = vsub.f32 %v4962_v7, %v5212_v24  ;;  %5458 = vrot.lane.b32.xlu1 %v5341_v4, %s7032_s21 }
 0x7e6   : > { %v5210_v60 = vpop.permute.xlu1 %5209 }
 0x7e7   : > { %v5343_v10 = vmul.f32 0.5, %v5311_v3  ;;  %v5314_v12 = vmul.f32 %v5282_v55, %v5282_v55  ;;  %v5281_v57 = vsub.f32 %v4961_v34, %v5210_v60  ;;  %5464 = vrot.lane.b32.xlu0 %v5344_v42, %s7032_s21  ;;  %v4512_v3 = vadd.f32 %v9564_v11, %v10098_v16 }
 0x7e8   : > { %v5216_v0 = vpop.permute.xlu0 %5215  ;;  %v4507_v60 = vadd.f32 %v10098_v16, %v9566_v36  ;;  %v4532_v11 = vadd.f32 %v9616_v51, %v10098_v16  ;;  %v4527_v36 = vadd.f32 %v10098_v16, %v9618_v27  ;;  %v4552_v51 = vadd.f32 %v9671_v45, %v10098_v16 }
 0x7e9   : > { %v5346_v50 = vmul.f32 0.5, %v5314_v12  ;;  %v5313_v44 = vmul.f32 %v5281_v57, %v5281_v57  ;;  %v5284_v21 = vsub.f32 %v4964_v23, %v5216_v0  ;;  %5462 = vrot.lane.b32.xlu1 %v5343_v10, %s7032_s21  ;;  %v4522_v23 = vadd.f32 %v9590_v54, %v10098_v16  ;;  %v10723_v0 = vld [vmem:[#allocation14_spill] sm:$0xff] }
 0x7ea   : > { %v5214_v22 = vpop.permute.xlu1 %5213  ;;  %v4517_v10 = vadd.f32 %v10098_v16, %v9592_v53  ;;  %v4542_v54 = vadd.f32 %v9645_v6, %v10098_v16  ;;  %v4537_v53 = vadd.f32 %v10098_v16, %v9647_v15  ;;  %v4547_v27 = vadd.f32 %v10098_v16, %v9675_v48 }
 0x7eb   : > { %v5345_v43 = vmul.f32 0.5, %v5313_v44  ;;  %v5316_v52 = vmul.f32 %v5284_v21, %v5284_v21  ;;  %v5283_v35 = vsub.f32 %v4963_v30, %v5214_v22  ;;  %5468 = vrot.lane.b32.xlu0 %v5346_v50, %s7032_s21  ;;  %v4562_v6 = vadd.f32 %v9703_v26, %v10098_v16  ;;  %v10724_v30 = vld [vmem:[#allocation13_spill] sm:$0xff]  ;;  %v10725_v50 = vld [vmem:[#allocation16_spill] sm:$0xff]  ;;  %v10726_v44 = vld [vmem:[#allocation15_spill] sm:$0xff] }
 0x7ec   : > { %v5220_v18 = vpop.permute.xlu0 %5219  ;;  %v4557_v15 = vadd.f32 %v10098_v16, %v9705_v38  ;;  %v4572_v45 = vadd.f32 %v9730_v29, %v10098_v16  ;;  %v4567_v48 = vadd.f32 %v10098_v16, %v9733_v47  ;;  %v4582_v26 = vadd.f32 %v9762_v17, %v10098_v16  ;;  %v10727_v21 = vld [vmem:[#allocation19_spill] sm:$0xff] }
 0x7ed   : > { %v5348_v40 = vmul.f32 0.5, %v5316_v52  ;;  %v5315_v41 = vmul.f32 %v5283_v35, %v5283_v35  ;;  %v5286_v63 = vsub.f32 %v4966_v58, %v5220_v18  ;;  %5466 = vrot.lane.b32.xlu1 %v5345_v43, %s7032_s21  ;;  %v4577_v38 = vadd.f32 %v10098_v16, %v9764_v39  ;;  %v10728_v58 = vld [vmem:[#allocation18_spill] sm:$0xff]  ;;  %v10730_v18 = vld [vmem:[#allocation21_spill] sm:$0xff] }
 0x7ee   : > { %v5218_v33 = vpop.permute.xlu1 %5217  ;;  %v4592_v29 = vadd.f32 %v9786_v59, %v10098_v16  ;;  %v4587_v47 = vadd.f32 %v10098_v16, %v9789_v28  ;;  %v4602_v17 = vadd.f32 %v9811_v61, %v10098_v16  ;;  %v4597_v39 = vadd.f32 %v10098_v16, %v9813_v19  ;;  %v10729_v52 = vld [vmem:[#allocation22_spill] sm:$0xff] }
 0x7ef   : > { %v5347_v62 = vmul.f32 0.5, %v5315_v41  ;;  %v5318_v8 = vmul.f32 %v5286_v63, %v5286_v63  ;;  %v5285_v49 = vsub.f32 %v4965_v31, %v5218_v33  ;;  %5472 = vrot.lane.b32.xlu0 %v5348_v40, %s7032_s21  ;;  %v4612_v59 = vadd.f32 %v10723_v0, %v10098_v16 }
 0x7f0   : > { %v5224_v25 = vpop.permute.xlu0 %5223  ;;  %v4607_v28 = vadd.f32 %v10098_v16, %v10724_v30  ;;  %v4622_v61 = vadd.f32 %v10725_v50, %v10098_v16  ;;  %v4617_v19 = vadd.f32 %v10098_v16, %v10726_v44  ;;  %v4632_v22 = vadd.f32 %v10727_v21, %v10098_v16 }
 0x7f1   : > { %v5350_v9 = vmul.f32 0.5, %v5318_v8  ;;  %v5317_v1 = vmul.f32 %v5285_v49, %v5285_v49  ;;  %v5288_v5 = vsub.f32 %v4968_v46, %v5224_v25  ;;  %5470 = vrot.lane.b32.xlu1 %v5347_v62, %s7032_s21  ;;  %v4627_v43 = vadd.f32 %v10098_v16, %v10728_v58 }
 0x7f2   : > { %v5222_v7 = vpop.permute.xlu1 %5221  ;;  %v4642_v35 = vadd.f32 %v10729_v52, %v10098_v16  ;;  %v4637_v31 = vadd.f32 %v10098_v16, %v10730_v18  ;;  %v4652_v40 = vadd.f32 %v10041_v37, %v10098_v16  ;;  %v4647_v63 = vadd.f32 %v10098_v16, %v10044_v14 }
 0x7f3   : > { %v5349_v4 = vmul.f32 0.5, %v5317_v1  ;;  %v5320_v13 = vmul.f32 %v5288_v5, %v5288_v5  ;;  %v5287_v2 = vsub.f32 %v4967_v20, %v5222_v7  ;;  %5476 = vrot.lane.b32.xlu0 %v5350_v9, %s7032_s21 }
 0x7f4   : > { %v5421_v32 = vpop.permute.xlu0 %5420 }
 0x7f5   : > { %v5352_v24 = vmul.f32 0.5, %v5320_v13  ;;  %v5319_v34 = vmul.f32 %v5287_v2, %v5287_v2  ;;  %5516 = vst.msk [vmem:[%s9473_s29 + $0x8] sm:$0xff] %vm5514_vm0, %v5421_v32  ;;  %5474 = vrot.lane.b32.xlu1 %v5349_v4, %s7032_s21 }
 0x7f6   : > { %v5419_v56 = vpop.permute.xlu1 %5418 }
 0x7f7   : > { %v5351_v42 = vmul.f32 0.5, %v5319_v34  ;;  %5515 = vst.msk [vmem:[%s9473_s29] sm:$0xff] %vm5514_vm0, %v5419_v56  ;;  %5480 = vrot.lane.b32.xlu0 %v5352_v24, %s7032_s21 }
 0x7f9   : > { %5478 = vrot.lane.b32.xlu1 %v5351_v42, %s7032_s21 }
 0x7fa   : > { %v5423_v55 = vpop.permute.xlu1 %5422 }
 0x7fb   : > { %5517 = vst.msk [vmem:[%s9473_s29 + $0x10] sm:$0xff] %vm5514_vm0, %v5423_v55  ;;  %5581 = vrot.lane.b32.xlu0 %v4512_v3, %s7033_s16 }
 0x7fd   : > { %5579 = vrot.lane.b32.xlu1 %v4507_v60, %s7033_s16 }
 0x7ff   : > { %5585 = vrot.lane.b32.xlu0 %v4522_v23, %s7033_s16 }
 0x801   : > { %5583 = vrot.lane.b32.xlu1 %v4517_v10, %s7033_s16 }
 0x803   : > { %5589 = vrot.lane.b32.xlu0 %v4532_v11, %s7033_s16 }
 0x805   : > { %5587 = vrot.lane.b32.xlu1 %v4527_v36, %s7033_s16 }
 0x807   : > { %5593 = vrot.lane.b32.xlu0 %v4542_v54, %s7033_s16 }
 0x808   : > { %v6876_v12 = vpop.f32.mrb[126].mxu1 }
 0x809   : > { %v4656_v57 = vpop.f32.mrb[127].mxu1  ;;  %5591 = vrot.lane.b32.xlu1 %v4537_v53, %s7033_s16  ;;  %v4662_v33 = vadd.f32 %v6876_v12, %v10098_v16 }
 0x80a   : > { %v4657_v37 = vadd.f32 %v10098_v16, %v4656_v57 }
 0x80b   : > { %5597 = vrot.lane.b32.xlu0 %v4552_v51, %s7033_s16 }
 0x80d   : > { %5595 = vrot.lane.b32.xlu1 %v4547_v27, %s7033_s16 }
 0x80f   : > { %5601 = vrot.lane.b32.xlu0 %v4562_v6, %s7033_s16 }
 0x811   : > { %5599 = vrot.lane.b32.xlu1 %v4557_v15, %s7033_s16 }
 0x813   : > { %5605 = vrot.lane.b32.xlu0 %v4572_v45, %s7033_s16 }
 0x815   : > { %5603 = vrot.lane.b32.xlu1 %v4567_v48, %s7033_s16 }
 0x817   : > { %5609 = vrot.lane.b32.xlu0 %v4582_v26, %s7033_s16 }
 0x819   : > { %5607 = vrot.lane.b32.xlu1 %v4577_v38, %s7033_s16 }
 0x81b   : > { %5613 = vrot.lane.b32.xlu0 %v4592_v29, %s7033_s16 }
 0x81d   : > { %5611 = vrot.lane.b32.xlu1 %v4587_v47, %s7033_s16 }
 0x81f   : > { %5617 = vrot.lane.b32.xlu0 %v4602_v17, %s7033_s16 }
 0x821   : > { %5615 = vrot.lane.b32.xlu1 %v4597_v39, %s7033_s16 }
 0x823   : > { %5621 = vrot.lane.b32.xlu0 %v4612_v59, %s7033_s16 }
 0x825   : > { %5619 = vrot.lane.b32.xlu1 %v4607_v28, %s7033_s16 }
 0x827   : > { %5625 = vrot.lane.b32.xlu0 %v4622_v61, %s7033_s16 }
 0x829   : > { %5623 = vrot.lane.b32.xlu1 %v4617_v19, %s7033_s16 }
 0x82b   : > { %5629 = vrot.lane.b32.xlu0 %v4632_v22, %s7033_s16 }
 0x82d   : > { %5627 = vrot.lane.b32.xlu1 %v4627_v43, %s7033_s16 }
 0x82f   : > { %5633 = vrot.lane.b32.xlu0 %v4642_v35, %s7033_s16 }
 0x831   : > { %5631 = vrot.lane.b32.xlu1 %v4637_v31, %s7033_s16  ;;  %v5425_v41 = vpop.permute.xlu0 %5424 }
 0x832   : > { %5518 = vst.msk [vmem:[%s9473_s29 + $0x18] sm:$0xff] %vm5514_vm0, %v5425_v41 }
 0x833   : > { %5637 = vrot.lane.b32.xlu0 %v4652_v40, %s7033_s16 }
 0x835   : > { %5635 = vrot.lane.b32.xlu1 %v4647_v63, %s7033_s16  ;;  %v5429_v46 = vpop.permute.xlu0 %5428 }
 0x836   : > { %5520 = vst.msk [vmem:[%s9473_s29 + $0x28] sm:$0xff] %vm5514_vm0, %v5429_v46 }
 0x837   : > { %v5427_v62 = vpop.permute.xlu1 %5426  ;;  %5641 = vrot.lane.b32.xlu0 %v4662_v33, %s7033_s16 }
 0x838   : > { %5519 = vst.msk [vmem:[%s9473_s29 + $0x20] sm:$0xff] %vm5514_vm0, %v5427_v62 }
 0x839   : > { %5639 = vrot.lane.b32.xlu1 %v4657_v37, %s7033_s16  ;;  %v5433_v14 = vpop.permute.xlu0 %5432 }
 0x83a   : > { %5522 = vst.msk [vmem:[%s9473_s29 + $0x38] sm:$0xff] %vm5514_vm0, %v5433_v14 }
 0x83b   : > { %v5431_v8 = vpop.permute.xlu1 %5430 }
 0x83c   : > { %5521 = vst.msk [vmem:[%s9473_s29 + $0x30] sm:$0xff] %vm5514_vm0, %v5431_v8 }
 0x83d   : > { %v5437_v49 = vpop.permute.xlu0 %5436 }
 0x83e   : > { %5524 = vst.msk [vmem:[%s9473_s29 + $0x48] sm:$0xff] %vm5514_vm0, %v5437_v49 }
 0x83f   : > { %v5435_v25 = vpop.permute.xlu1 %5434 }
 0x840   : > { %5523 = vst.msk [vmem:[%s9473_s29 + $0x40] sm:$0xff] %vm5514_vm0, %v5435_v25 }
 0x841   : > { %v5441_v20 = vpop.permute.xlu0 %5440 }
 0x842   : > { %5526 = vst.msk [vmem:[%s9473_s29 + $0x58] sm:$0xff] %vm5514_vm0, %v5441_v20 }
 0x843   : > { %v5439_v9 = vpop.permute.xlu1 %5438 }
 0x844   : > { %5525 = vst.msk [vmem:[%s9473_s29 + $0x50] sm:$0xff] %vm5514_vm0, %v5439_v9 }
 0x845   : > { %v5445_v1 = vpop.permute.xlu0 %5444 }
 0x846   : > { %5528 = vst.msk [vmem:[%s9473_s29 + $0x68] sm:$0xff] %vm5514_vm0, %v5445_v1 }
 0x847   : > { %v5443_v5 = vpop.permute.xlu1 %5442 }
 0x848   : > { %5527 = vst.msk [vmem:[%s9473_s29 + $0x60] sm:$0xff] %vm5514_vm0, %v5443_v5 }
 0x849   : > { %v5449_v7 = vpop.permute.xlu0 %5448 }
 0x84a   : > { %5530 = vst.msk [vmem:[%s9473_s29 + $0x78] sm:$0xff] %vm5514_vm0, %v5449_v7 }
 0x84b   : > { %v5447_v4 = vpop.permute.xlu1 %5446 }
 0x84c   : > { %5529 = vst.msk [vmem:[%s9473_s29 + $0x70] sm:$0xff] %vm5514_vm0, %v5447_v4 }
 0x84d   : > { %v5453_v13 = vpop.permute.xlu0 %5452 }
 0x84e   : > { %5532 = vst.msk [vmem:[%s9473_s29 + $0x88] sm:$0xff] %vm5514_vm0, %v5453_v13 }
 0x84f   : > { %v5451_v2 = vpop.permute.xlu1 %5450 }
 0x850   : > { %5531 = vst.msk [vmem:[%s9473_s29 + $0x80] sm:$0xff] %vm5514_vm0, %v5451_v2 }
 0x851   : > { %v5457_v32 = vpop.permute.xlu0 %5456 }
 0x852   : > { %5534 = vst.msk [vmem:[%s9473_s29 + $0x98] sm:$0xff] %vm5514_vm0, %v5457_v32 }
 0x853   : > { %v5455_v24 = vpop.permute.xlu1 %5454 }
 0x854   : > { %5533 = vst.msk [vmem:[%s9473_s29 + $0x90] sm:$0xff] %vm5514_vm0, %v5455_v24 }
 0x855   : > { %v5461_v34 = vpop.permute.xlu0 %5460 }
 0x856   : > { %5536 = vst.msk [vmem:[%s9473_s29 + $0xa8] sm:$0xff] %vm5514_vm0, %v5461_v34 }
 0x857   : > { %v5459_v16 = vpop.permute.xlu1 %5458 }
 0x858   : > { %5535 = vst.msk [vmem:[%s9473_s29 + $0xa0] sm:$0xff] %vm5514_vm0, %v5459_v16 }
 0x859   : > { %v5465_v56 = vpop.permute.xlu0 %5464 }
 0x85a   : > { %5538 = vst.msk [vmem:[%s9473_s29 + $0xb8] sm:$0xff] %vm5514_vm0, %v5465_v56 }
 0x85b   : > { %v5463_v42 = vpop.permute.xlu1 %5462 }
 0x85c   : > { %5537 = vst.msk [vmem:[%s9473_s29 + $0xb0] sm:$0xff] %vm5514_vm0, %v5463_v42 }
 0x85d   : > { %v5469_v3 = vpop.permute.xlu0 %5468 }
 0x85e   : > { %5540 = vst.msk [vmem:[%s9473_s29 + $0xc8] sm:$0xff] %vm5514_vm0, %v5469_v3 }
 0x85f   : > { %v5467_v55 = vpop.permute.xlu1 %5466 }
 0x860   : > { %5539 = vst.msk [vmem:[%s9473_s29 + $0xc0] sm:$0xff] %vm5514_vm0, %v5467_v55 }
 0x861   : > { %v5473_v60 = vpop.permute.xlu0 %5472 }
 0x862   : > { %5542 = vst.msk [vmem:[%s9473_s29 + $0xd8] sm:$0xff] %vm5514_vm0, %v5473_v60 }
 0x863   : > { %v5471_v23 = vpop.permute.xlu1 %5470 }
 0x864   : > { %5541 = vst.msk [vmem:[%s9473_s29 + $0xd0] sm:$0xff] %vm5514_vm0, %v5471_v23 }
 0x865   : > { %v5477_v10 = vpop.permute.xlu0 %5476 }
 0x866   : > { %5544 = vst.msk [vmem:[%s9473_s29 + $0xe8] sm:$0xff] %vm5514_vm0, %v5477_v10 }
 0x867   : > { %v5475_v11 = vpop.permute.xlu1 %5474 }
 0x868   : > { %5543 = vst.msk [vmem:[%s9473_s29 + $0xe0] sm:$0xff] %vm5514_vm0, %v5475_v11 }
 0x869   : > { %v5481_v36 = vpop.permute.xlu0 %5480 }
 0x86a   : > { %5546 = vst.msk [vmem:[%s9473_s29 + $0xf8] sm:$0xff] %vm5514_vm0, %v5481_v36 }
 0x86b   : > { %v5479_v54 = vpop.permute.xlu1 %5478 }
 0x86c   : > { %5545 = vst.msk [vmem:[%s9473_s29 + $0xf0] sm:$0xff] %vm5514_vm0, %v5479_v54 }
 0x86d   : > { %v5582_v53 = vpop.permute.xlu0 %5581 }
 0x86e   : > { %5677 = vst.msk [vmem:[%s9473_s29 + $0x8] sm:$0xff] %vm5675_vm4, %v5582_v53 }
 0x86f   : > { %v5580_v12 = vpop.permute.xlu1 %5579 }
 0x870   : > { %5676 = vst.msk [vmem:[%s9473_s29] sm:$0xff] %vm5675_vm4, %v5580_v12 }
 0x871   : > { %v5586_v51 = vpop.permute.xlu0 %5585 }
 0x872   : > { %5679 = vst.msk [vmem:[%s9473_s29 + $0x18] sm:$0xff] %vm5675_vm4, %v5586_v51 }
 0x873   : > { %v5584_v57 = vpop.permute.xlu1 %5583 }
 0x874   : > { %5678 = vst.msk [vmem:[%s9473_s29 + $0x10] sm:$0xff] %vm5675_vm4, %v5584_v57 }
 0x875   : > { %v5590_v27 = vpop.permute.xlu0 %5589 }
 0x876   : > { %5681 = vst.msk [vmem:[%s9473_s29 + $0x28] sm:$0xff] %vm5675_vm4, %v5590_v27 }
 0x877   : > { %v5588_v6 = vpop.permute.xlu1 %5587 }
 0x878   : > { %5680 = vst.msk [vmem:[%s9473_s29 + $0x20] sm:$0xff] %vm5675_vm4, %v5588_v6 }
 0x879   : > { %v5594_v15 = vpop.permute.xlu0 %5593 }
 0x87a   : > { %5683 = vst.msk [vmem:[%s9473_s29 + $0x38] sm:$0xff] %vm5675_vm4, %v5594_v15 }
 0x87b   : > { %v5592_v45 = vpop.permute.xlu1 %5591 }
 0x87c   : > { %5682 = vst.msk [vmem:[%s9473_s29 + $0x30] sm:$0xff] %vm5675_vm4, %v5592_v45 }
 0x87d   : > { %v5598_v48 = vpop.permute.xlu0 %5597 }
 0x87e   : > { %5685 = vst.msk [vmem:[%s9473_s29 + $0x48] sm:$0xff] %vm5675_vm4, %v5598_v48 }
 0x87f   : > { %v5596_v26 = vpop.permute.xlu1 %5595 }
 0x880   : > { %5684 = vst.msk [vmem:[%s9473_s29 + $0x40] sm:$0xff] %vm5675_vm4, %v5596_v26 }
 0x881   : > { %v5602_v38 = vpop.permute.xlu0 %5601 }
 0x882   : > { %5687 = vst.msk [vmem:[%s9473_s29 + $0x58] sm:$0xff] %vm5675_vm4, %v5602_v38 }
 0x883   : > { %v5600_v29 = vpop.permute.xlu1 %5599 }
 0x884   : > { %5686 = vst.msk [vmem:[%s9473_s29 + $0x50] sm:$0xff] %vm5675_vm4, %v5600_v29 }
 0x885   : > { %v5606_v47 = vpop.permute.xlu0 %5605 }
 0x886   : > { %5689 = vst.msk [vmem:[%s9473_s29 + $0x68] sm:$0xff] %vm5675_vm4, %v5606_v47 }
 0x887   : > { %v5604_v17 = vpop.permute.xlu1 %5603 }
 0x888   : > { %5688 = vst.msk [vmem:[%s9473_s29 + $0x60] sm:$0xff] %vm5675_vm4, %v5604_v17 }
 0x889   : > { %v5610_v39 = vpop.permute.xlu0 %5609 }
 0x88a   : > { %5691 = vst.msk [vmem:[%s9473_s29 + $0x78] sm:$0xff] %vm5675_vm4, %v5610_v39 }
 0x88b   : > { %v5608_v0 = vpop.permute.xlu1 %5607 }
 0x88c   : > { %5690 = vst.msk [vmem:[%s9473_s29 + $0x70] sm:$0xff] %vm5675_vm4, %v5608_v0 }
 0x88d   : > { %v5614_v59 = vpop.permute.xlu0 %5613 }
 0x88e   : > { %5693 = vst.msk [vmem:[%s9473_s29 + $0x88] sm:$0xff] %vm5675_vm4, %v5614_v59 }
 0x88f   : > { %v5612_v30 = vpop.permute.xlu1 %5611 }
 0x890   : > { %5692 = vst.msk [vmem:[%s9473_s29 + $0x80] sm:$0xff] %vm5675_vm4, %v5612_v30 }
 0x891   : > { %v5618_v28 = vpop.permute.xlu0 %5617 }
 0x892   : > { %5695 = vst.msk [vmem:[%s9473_s29 + $0x98] sm:$0xff] %vm5675_vm4, %v5618_v28 }
 0x893   : > { %v5616_v50 = vpop.permute.xlu1 %5615 }
 0x894   : > { %5694 = vst.msk [vmem:[%s9473_s29 + $0x90] sm:$0xff] %vm5675_vm4, %v5616_v50 }
 0x895   : > { %v5622_v61 = vpop.permute.xlu0 %5621 }
 0x896   : > { %5697 = vst.msk [vmem:[%s9473_s29 + $0xa8] sm:$0xff] %vm5675_vm4, %v5622_v61 }
 0x897   : > { %v5620_v44 = vpop.permute.xlu1 %5619 }
 0x898   : > { %5696 = vst.msk [vmem:[%s9473_s29 + $0xa0] sm:$0xff] %vm5675_vm4, %v5620_v44 }
 0x899   : > { %v5626_v19 = vpop.permute.xlu0 %5625 }
 0x89a   : > { %5699 = vst.msk [vmem:[%s9473_s29 + $0xb8] sm:$0xff] %vm5675_vm4, %v5626_v19 }
 0x89b   : > { %v5624_v21 = vpop.permute.xlu1 %5623 }
 0x89c   : > { %5698 = vst.msk [vmem:[%s9473_s29 + $0xb0] sm:$0xff] %vm5675_vm4, %v5624_v21 }
 0x89d   : > { %v5630_v22 = vpop.permute.xlu0 %5629 }
 0x89e   : > { %5701 = vst.msk [vmem:[%s9473_s29 + $0xc8] sm:$0xff] %vm5675_vm4, %v5630_v22 }
 0x89f   : > { %v5628_v58 = vpop.permute.xlu1 %5627 }
 0x8a0   : > { %5700 = vst.msk [vmem:[%s9473_s29 + $0xc0] sm:$0xff] %vm5675_vm4, %v5628_v58 }
 0x8a1   : > { %v5634_v43 = vpop.permute.xlu0 %5633 }
 0x8a2   : > { %5703 = vst.msk [vmem:[%s9473_s29 + $0xd8] sm:$0xff] %vm5675_vm4, %v5634_v43 }
 0x8a3   : > { %v5632_v52 = vpop.permute.xlu1 %5631 }
 0x8a4   : > { %5702 = vst.msk [vmem:[%s9473_s29 + $0xd0] sm:$0xff] %vm5675_vm4, %v5632_v52 }
 0x8a5   : > { %v5638_v35 = vpop.permute.xlu0 %5637 }
 0x8a6   : > { %5705 = vst.msk [vmem:[%s9473_s29 + $0xe8] sm:$0xff] %vm5675_vm4, %v5638_v35 }
 0x8a7   : > { %v5636_v18 = vpop.permute.xlu1 %5635 }
 0x8a8   : > { %5704 = vst.msk [vmem:[%s9473_s29 + $0xe0] sm:$0xff] %vm5675_vm4, %v5636_v18 }
 0x8a9   : > { %v5642_v31 = vpop.permute.xlu0 %5641 }
 0x8aa   : > { %5707 = vst.msk [vmem:[%s9473_s29 + $0xf8] sm:$0xff] %vm5675_vm4, %v5642_v31 }
 0x8ab   : > { %v5640_v40 = vpop.permute.xlu1 %5639 }
 0x8ac   : > { %5706 = vst.msk [vmem:[%s9473_s29 + $0xf0] sm:$0xff] %vm5675_vm4, %v5640_v40 }
 0x8ad PF: > { %s26_s15 = sadd.s32 1, %s7020_s15  }
 0x8ae   : > { %p23_p4 = scmp.ge.s32.totalorder %s26_s15, 4  }
 0x8b0   :  { %25 = sbr.rel (!%p23_p4) target bundleno = 3 (0x3), region = 106 }

</bundles_post_ra>
